<compile_context>
chip_gen: v7x
topology: tpu7x:2x2x1
jax: 0.10.0
libtpu: 0.0.40
codegen_flags: <defaults>
</compile_context>

<pallas_src>
import functools

import jax
import jax.numpy as jnp
import numpy as np
from jax.experimental import pallas as pl
from jax.experimental.pallas import tpu as pltpu


_VMEM_LIMIT_BYTES = 32 * 1024 * 1024  # safe on v5e / v6e / v7x


# --------------------------------------------------------------------------- #
# Kernel 1: 4x4 / stride-2 / pad-1 conv from phase-decomposed input.          #
# --------------------------------------------------------------------------- #
def _make_strided_conv_kernel(kh, kw, stride, Ho, Wo, Cin, Cout, apply_relu):
    taps = [(i, j) for i in range(kh) for j in range(kw)]
    M = Ho * Wo

    def kernel(x_ref, w_ref, b_ref, o_ref):
        # x_ref: (stride*stride, Hph, Wph, Cin)   phase slabs of one image
        # w_ref: (kh*kw, Cin, Cout)   b_ref: (1, Cout)   o_ref: (1, Ho, Wo, Cout)
        acc = jnp.zeros((M, Cout), jnp.float32)
        for t, (i, j) in enumerate(taps):
            ph = (i % stride) * stride + (j % stride)
            r0 = i // stride
            c0 = j // stride
            xt = x_ref[ph, r0:r0 + Ho, c0:c0 + Wo, :].reshape(M, Cin)
            acc = acc + jnp.dot(xt, w_ref[t],
                                preferred_element_type=jnp.float32)
        acc = acc + b_ref[...]
        if apply_relu:
            acc = jnp.maximum(acc, 0.0)
        o_ref[0] = acc.reshape(Ho, Wo, Cout).astype(o_ref.dtype)

    return kernel


def _phase_decompose(x_nhwc, pad, stride):
    """Zero-pad, then split into stride*stride unit-stride phase slabs."""
    x = jnp.pad(x_nhwc, ((0, 0), (pad, pad), (pad, pad), (0, 0)))
    B, Hp, Wp, C = x.shape
    assert Hp % stride == 0 and Wp % stride == 0, "need even padded spatial dims"
    slabs = [x[:, pi::stride, pj::stride, :]
             for pi in range(stride) for pj in range(stride)]
    xph = jnp.stack(slabs, axis=1)                       # (B, s*s, Hph, Wph, C)
    _, S2, Hph, Wph, _ = xph.shape
    return xph.reshape(B * S2, Hph, Wph, C), (Hph, Wph)


def conv2d_s2_pallas(x_nhwc, w_oihw, bias, *, apply_relu):
    """Conv2d(k=4, stride=2, pad=1) + bias (+ ReLU), PyTorch semantics."""
    Cout, Cin, kh, kw = w_oihw.shape
    stride, pad = 2, 1
    B, H, W, _ = x_nhwc.shape
    Ho = (H + 2 * pad - kh) // stride + 1
    Wo = (W + 2 * pad - kw) // stride + 1
    S2 = stride * stride

    xph, (Hph, Wph) = _phase_decompose(x_nhwc, pad, stride)
    w = jnp.transpose(w_oihw, (2, 3, 1, 0)).reshape(kh * kw, Cin, Cout)
    b2 = bias.reshape(1, Cout)

    kernel = _make_strided_conv_kernel(kh, kw, stride, Ho, Wo, Cin, Cout,
                                       apply_relu)
    return pl.pallas_call(
        kernel,
        out_shape=jax.ShapeDtypeStruct((B, Ho, Wo, Cout), x_nhwc.dtype),
        grid=(B,),
        in_specs=[
            pl.BlockSpec((S2, Hph, Wph, Cin), lambda b: (b, 0, 0, 0)),
            pl.BlockSpec((kh * kw, Cin, Cout), lambda b: (0, 0, 0)),
            pl.BlockSpec((1, Cout), lambda b: (0, 0)),
        ],
        out_specs=pl.BlockSpec((1, Ho, Wo, Cout), lambda b: (b, 0, 0, 0)),
        compiler_params=pltpu.CompilerParams(
            dimension_semantics=("parallel",),
            vmem_limit_bytes=_VMEM_LIMIT_BYTES),
    )(xph, w, b2)


# --------------------------------------------------------------------------- #
# Kernel 2: fused [conv3 (3x3/s1/p1, bias) + full ResidualStack + final ReLU]. #
# --------------------------------------------------------------------------- #
def _make_conv3_resstack_kernel(Ho, Wo, C, R, n_res_layers):
    taps = [(i, j) for i in range(3) for j in range(3)]
    M = Ho * Wo

    def conv3x3_from_pad(pad_ref, w_ref, n_out):
        acc = jnp.zeros((M, n_out), jnp.float32)
        for t, (i, j) in enumerate(taps):
            xt = pad_ref[i:i + Ho, j:j + Wo, :].reshape(M, C)
            acc = acc + jnp.dot(xt, w_ref[t],
                                preferred_element_type=jnp.float32)
        return acc

    def kernel(x_ref, w3_ref, b3_ref, w1_ref, w2_ref, o_ref, pad_ref, cur_ref):
        # Zero the halo scratch once; only its interior is rewritten below.
        pad_ref[...] = jnp.zeros_like(pad_ref)

        # conv3: 3x3 / stride 1 / pad 1 with bias, NO activation after it.
        pad_ref[1:Ho + 1, 1:Wo + 1, :] = x_ref[0]
        cur_ref[...] = conv3x3_from_pad(pad_ref, w3_ref, C) + b3_ref[...]

        # ResidualStack: n_res_layers layers sharing ONE weight set
        # (faithful to PyTorch's `[ResidualLayer(...)] * n_res_layers`).
        for _ in range(n_res_layers):
            pad_ref[1:Ho + 1, 1:Wo + 1, :] = (
                jnp.maximum(cur_ref[...], 0.0).reshape(Ho, Wo, C))
            h = jnp.maximum(conv3x3_from_pad(pad_ref, w1_ref, R), 0.0)
            cur_ref[...] = cur_ref[...] + jnp.dot(
                h, w2_ref[...], preferred_element_type=jnp.float32)

        # Trailing F.relu of ResidualStack (also covers n_res_layers == 0).
        o_ref[0] = (jnp.maximum(cur_ref[...], 0.0)
                    .reshape(Ho, Wo, C).astype(o_ref.dtype))

    return kernel


def conv3_resstack_pallas(x_nhwc, w3, b3, w1, w2, n_res_layers):
    B, Ho, Wo, C = x_nhwc.shape
    R = w1.shape[0]                                   # res_hidden_channel
    w3r = jnp.transpose(w3, (2, 3, 1, 0)).reshape(9, C, C)
    w1r = jnp.transpose(w1, (2, 3, 1, 0)).reshape(9, C, R)
    w2r = jnp.transpose(w2, (2, 3, 1, 0)).reshape(R, C)   # 1x1 conv weight
    b3r = b3.reshape(1, C)

    kernel = _make_conv3_resstack_kernel(Ho, Wo, C, R, n_res_layers)
    return pl.pallas_call(
        kernel,
        out_shape=jax.ShapeDtypeStruct((B, Ho, Wo, C), x_nhwc.dtype),
        grid=(B,),
        in_specs=[
            pl.BlockSpec((1, Ho, Wo, C), lambda b: (b, 0, 0, 0)),
            pl.BlockSpec((9, C, C), lambda b: (0, 0, 0)),
            pl.BlockSpec((1, C), lambda b: (0, 0)),
            pl.BlockSpec((9, C, R), lambda b: (0, 0, 0)),
            pl.BlockSpec((R, C), lambda b: (0, 0)),
        ],
        out_specs=pl.BlockSpec((1, Ho, Wo, C), lambda b: (b, 0, 0, 0)),
        scratch_shapes=[
            pltpu.VMEM((Ho + 2, Wo + 2, C), jnp.float32),   # zero-padded halo
            pltpu.VMEM((Ho * Wo, C), jnp.float32),          # running activation
        ],
        compiler_params=pltpu.CompilerParams(
            dimension_semantics=("parallel",),
            vmem_limit_bytes=_VMEM_LIMIT_BYTES),
    )(x_nhwc, w3r, b3r, w1r, w2r)


# ----------------------------- Encoder model ------------------------------- #
def init_encoder_params(key, in_channel, hidden_channel, res_hidden_channel):
    keys = jax.random.split(key, 8)

    def conv_w(k, cout, cin, kh, kw):
        fan_in = cin * kh * kw
        bound = 1.0 / np.sqrt(fan_in)
        return jax.random.uniform(k, (cout, cin, kh, kw), jnp.float32, -bound, bound)

    def conv_b(k, cout, fan_in):
        bound = 1.0 / np.sqrt(fan_in)
        return jax.random.uniform(k, (cout,), jnp.float32, -bound, bound)

    h2 = hidden_channel // 2
    return {
        "c1_w": conv_w(keys[0], h2, in_channel, 4, 4),
        "c1_b": conv_b(keys[1], h2, in_channel * 16),
        "c2_w": conv_w(keys[2], hidden_channel, h2, 4, 4),
        "c2_b": conv_b(keys[3], hidden_channel, h2 * 16),
        "c3_w": conv_w(keys[4], hidden_channel, hidden_channel, 3, 3),
        "c3_b": conv_b(keys[5], hidden_channel, hidden_channel * 9),
        # residual layer weights (shared across all n_res_layers, bias=False)
        "r1_w": conv_w(keys[6], res_hidden_channel, hidden_channel, 3, 3),
        "r2_w": conv_w(keys[7], hidden_channel, res_hidden_channel, 1, 1),
    }


def encoder_forward_pallas(x_nchw, params, n_res_layers):
    B, Cin, H, W = x_nchw.shape
    assert H % 4 == 0 and W % 4 == 0, "spatial dims must be divisible by 4"
    # PyTorch API is NCHW; compute in NHWC (lane = channels).
    x = jnp.transpose(x_nchw, (0, 2, 3, 1))
    x = conv2d_s2_pallas(x, params["c1_w"], params["c1_b"], apply_relu=True)
    x = conv2d_s2_pallas(x, params["c2_w"], params["c2_b"], apply_relu=True)
    x = conv3_resstack_pallas(x, params["c3_w"], params["c3_b"],
                              params["r1_w"], params["r2_w"], n_res_layers)
    return jnp.transpose(x, (0, 3, 1, 2))


# ----------------------- pure-JAX reference (for check) -------------------- #
def encoder_forward_ref(x_nchw, params, n_res_layers):
    def conv(x, w, b, stride, pad):
        out = jax.lax.conv_general_dilated(
            x, w, (stride, stride), [(pad, pad), (pad, pad)],
            dimension_numbers=("NCHW", "OIHW", "NCHW"))
        if b is not None:
            out = out + b[None, :, None, None]
        return out

    relu = lambda t: jnp.maximum(t, 0.0)
    x = relu(conv(x_nchw, params["c1_w"], params["c1_b"], 2, 1))
    x = relu(conv(x, params["c2_w"], params["c2_b"], 2, 1))
    x = conv(x, params["c3_w"], params["c3_b"], 1, 1)
    for _ in range(n_res_layers):
        h = relu(x)
        h = conv(h, params["r1_w"], None, 1, 1)
        h = relu(h)
        h = conv(h, params["r2_w"], None, 1, 0)
        x = x + h
    return relu(x)


if __name__ == "__main__":
    key = jax.random.PRNGKey(0)
    kx, kp = jax.random.split(key)

    B, Cin, H, W = 2, 3, 16, 16
    hidden_channel, n_res_layers, res_hidden_channel = 32, 2, 8

    x = jax.random.normal(kx, (B, Cin, H, W), jnp.float32)
    params = init_encoder_params(kp, Cin, hidden_channel, res_hidden_channel)

    fwd = jax.jit(functools.partial(encoder_forward_pallas,
                                    n_res_layers=n_res_layers))
    out = jax.block_until_ready(fwd(x, params))

    assert out.shape == (B, hidden_channel, H // 4, W // 4), out.shape
    ref = encoder_forward_ref(x, params, n_res_layers)
    np.testing.assert_allclose(np.asarray(out), np.asarray(ref),
                               atol=1e-4, rtol=1e-4)
    print("KERNEL_OK")
</pallas_src>

<mosaic_0001>
module attributes {stable_mosaic.version = 11 : i64} {
  func.func @kernel(%arg0: i32, %arg1: memref<4x9x9x3xf32, #tpu.memory_space<vmem>>, %arg2: memref<16x3x16xf32, #tpu.memory_space<vmem>>, %arg3: memref<1x16xf32, #tpu.memory_space<vmem>>, %arg4: memref<1x8x8x16xf32, #tpu.memory_space<vmem>>) attributes {dimension_semantics = [#tpu.dimension_semantics<parallel>], iteration_bounds = array<i64: 2>, scalar_prefetch = 0 : i64, scratch_operands = 0 : i64, tpu.core_type = #tpu.core_type<tc>, window_params = [{transform_indices = @transform_0, window_bounds = array<i64: 4, 9, 9, 3>}, {pipeline_mode = #tpu.pipeline_mode<synchronous>, transform_indices = @transform_1, window_bounds = array<i64: 16, 3, 16>}, {pipeline_mode = #tpu.pipeline_mode<synchronous>, transform_indices = @transform_2, window_bounds = array<i64: 1, 16>}, {transform_indices = @transform_3, window_bounds = array<i64: 1, 8, 8, 16>}]} {
    %cst = arith.constant 0.000000e+00 : f32
    %0 = vector.broadcast %cst : f32 to vector<64x16xf32>
    %c0 = arith.constant 0 : index
    %c0_0 = arith.constant 0 : index
    %c0_1 = arith.constant 0 : index
    %c0_2 = arith.constant 0 : index
    %1 = vector.load %arg1[%c0, %c0_0, %c0_1, %c0_2] : memref<4x9x9x3xf32, #tpu.memory_space<vmem>>, vector<1x8x8x3xf32>
    %2 = vector.shape_cast %1 : vector<1x8x8x3xf32> to vector<8x8x3xf32>
    %3 = vector.shape_cast %2 : vector<8x8x3xf32> to vector<64x3xf32>
    %c0_3 = arith.constant 0 : index
    %c0_4 = arith.constant 0 : index
    %c0_5 = arith.constant 0 : index
    %4 = vector.load %arg2[%c0_3, %c0_4, %c0_5] : memref<16x3x16xf32, #tpu.memory_space<vmem>>, vector<1x3x16xf32>
    %5 = vector.shape_cast %4 : vector<1x3x16xf32> to vector<3x16xf32>
    %cst_6 = arith.constant dense<0.000000e+00> : vector<64x16xf32>
    %6 = tpu.matmul %3, %5, %cst_6 {dimension_numbers = #tpu.dot_dimension_numbers<[1], [0], [0], [1], [0, 0, 1, 1], [], []>} : vector<64x3xf32>, vector<3x16xf32>, vector<64x16xf32> -> vector<64x16xf32>
    %7 = arith.addf %0, %6 : vector<64x16xf32>
    %c1 = arith.constant 1 : index
    %c0_7 = arith.constant 0 : index
    %c0_8 = arith.constant 0 : index
    %c0_9 = arith.constant 0 : index
    %8 = vector.load %arg1[%c1, %c0_7, %c0_8, %c0_9] : memref<4x9x9x3xf32, #tpu.memory_space<vmem>>, vector<1x8x8x3xf32>
    %9 = vector.shape_cast %8 : vector<1x8x8x3xf32> to vector<8x8x3xf32>
    %10 = vector.shape_cast %9 : vector<8x8x3xf32> to vector<64x3xf32>
    %c1_10 = arith.constant 1 : index
    %c0_11 = arith.constant 0 : index
    %c0_12 = arith.constant 0 : index
    %11 = vector.load %arg2[%c1_10, %c0_11, %c0_12] : memref<16x3x16xf32, #tpu.memory_space<vmem>>, vector<1x3x16xf32>
    %12 = vector.shape_cast %11 : vector<1x3x16xf32> to vector<3x16xf32>
    %cst_13 = arith.constant dense<0.000000e+00> : vector<64x16xf32>
    %13 = tpu.matmul %10, %12, %cst_13 {dimension_numbers = #tpu.dot_dimension_numbers<[1], [0], [0], [1], [0, 0, 1, 1], [], []>} : vector<64x3xf32>, vector<3x16xf32>, vector<64x16xf32> -> vector<64x16xf32>
    %14 = arith.addf %7, %13 : vector<64x16xf32>
    %c0_14 = arith.constant 0 : index
    %c0_15 = arith.constant 0 : index
    %c1_16 = arith.constant 1 : index
    %c0_17 = arith.constant 0 : index
    %15 = vector.load %arg1[%c0_14, %c0_15, %c1_16, %c0_17] : memref<4x9x9x3xf32, #tpu.memory_space<vmem>>, vector<1x8x8x3xf32>
    %16 = vector.shape_cast %15 : vector<1x8x8x3xf32> to vector<8x8x3xf32>
    %17 = vector.shape_cast %16 : vector<8x8x3xf32> to vector<64x3xf32>
    %c2 = arith.constant 2 : index
    %c0_18 = arith.constant 0 : index
    %c0_19 = arith.constant 0 : index
    %18 = vector.load %arg2[%c2, %c0_18, %c0_19] : memref<16x3x16xf32, #tpu.memory_space<vmem>>, vector<1x3x16xf32>
    %19 = vector.shape_cast %18 : vector<1x3x16xf32> to vector<3x16xf32>
    %cst_20 = arith.constant dense<0.000000e+00> : vector<64x16xf32>
    %20 = tpu.matmul %17, %19, %cst_20 {dimension_numbers = #tpu.dot_dimension_numbers<[1], [0], [0], [1], [0, 0, 1, 1], [], []>} : vector<64x3xf32>, vector<3x16xf32>, vector<64x16xf32> -> vector<64x16xf32>
    %21 = arith.addf %14, %20 : vector<64x16xf32>
    %c1_21 = arith.constant 1 : index
    %c0_22 = arith.constant 0 : index
    %c1_23 = arith.constant 1 : index
    %c0_24 = arith.constant 0 : index
    %22 = vector.load %arg1[%c1_21, %c0_22, %c1_23, %c0_24] : memref<4x9x9x3xf32, #tpu.memory_space<vmem>>, vector<1x8x8x3xf32>
    %23 = vector.shape_cast %22 : vector<1x8x8x3xf32> to vector<8x8x3xf32>
    %24 = vector.shape_cast %23 : vector<8x8x3xf32> to vector<64x3xf32>
    %c3 = arith.constant 3 : index
    %c0_25 = arith.constant 0 : index
    %c0_26 = arith.constant 0 : index
    %25 = vector.load %arg2[%c3, %c0_25, %c0_26] : memref<16x3x16xf32, #tpu.memory_space<vmem>>, vector<1x3x16xf32>
    %26 = vector.shape_cast %25 : vector<1x3x16xf32> to vector<3x16xf32>
    %cst_27 = arith.constant dense<0.000000e+00> : vector<64x16xf32>
    %27 = tpu.matmul %24, %26, %cst_27 {dimension_numbers = #tpu.dot_dimension_numbers<[1], [0], [0], [1], [0, 0, 1, 1], [], []>} : vector<64x3xf32>, vector<3x16xf32>, vector<64x16xf32> -> vector<64x16xf32>
    %28 = arith.addf %21, %27 : vector<64x16xf32>
    %c2_28 = arith.constant 2 : index
    %c0_29 = arith.constant 0 : index
    %c0_30 = arith.constant 0 : index
    %c0_31 = arith.constant 0 : index
    %29 = vector.load %arg1[%c2_28, %c0_29, %c0_30, %c0_31] : memref<4x9x9x3xf32, #tpu.memory_space<vmem>>, vector<1x8x8x3xf32>
    %30 = vector.shape_cast %29 : vector<1x8x8x3xf32> to vector<8x8x3xf32>
    %31 = vector.shape_cast %30 : vector<8x8x3xf32> to vector<64x3xf32>
    %c4 = arith.constant 4 : index
    %c0_32 = arith.constant 0 : index
    %c0_33 = arith.constant 0 : index
    %32 = vector.load %arg2[%c4, %c0_32, %c0_33] : memref<16x3x16xf32, #tpu.memory_space<vmem>>, vector<1x3x16xf32>
    %33 = vector.shape_cast %32 : vector<1x3x16xf32> to vector<3x16xf32>
    %cst_34 = arith.constant dense<0.000000e+00> : vector<64x16xf32>
    %34 = tpu.matmul %31, %33, %cst_34 {dimension_numbers = #tpu.dot_dimension_numbers<[1], [0], [0], [1], [0, 0, 1, 1], [], []>} : vector<64x3xf32>, vector<3x16xf32>, vector<64x16xf32> -> vector<64x16xf32>
    %35 = arith.addf %28, %34 : vector<64x16xf32>
    %c3_35 = arith.constant 3 : index
    %c0_36 = arith.constant 0 : index
    %c0_37 = arith.constant 0 : index
    %c0_38 = arith.constant 0 : index
    %36 = vector.load %arg1[%c3_35, %c0_36, %c0_37, %c0_38] : memref<4x9x9x3xf32, #tpu.memory_space<vmem>>, vector<1x8x8x3xf32>
    %37 = vector.shape_cast %36 : vector<1x8x8x3xf32> to vector<8x8x3xf32>
    %38 = vector.shape_cast %37 : vector<8x8x3xf32> to vector<64x3xf32>
    %c5 = arith.constant 5 : index
    %c0_39 = arith.constant 0 : index
    %c0_40 = arith.constant 0 : index
    %39 = vector.load %arg2[%c5, %c0_39, %c0_40] : memref<16x3x16xf32, #tpu.memory_space<vmem>>, vector<1x3x16xf32>
    %40 = vector.shape_cast %39 : vector<1x3x16xf32> to vector<3x16xf32>
    %cst_41 = arith.constant dense<0.000000e+00> : vector<64x16xf32>
    %41 = tpu.matmul %38, %40, %cst_41 {dimension_numbers = #tpu.dot_dimension_numbers<[1], [0], [0], [1], [0, 0, 1, 1], [], []>} : vector<64x3xf32>, vector<3x16xf32>, vector<64x16xf32> -> vector<64x16xf32>
    %42 = arith.addf %35, %41 : vector<64x16xf32>
    %c2_42 = arith.constant 2 : index
    %c0_43 = arith.constant 0 : index
    %c1_44 = arith.constant 1 : index
    %c0_45 = arith.constant 0 : index
    %43 = vector.load %arg1[%c2_42, %c0_43, %c1_44, %c0_45] : memref<4x9x9x3xf32, #tpu.memory_space<vmem>>, vector<1x8x8x3xf32>
    %44 = vector.shape_cast %43 : vector<1x8x8x3xf32> to vector<8x8x3xf32>
    %45 = vector.shape_cast %44 : vector<8x8x3xf32> to vector<64x3xf32>
    %c6 = arith.constant 6 : index
    %c0_46 = arith.constant 0 : index
    %c0_47 = arith.constant 0 : index
    %46 = vector.load %arg2[%c6, %c0_46, %c0_47] : memref<16x3x16xf32, #tpu.memory_space<vmem>>, vector<1x3x16xf32>
    %47 = vector.shape_cast %46 : vector<1x3x16xf32> to vector<3x16xf32>
    %cst_48 = arith.constant dense<0.000000e+00> : vector<64x16xf32>
    %48 = tpu.matmul %45, %47, %cst_48 {dimension_numbers = #tpu.dot_dimension_numbers<[1], [0], [0], [1], [0, 0, 1, 1], [], []>} : vector<64x3xf32>, vector<3x16xf32>, vector<64x16xf32> -> vector<64x16xf32>
    %49 = arith.addf %42, %48 : vector<64x16xf32>
    %c3_49 = arith.constant 3 : index
    %c0_50 = arith.constant 0 : index
    %c1_51 = arith.constant 1 : index
    %c0_52 = arith.constant 0 : index
    %50 = vector.load %arg1[%c3_49, %c0_50, %c1_51, %c0_52] : memref<4x9x9x3xf32, #tpu.memory_space<vmem>>, vector<1x8x8x3xf32>
    %51 = vector.shape_cast %50 : vector<1x8x8x3xf32> to vector<8x8x3xf32>
    %52 = vector.shape_cast %51 : vector<8x8x3xf32> to vector<64x3xf32>
    %c7 = arith.constant 7 : index
    %c0_53 = arith.constant 0 : index
    %c0_54 = arith.constant 0 : index
    %53 = vector.load %arg2[%c7, %c0_53, %c0_54] : memref<16x3x16xf32, #tpu.memory_space<vmem>>, vector<1x3x16xf32>
    %54 = vector.shape_cast %53 : vector<1x3x16xf32> to vector<3x16xf32>
    %cst_55 = arith.constant dense<0.000000e+00> : vector<64x16xf32>
    %55 = tpu.matmul %52, %54, %cst_55 {dimension_numbers = #tpu.dot_dimension_numbers<[1], [0], [0], [1], [0, 0, 1, 1], [], []>} : vector<64x3xf32>, vector<3x16xf32>, vector<64x16xf32> -> vector<64x16xf32>
    %56 = arith.addf %49, %55 : vector<64x16xf32>
    %c0_56 = arith.constant 0 : index
    %c1_57 = arith.constant 1 : index
    %c0_58 = arith.constant 0 : index
    %c0_59 = arith.constant 0 : index
    %57 = vector.load %arg1[%c0_56, %c1_57, %c0_58, %c0_59] : memref<4x9x9x3xf32, #tpu.memory_space<vmem>>, vector<1x8x8x3xf32>
    %58 = vector.shape_cast %57 : vector<1x8x8x3xf32> to vector<8x8x3xf32>
    %59 = vector.shape_cast %58 : vector<8x8x3xf32> to vector<64x3xf32>
    %c8 = arith.constant 8 : index
    %c0_60 = arith.constant 0 : index
    %c0_61 = arith.constant 0 : index
    %60 = vector.load %arg2[%c8, %c0_60, %c0_61] : memref<16x3x16xf32, #tpu.memory_space<vmem>>, vector<1x3x16xf32>
    %61 = vector.shape_cast %60 : vector<1x3x16xf32> to vector<3x16xf32>
    %cst_62 = arith.constant dense<0.000000e+00> : vector<64x16xf32>
    %62 = tpu.matmul %59, %61, %cst_62 {dimension_numbers = #tpu.dot_dimension_numbers<[1], [0], [0], [1], [0, 0, 1, 1], [], []>} : vector<64x3xf32>, vector<3x16xf32>, vector<64x16xf32> -> vector<64x16xf32>
    %63 = arith.addf %56, %62 : vector<64x16xf32>
    %c1_63 = arith.constant 1 : index
    %c1_64 = arith.constant 1 : index
    %c0_65 = arith.constant 0 : index
    %c0_66 = arith.constant 0 : index
    %64 = vector.load %arg1[%c1_63, %c1_64, %c0_65, %c0_66] : memref<4x9x9x3xf32, #tpu.memory_space<vmem>>, vector<1x8x8x3xf32>
    %65 = vector.shape_cast %64 : vector<1x8x8x3xf32> to vector<8x8x3xf32>
    %66 = vector.shape_cast %65 : vector<8x8x3xf32> to vector<64x3xf32>
    %c9 = arith.constant 9 : index
    %c0_67 = arith.constant 0 : index
    %c0_68 = arith.constant 0 : index
    %67 = vector.load %arg2[%c9, %c0_67, %c0_68] : memref<16x3x16xf32, #tpu.memory_space<vmem>>, vector<1x3x16xf32>
    %68 = vector.shape_cast %67 : vector<1x3x16xf32> to vector<3x16xf32>
    %cst_69 = arith.constant dense<0.000000e+00> : vector<64x16xf32>
    %69 = tpu.matmul %66, %68, %cst_69 {dimension_numbers = #tpu.dot_dimension_numbers<[1], [0], [0], [1], [0, 0, 1, 1], [], []>} : vector<64x3xf32>, vector<3x16xf32>, vector<64x16xf32> -> vector<64x16xf32>
    %70 = arith.addf %63, %69 : vector<64x16xf32>
    %c0_70 = arith.constant 0 : index
    %c1_71 = arith.constant 1 : index
    %c1_72 = arith.constant 1 : index
    %c0_73 = arith.constant 0 : index
    %71 = vector.load %arg1[%c0_70, %c1_71, %c1_72, %c0_73] : memref<4x9x9x3xf32, #tpu.memory_space<vmem>>, vector<1x8x8x3xf32>
    %72 = vector.shape_cast %71 : vector<1x8x8x3xf32> to vector<8x8x3xf32>
    %73 = vector.shape_cast %72 : vector<8x8x3xf32> to vector<64x3xf32>
    %c10 = arith.constant 10 : index
    %c0_74 = arith.constant 0 : index
    %c0_75 = arith.constant 0 : index
    %74 = vector.load %arg2[%c10, %c0_74, %c0_75] : memref<16x3x16xf32, #tpu.memory_space<vmem>>, vector<1x3x16xf32>
    %75 = vector.shape_cast %74 : vector<1x3x16xf32> to vector<3x16xf32>
    %cst_76 = arith.constant dense<0.000000e+00> : vector<64x16xf32>
    %76 = tpu.matmul %73, %75, %cst_76 {dimension_numbers = #tpu.dot_dimension_numbers<[1], [0], [0], [1], [0, 0, 1, 1], [], []>} : vector<64x3xf32>, vector<3x16xf32>, vector<64x16xf32> -> vector<64x16xf32>
    %77 = arith.addf %70, %76 : vector<64x16xf32>
    %c1_77 = arith.constant 1 : index
    %c1_78 = arith.constant 1 : index
    %c1_79 = arith.constant 1 : index
    %c0_80 = arith.constant 0 : index
    %78 = vector.load %arg1[%c1_77, %c1_78, %c1_79, %c0_80] : memref<4x9x9x3xf32, #tpu.memory_space<vmem>>, vector<1x8x8x3xf32>
    %79 = vector.shape_cast %78 : vector<1x8x8x3xf32> to vector<8x8x3xf32>
    %80 = vector.shape_cast %79 : vector<8x8x3xf32> to vector<64x3xf32>
    %c11 = arith.constant 11 : index
    %c0_81 = arith.constant 0 : index
    %c0_82 = arith.constant 0 : index
    %81 = vector.load %arg2[%c11, %c0_81, %c0_82] : memref<16x3x16xf32, #tpu.memory_space<vmem>>, vector<1x3x16xf32>
    %82 = vector.shape_cast %81 : vector<1x3x16xf32> to vector<3x16xf32>
    %cst_83 = arith.constant dense<0.000000e+00> : vector<64x16xf32>
    %83 = tpu.matmul %80, %82, %cst_83 {dimension_numbers = #tpu.dot_dimension_numbers<[1], [0], [0], [1], [0, 0, 1, 1], [], []>} : vector<64x3xf32>, vector<3x16xf32>, vector<64x16xf32> -> vector<64x16xf32>
    %84 = arith.addf %77, %83 : vector<64x16xf32>
    %c2_84 = arith.constant 2 : index
    %c1_85 = arith.constant 1 : index
    %c0_86 = arith.constant 0 : index
    %c0_87 = arith.constant 0 : index
    %85 = vector.load %arg1[%c2_84, %c1_85, %c0_86, %c0_87] : memref<4x9x9x3xf32, #tpu.memory_space<vmem>>, vector<1x8x8x3xf32>
    %86 = vector.shape_cast %85 : vector<1x8x8x3xf32> to vector<8x8x3xf32>
    %87 = vector.shape_cast %86 : vector<8x8x3xf32> to vector<64x3xf32>
    %c12 = arith.constant 12 : index
    %c0_88 = arith.constant 0 : index
    %c0_89 = arith.constant 0 : index
    %88 = vector.load %arg2[%c12, %c0_88, %c0_89] : memref<16x3x16xf32, #tpu.memory_space<vmem>>, vector<1x3x16xf32>
    %89 = vector.shape_cast %88 : vector<1x3x16xf32> to vector<3x16xf32>
    %cst_90 = arith.constant dense<0.000000e+00> : vector<64x16xf32>
    %90 = tpu.matmul %87, %89, %cst_90 {dimension_numbers = #tpu.dot_dimension_numbers<[1], [0], [0], [1], [0, 0, 1, 1], [], []>} : vector<64x3xf32>, vector<3x16xf32>, vector<64x16xf32> -> vector<64x16xf32>
    %91 = arith.addf %84, %90 : vector<64x16xf32>
    %c3_91 = arith.constant 3 : index
    %c1_92 = arith.constant 1 : index
    %c0_93 = arith.constant 0 : index
    %c0_94 = arith.constant 0 : index
    %92 = vector.load %arg1[%c3_91, %c1_92, %c0_93, %c0_94] : memref<4x9x9x3xf32, #tpu.memory_space<vmem>>, vector<1x8x8x3xf32>
    %93 = vector.shape_cast %92 : vector<1x8x8x3xf32> to vector<8x8x3xf32>
    %94 = vector.shape_cast %93 : vector<8x8x3xf32> to vector<64x3xf32>
    %c13 = arith.constant 13 : index
    %c0_95 = arith.constant 0 : index
    %c0_96 = arith.constant 0 : index
    %95 = vector.load %arg2[%c13, %c0_95, %c0_96] : memref<16x3x16xf32, #tpu.memory_space<vmem>>, vector<1x3x16xf32>
    %96 = vector.shape_cast %95 : vector<1x3x16xf32> to vector<3x16xf32>
    %cst_97 = arith.constant dense<0.000000e+00> : vector<64x16xf32>
    %97 = tpu.matmul %94, %96, %cst_97 {dimension_numbers = #tpu.dot_dimension_numbers<[1], [0], [0], [1], [0, 0, 1, 1], [], []>} : vector<64x3xf32>, vector<3x16xf32>, vector<64x16xf32> -> vector<64x16xf32>
    %98 = arith.addf %91, %97 : vector<64x16xf32>
    %c2_98 = arith.constant 2 : index
    %c1_99 = arith.constant 1 : index
    %c1_100 = arith.constant 1 : index
    %c0_101 = arith.constant 0 : index
    %99 = vector.load %arg1[%c2_98, %c1_99, %c1_100, %c0_101] : memref<4x9x9x3xf32, #tpu.memory_space<vmem>>, vector<1x8x8x3xf32>
    %100 = vector.shape_cast %99 : vector<1x8x8x3xf32> to vector<8x8x3xf32>
    %101 = vector.shape_cast %100 : vector<8x8x3xf32> to vector<64x3xf32>
    %c14 = arith.constant 14 : index
    %c0_102 = arith.constant 0 : index
    %c0_103 = arith.constant 0 : index
    %102 = vector.load %arg2[%c14, %c0_102, %c0_103] : memref<16x3x16xf32, #tpu.memory_space<vmem>>, vector<1x3x16xf32>
    %103 = vector.shape_cast %102 : vector<1x3x16xf32> to vector<3x16xf32>
    %cst_104 = arith.constant dense<0.000000e+00> : vector<64x16xf32>
    %104 = tpu.matmul %101, %103, %cst_104 {dimension_numbers = #tpu.dot_dimension_numbers<[1], [0], [0], [1], [0, 0, 1, 1], [], []>} : vector<64x3xf32>, vector<3x16xf32>, vector<64x16xf32> -> vector<64x16xf32>
    %105 = arith.addf %98, %104 : vector<64x16xf32>
    %c3_105 = arith.constant 3 : index
    %c1_106 = arith.constant 1 : index
    %c1_107 = arith.constant 1 : index
    %c0_108 = arith.constant 0 : index
    %106 = vector.load %arg1[%c3_105, %c1_106, %c1_107, %c0_108] : memref<4x9x9x3xf32, #tpu.memory_space<vmem>>, vector<1x8x8x3xf32>
    %107 = vector.shape_cast %106 : vector<1x8x8x3xf32> to vector<8x8x3xf32>
    %108 = vector.shape_cast %107 : vector<8x8x3xf32> to vector<64x3xf32>
    %c15 = arith.constant 15 : index
    %c0_109 = arith.constant 0 : index
    %c0_110 = arith.constant 0 : index
    %109 = vector.load %arg2[%c15, %c0_109, %c0_110] : memref<16x3x16xf32, #tpu.memory_space<vmem>>, vector<1x3x16xf32>
    %110 = vector.shape_cast %109 : vector<1x3x16xf32> to vector<3x16xf32>
    %cst_111 = arith.constant dense<0.000000e+00> : vector<64x16xf32>
    %111 = tpu.matmul %108, %110, %cst_111 {dimension_numbers = #tpu.dot_dimension_numbers<[1], [0], [0], [1], [0, 0, 1, 1], [], []>} : vector<64x3xf32>, vector<3x16xf32>, vector<64x16xf32> -> vector<64x16xf32>
    %112 = arith.addf %105, %111 : vector<64x16xf32>
    %c0_112 = arith.constant 0 : index
    %c0_113 = arith.constant 0 : index
    %113 = vector.load %arg3[%c0_112, %c0_113] : memref<1x16xf32, #tpu.memory_space<vmem>>, vector<1x16xf32>
    %114 = vector.broadcast %113 : vector<1x16xf32> to vector<64x16xf32>
    %115 = arith.addf %112, %114 : vector<64x16xf32>
    %cst_114 = arith.constant 0.000000e+00 : f32
    %116 = vector.broadcast %cst_114 : f32 to vector<64x16xf32>
    %117 = arith.maximumf %115, %116 : vector<64x16xf32>
    %118 = vector.shape_cast %117 : vector<64x16xf32> to vector<8x8x16xf32>
    %c0_115 = arith.constant 0 : index
    %c0_116 = arith.constant 0 : index
    %c0_117 = arith.constant 0 : index
    %c0_118 = arith.constant 0 : index
    %119 = vector.load %arg4[%c0_115, %c0_116, %c0_117, %c0_118] : memref<1x8x8x16xf32, #tpu.memory_space<vmem>>, vector<1x8x8x16xf32>
    %120 = vector.shape_cast %119 : vector<1x8x8x16xf32> to vector<8x8x16xf32>
    %121 = vector.shape_cast %118 : vector<8x8x16xf32> to vector<1x8x8x16xf32>
    tpu.vector_store %arg4[%c0_115, %c0_116, %c0_117, %c0_118], %121 {strides = array<i32>} : memref<1x8x8x16xf32, #tpu.memory_space<vmem>>, vector<1x8x8x16xf32>,
    return
  }
  func.func @transform_0(%arg0: i32) -> (i32, i32, i32, i32) {
    %c0_i32 = arith.constant 0 : i32
    %c0_i32_0 = arith.constant 0 : i32
    %c0_i32_1 = arith.constant 0 : i32
    %c0_i32_2 = arith.constant 0 : i32
    return %arg0, %c0_i32, %c0_i32_0, %c0_i32_1 : i32, i32, i32, i32
  }
  func.func @transform_1(%arg0: i32) -> (i32, i32, i32) {
    %c0_i32 = arith.constant 0 : i32
    %c0_i32_0 = arith.constant 0 : i32
    %c0_i32_1 = arith.constant 0 : i32
    %c0_i32_2 = arith.constant 0 : i32
    return %c0_i32, %c0_i32_0, %c0_i32_1 : i32, i32, i32
  }
  func.func @transform_2(%arg0: i32) -> (i32, i32) {
    %c0_i32 = arith.constant 0 : i32
    %c0_i32_0 = arith.constant 0 : i32
    %c0_i32_1 = arith.constant 0 : i32
    return %c0_i32, %c0_i32_0 : i32, i32
  }
  func.func @transform_3(%arg0: i32) -> (i32, i32, i32, i32) {
    %c0_i32 = arith.constant 0 : i32
    %c0_i32_0 = arith.constant 0 : i32
    %c0_i32_1 = arith.constant 0 : i32
    %c0_i32_2 = arith.constant 0 : i32
    return %arg0, %c0_i32, %c0_i32_0, %c0_i32_1 : i32, i32, i32, i32
  }
}

module attributes {stable_mosaic.version = 11 : i64} {
  func.func @kernel(%arg0: i32, %arg1: memref<4x5x5x16xf32, #tpu.memory_space<vmem>>, %arg2: memref<16x16x32xf32, #tpu.memory_space<vmem>>, %arg3: memref<1x32xf32, #tpu.memory_space<vmem>>, %arg4: memref<1x4x4x32xf32, #tpu.memory_space<vmem>>) attributes {dimension_semantics = [#tpu.dimension_semantics<parallel>], iteration_bounds = array<i64: 2>, scalar_prefetch = 0 : i64, scratch_operands = 0 : i64, tpu.core_type = #tpu.core_type<tc>, window_params = [{transform_indices = @transform_0, window_bounds = array<i64: 4, 5, 5, 16>}, {pipeline_mode = #tpu.pipeline_mode<synchronous>, transform_indices = @transform_1, window_bounds = array<i64: 16, 16, 32>}, {pipeline_mode = #tpu.pipeline_mode<synchronous>, transform_indices = @transform_2, window_bounds = array<i64: 1, 32>}, {transform_indices = @transform_3, window_bounds = array<i64: 1, 4, 4, 32>}]} {
    %cst = arith.constant 0.000000e+00 : f32
    %0 = vector.broadcast %cst : f32 to vector<16x32xf32>
    %c0 = arith.constant 0 : index
    %c0_0 = arith.constant 0 : index
    %c0_1 = arith.constant 0 : index
    %c0_2 = arith.constant 0 : index
    %1 = vector.load %arg1[%c0, %c0_0, %c0_1, %c0_2] : memref<4x5x5x16xf32, #tpu.memory_space<vmem>>, vector<1x4x4x16xf32>
    %2 = vector.shape_cast %1 : vector<1x4x4x16xf32> to vector<4x4x16xf32>
    %3 = vector.shape_cast %2 : vector<4x4x16xf32> to vector<16x16xf32>
    %c0_3 = arith.constant 0 : index
    %c0_4 = arith.constant 0 : index
    %c0_5 = arith.constant 0 : index
    %4 = vector.load %arg2[%c0_3, %c0_4, %c0_5] : memref<16x16x32xf32, #tpu.memory_space<vmem>>, vector<1x16x32xf32>
    %5 = vector.shape_cast %4 : vector<1x16x32xf32> to vector<16x32xf32>
    %cst_6 = arith.constant dense<0.000000e+00> : vector<16x32xf32>
    %6 = tpu.matmul %3, %5, %cst_6 {dimension_numbers = #tpu.dot_dimension_numbers<[1], [0], [0], [1], [0, 0, 1, 1], [], []>} : vector<16x16xf32>, vector<16x32xf32>, vector<16x32xf32> -> vector<16x32xf32>
    %7 = arith.addf %0, %6 : vector<16x32xf32>
    %c1 = arith.constant 1 : index
    %c0_7 = arith.constant 0 : index
    %c0_8 = arith.constant 0 : index
    %c0_9 = arith.constant 0 : index
    %8 = vector.load %arg1[%c1, %c0_7, %c0_8, %c0_9] : memref<4x5x5x16xf32, #tpu.memory_space<vmem>>, vector<1x4x4x16xf32>
    %9 = vector.shape_cast %8 : vector<1x4x4x16xf32> to vector<4x4x16xf32>
    %10 = vector.shape_cast %9 : vector<4x4x16xf32> to vector<16x16xf32>
    %c1_10 = arith.constant 1 : index
    %c0_11 = arith.constant 0 : index
    %c0_12 = arith.constant 0 : index
    %11 = vector.load %arg2[%c1_10, %c0_11, %c0_12] : memref<16x16x32xf32, #tpu.memory_space<vmem>>, vector<1x16x32xf32>
    %12 = vector.shape_cast %11 : vector<1x16x32xf32> to vector<16x32xf32>
    %cst_13 = arith.constant dense<0.000000e+00> : vector<16x32xf32>
    %13 = tpu.matmul %10, %12, %cst_13 {dimension_numbers = #tpu.dot_dimension_numbers<[1], [0], [0], [1], [0, 0, 1, 1], [], []>} : vector<16x16xf32>, vector<16x32xf32>, vector<16x32xf32> -> vector<16x32xf32>
    %14 = arith.addf %7, %13 : vector<16x32xf32>
    %c0_14 = arith.constant 0 : index
    %c0_15 = arith.constant 0 : index
    %c1_16 = arith.constant 1 : index
    %c0_17 = arith.constant 0 : index
    %15 = vector.load %arg1[%c0_14, %c0_15, %c1_16, %c0_17] : memref<4x5x5x16xf32, #tpu.memory_space<vmem>>, vector<1x4x4x16xf32>
    %16 = vector.shape_cast %15 : vector<1x4x4x16xf32> to vector<4x4x16xf32>
    %17 = vector.shape_cast %16 : vector<4x4x16xf32> to vector<16x16xf32>
    %c2 = arith.constant 2 : index
    %c0_18 = arith.constant 0 : index
    %c0_19 = arith.constant 0 : index
    %18 = vector.load %arg2[%c2, %c0_18, %c0_19] : memref<16x16x32xf32, #tpu.memory_space<vmem>>, vector<1x16x32xf32>
    %19 = vector.shape_cast %18 : vector<1x16x32xf32> to vector<16x32xf32>
    %cst_20 = arith.constant dense<0.000000e+00> : vector<16x32xf32>
    %20 = tpu.matmul %17, %19, %cst_20 {dimension_numbers = #tpu.dot_dimension_numbers<[1], [0], [0], [1], [0, 0, 1, 1], [], []>} : vector<16x16xf32>, vector<16x32xf32>, vector<16x32xf32> -> vector<16x32xf32>
    %21 = arith.addf %14, %20 : vector<16x32xf32>
    %c1_21 = arith.constant 1 : index
    %c0_22 = arith.constant 0 : index
    %c1_23 = arith.constant 1 : index
    %c0_24 = arith.constant 0 : index
    %22 = vector.load %arg1[%c1_21, %c0_22, %c1_23, %c0_24] : memref<4x5x5x16xf32, #tpu.memory_space<vmem>>, vector<1x4x4x16xf32>
    %23 = vector.shape_cast %22 : vector<1x4x4x16xf32> to vector<4x4x16xf32>
    %24 = vector.shape_cast %23 : vector<4x4x16xf32> to vector<16x16xf32>
    %c3 = arith.constant 3 : index
    %c0_25 = arith.constant 0 : index
    %c0_26 = arith.constant 0 : index
    %25 = vector.load %arg2[%c3, %c0_25, %c0_26] : memref<16x16x32xf32, #tpu.memory_space<vmem>>, vector<1x16x32xf32>
    %26 = vector.shape_cast %25 : vector<1x16x32xf32> to vector<16x32xf32>
    %cst_27 = arith.constant dense<0.000000e+00> : vector<16x32xf32>
    %27 = tpu.matmul %24, %26, %cst_27 {dimension_numbers = #tpu.dot_dimension_numbers<[1], [0], [0], [1], [0, 0, 1, 1], [], []>} : vector<16x16xf32>, vector<16x32xf32>, vector<16x32xf32> -> vector<16x32xf32>
    %28 = arith.addf %21, %27 : vector<16x32xf32>
    %c2_28 = arith.constant 2 : index
    %c0_29 = arith.constant 0 : index
    %c0_30 = arith.constant 0 : index
    %c0_31 = arith.constant 0 : index
    %29 = vector.load %arg1[%c2_28, %c0_29, %c0_30, %c0_31] : memref<4x5x5x16xf32, #tpu.memory_space<vmem>>, vector<1x4x4x16xf32>
    %30 = vector.shape_cast %29 : vector<1x4x4x16xf32> to vector<4x4x16xf32>
    %31 = vector.shape_cast %30 : vector<4x4x16xf32> to vector<16x16xf32>
    %c4 = arith.constant 4 : index
    %c0_32 = arith.constant 0 : index
    %c0_33 = arith.constant 0 : index
    %32 = vector.load %arg2[%c4, %c0_32, %c0_33] : memref<16x16x32xf32, #tpu.memory_space<vmem>>, vector<1x16x32xf32>
    %33 = vector.shape_cast %32 : vector<1x16x32xf32> to vector<16x32xf32>
    %cst_34 = arith.constant dense<0.000000e+00> : vector<16x32xf32>
    %34 = tpu.matmul %31, %33, %cst_34 {dimension_numbers = #tpu.dot_dimension_numbers<[1], [0], [0], [1], [0, 0, 1, 1], [], []>} : vector<16x16xf32>, vector<16x32xf32>, vector<16x32xf32> -> vector<16x32xf32>
    %35 = arith.addf %28, %34 : vector<16x32xf32>
    %c3_35 = arith.constant 3 : index
    %c0_36 = arith.constant 0 : index
    %c0_37 = arith.constant 0 : index
    %c0_38 = arith.constant 0 : index
    %36 = vector.load %arg1[%c3_35, %c0_36, %c0_37, %c0_38] : memref<4x5x5x16xf32, #tpu.memory_space<vmem>>, vector<1x4x4x16xf32>
    %37 = vector.shape_cast %36 : vector<1x4x4x16xf32> to vector<4x4x16xf32>
    %38 = vector.shape_cast %37 : vector<4x4x16xf32> to vector<16x16xf32>
    %c5 = arith.constant 5 : index
    %c0_39 = arith.constant 0 : index
    %c0_40 = arith.constant 0 : index
    %39 = vector.load %arg2[%c5, %c0_39, %c0_40] : memref<16x16x32xf32, #tpu.memory_space<vmem>>, vector<1x16x32xf32>
    %40 = vector.shape_cast %39 : vector<1x16x32xf32> to vector<16x32xf32>
    %cst_41 = arith.constant dense<0.000000e+00> : vector<16x32xf32>
    %41 = tpu.matmul %38, %40, %cst_41 {dimension_numbers = #tpu.dot_dimension_numbers<[1], [0], [0], [1], [0, 0, 1, 1], [], []>} : vector<16x16xf32>, vector<16x32xf32>, vector<16x32xf32> -> vector<16x32xf32>
    %42 = arith.addf %35, %41 : vector<16x32xf32>
    %c2_42 = arith.constant 2 : index
    %c0_43 = arith.constant 0 : index
    %c1_44 = arith.constant 1 : index
    %c0_45 = arith.constant 0 : index
    %43 = vector.load %arg1[%c2_42, %c0_43, %c1_44, %c0_45] : memref<4x5x5x16xf32, #tpu.memory_space<vmem>>, vector<1x4x4x16xf32>
    %44 = vector.shape_cast %43 : vector<1x4x4x16xf32> to vector<4x4x16xf32>
    %45 = vector.shape_cast %44 : vector<4x4x16xf32> to vector<16x16xf32>
    %c6 = arith.constant 6 : index
    %c0_46 = arith.constant 0 : index
    %c0_47 = arith.constant 0 : index
    %46 = vector.load %arg2[%c6, %c0_46, %c0_47] : memref<16x16x32xf32, #tpu.memory_space<vmem>>, vector<1x16x32xf32>
    %47 = vector.shape_cast %46 : vector<1x16x32xf32> to vector<16x32xf32>
    %cst_48 = arith.constant dense<0.000000e+00> : vector<16x32xf32>
    %48 = tpu.matmul %45, %47, %cst_48 {dimension_numbers = #tpu.dot_dimension_numbers<[1], [0], [0], [1], [0, 0, 1, 1], [], []>} : vector<16x16xf32>, vector<16x32xf32>, vector<16x32xf32> -> vector<16x32xf32>
    %49 = arith.addf %42, %48 : vector<16x32xf32>
    %c3_49 = arith.constant 3 : index
    %c0_50 = arith.constant 0 : index
    %c1_51 = arith.constant 1 : index
    %c0_52 = arith.constant 0 : index
    %50 = vector.load %arg1[%c3_49, %c0_50, %c1_51, %c0_52] : memref<4x5x5x16xf32, #tpu.memory_space<vmem>>, vector<1x4x4x16xf32>
    %51 = vector.shape_cast %50 : vector<1x4x4x16xf32> to vector<4x4x16xf32>
    %52 = vector.shape_cast %51 : vector<4x4x16xf32> to vector<16x16xf32>
    %c7 = arith.constant 7 : index
    %c0_53 = arith.constant 0 : index
    %c0_54 = arith.constant 0 : index
    %53 = vector.load %arg2[%c7, %c0_53, %c0_54] : memref<16x16x32xf32, #tpu.memory_space<vmem>>, vector<1x16x32xf32>
    %54 = vector.shape_cast %53 : vector<1x16x32xf32> to vector<16x32xf32>
    %cst_55 = arith.constant dense<0.000000e+00> : vector<16x32xf32>
    %55 = tpu.matmul %52, %54, %cst_55 {dimension_numbers = #tpu.dot_dimension_numbers<[1], [0], [0], [1], [0, 0, 1, 1], [], []>} : vector<16x16xf32>, vector<16x32xf32>, vector<16x32xf32> -> vector<16x32xf32>
    %56 = arith.addf %49, %55 : vector<16x32xf32>
    %c0_56 = arith.constant 0 : index
    %c1_57 = arith.constant 1 : index
    %c0_58 = arith.constant 0 : index
    %c0_59 = arith.constant 0 : index
    %57 = vector.load %arg1[%c0_56, %c1_57, %c0_58, %c0_59] : memref<4x5x5x16xf32, #tpu.memory_space<vmem>>, vector<1x4x4x16xf32>
    %58 = vector.shape_cast %57 : vector<1x4x4x16xf32> to vector<4x4x16xf32>
    %59 = vector.shape_cast %58 : vector<4x4x16xf32> to vector<16x16xf32>
    %c8 = arith.constant 8 : index
    %c0_60 = arith.constant 0 : index
    %c0_61 = arith.constant 0 : index
    %60 = vector.load %arg2[%c8, %c0_60, %c0_61] : memref<16x16x32xf32, #tpu.memory_space<vmem>>, vector<1x16x32xf32>
    %61 = vector.shape_cast %60 : vector<1x16x32xf32> to vector<16x32xf32>
    %cst_62 = arith.constant dense<0.000000e+00> : vector<16x32xf32>
    %62 = tpu.matmul %59, %61, %cst_62 {dimension_numbers = #tpu.dot_dimension_numbers<[1], [0], [0], [1], [0, 0, 1, 1], [], []>} : vector<16x16xf32>, vector<16x32xf32>, vector<16x32xf32> -> vector<16x32xf32>
    %63 = arith.addf %56, %62 : vector<16x32xf32>
    %c1_63 = arith.constant 1 : index
    %c1_64 = arith.constant 1 : index
    %c0_65 = arith.constant 0 : index
    %c0_66 = arith.constant 0 : index
    %64 = vector.load %arg1[%c1_63, %c1_64, %c0_65, %c0_66] : memref<4x5x5x16xf32, #tpu.memory_space<vmem>>, vector<1x4x4x16xf32>
    %65 = vector.shape_cast %64 : vector<1x4x4x16xf32> to vector<4x4x16xf32>
    %66 = vector.shape_cast %65 : vector<4x4x16xf32> to vector<16x16xf32>
    %c9 = arith.constant 9 : index
    %c0_67 = arith.constant 0 : index
    %c0_68 = arith.constant 0 : index
    %67 = vector.load %arg2[%c9, %c0_67, %c0_68] : memref<16x16x32xf32, #tpu.memory_space<vmem>>, vector<1x16x32xf32>
    %68 = vector.shape_cast %67 : vector<1x16x32xf32> to vector<16x32xf32>
    %cst_69 = arith.constant dense<0.000000e+00> : vector<16x32xf32>
    %69 = tpu.matmul %66, %68, %cst_69 {dimension_numbers = #tpu.dot_dimension_numbers<[1], [0], [0], [1], [0, 0, 1, 1], [], []>} : vector<16x16xf32>, vector<16x32xf32>, vector<16x32xf32> -> vector<16x32xf32>
    %70 = arith.addf %63, %69 : vector<16x32xf32>
    %c0_70 = arith.constant 0 : index
    %c1_71 = arith.constant 1 : index
    %c1_72 = arith.constant 1 : index
    %c0_73 = arith.constant 0 : index
    %71 = vector.load %arg1[%c0_70, %c1_71, %c1_72, %c0_73] : memref<4x5x5x16xf32, #tpu.memory_space<vmem>>, vector<1x4x4x16xf32>
    %72 = vector.shape_cast %71 : vector<1x4x4x16xf32> to vector<4x4x16xf32>
    %73 = vector.shape_cast %72 : vector<4x4x16xf32> to vector<16x16xf32>
    %c10 = arith.constant 10 : index
    %c0_74 = arith.constant 0 : index
    %c0_75 = arith.constant 0 : index
    %74 = vector.load %arg2[%c10, %c0_74, %c0_75] : memref<16x16x32xf32, #tpu.memory_space<vmem>>, vector<1x16x32xf32>
    %75 = vector.shape_cast %74 : vector<1x16x32xf32> to vector<16x32xf32>
    %cst_76 = arith.constant dense<0.000000e+00> : vector<16x32xf32>
    %76 = tpu.matmul %73, %75, %cst_76 {dimension_numbers = #tpu.dot_dimension_numbers<[1], [0], [0], [1], [0, 0, 1, 1], [], []>} : vector<16x16xf32>, vector<16x32xf32>, vector<16x32xf32> -> vector<16x32xf32>
    %77 = arith.addf %70, %76 : vector<16x32xf32>
    %c1_77 = arith.constant 1 : index
    %c1_78 = arith.constant 1 : index
    %c1_79 = arith.constant 1 : index
    %c0_80 = arith.constant 0 : index
    %78 = vector.load %arg1[%c1_77, %c1_78, %c1_79, %c0_80] : memref<4x5x5x16xf32, #tpu.memory_space<vmem>>, vector<1x4x4x16xf32>
    %79 = vector.shape_cast %78 : vector<1x4x4x16xf32> to vector<4x4x16xf32>
    %80 = vector.shape_cast %79 : vector<4x4x16xf32> to vector<16x16xf32>
    %c11 = arith.constant 11 : index
    %c0_81 = arith.constant 0 : index
    %c0_82 = arith.constant 0 : index
    %81 = vector.load %arg2[%c11, %c0_81, %c0_82] : memref<16x16x32xf32, #tpu.memory_space<vmem>>, vector<1x16x32xf32>
    %82 = vector.shape_cast %81 : vector<1x16x32xf32> to vector<16x32xf32>
    %cst_83 = arith.constant dense<0.000000e+00> : vector<16x32xf32>
    %83 = tpu.matmul %80, %82, %cst_83 {dimension_numbers = #tpu.dot_dimension_numbers<[1], [0], [0], [1], [0, 0, 1, 1], [], []>} : vector<16x16xf32>, vector<16x32xf32>, vector<16x32xf32> -> vector<16x32xf32>
    %84 = arith.addf %77, %83 : vector<16x32xf32>
    %c2_84 = arith.constant 2 : index
    %c1_85 = arith.constant 1 : index
    %c0_86 = arith.constant 0 : index
    %c0_87 = arith.constant 0 : index
    %85 = vector.load %arg1[%c2_84, %c1_85, %c0_86, %c0_87] : memref<4x5x5x16xf32, #tpu.memory_space<vmem>>, vector<1x4x4x16xf32>
    %86 = vector.shape_cast %85 : vector<1x4x4x16xf32> to vector<4x4x16xf32>
    %87 = vector.shape_cast %86 : vector<4x4x16xf32> to vector<16x16xf32>
    %c12 = arith.constant 12 : index
    %c0_88 = arith.constant 0 : index
    %c0_89 = arith.constant 0 : index
    %88 = vector.load %arg2[%c12, %c0_88, %c0_89] : memref<16x16x32xf32, #tpu.memory_space<vmem>>, vector<1x16x32xf32>
    %89 = vector.shape_cast %88 : vector<1x16x32xf32> to vector<16x32xf32>
    %cst_90 = arith.constant dense<0.000000e+00> : vector<16x32xf32>
    %90 = tpu.matmul %87, %89, %cst_90 {dimension_numbers = #tpu.dot_dimension_numbers<[1], [0], [0], [1], [0, 0, 1, 1], [], []>} : vector<16x16xf32>, vector<16x32xf32>, vector<16x32xf32> -> vector<16x32xf32>
    %91 = arith.addf %84, %90 : vector<16x32xf32>
    %c3_91 = arith.constant 3 : index
    %c1_92 = arith.constant 1 : index
    %c0_93 = arith.constant 0 : index
    %c0_94 = arith.constant 0 : index
    %92 = vector.load %arg1[%c3_91, %c1_92, %c0_93, %c0_94] : memref<4x5x5x16xf32, #tpu.memory_space<vmem>>, vector<1x4x4x16xf32>
    %93 = vector.shape_cast %92 : vector<1x4x4x16xf32> to vector<4x4x16xf32>
    %94 = vector.shape_cast %93 : vector<4x4x16xf32> to vector<16x16xf32>
    %c13 = arith.constant 13 : index
    %c0_95 = arith.constant 0 : index
    %c0_96 = arith.constant 0 : index
    %95 = vector.load %arg2[%c13, %c0_95, %c0_96] : memref<16x16x32xf32, #tpu.memory_space<vmem>>, vector<1x16x32xf32>
    %96 = vector.shape_cast %95 : vector<1x16x32xf32> to vector<16x32xf32>
    %cst_97 = arith.constant dense<0.000000e+00> : vector<16x32xf32>
    %97 = tpu.matmul %94, %96, %cst_97 {dimension_numbers = #tpu.dot_dimension_numbers<[1], [0], [0], [1], [0, 0, 1, 1], [], []>} : vector<16x16xf32>, vector<16x32xf32>, vector<16x32xf32> -> vector<16x32xf32>
    %98 = arith.addf %91, %97 : vector<16x32xf32>
    %c2_98 = arith.constant 2 : index
    %c1_99 = arith.constant 1 : index
    %c1_100 = arith.constant 1 : index
    %c0_101 = arith.constant 0 : index
    %99 = vector.load %arg1[%c2_98, %c1_99, %c1_100, %c0_101] : memref<4x5x5x16xf32, #tpu.memory_space<vmem>>, vector<1x4x4x16xf32>
    %100 = vector.shape_cast %99 : vector<1x4x4x16xf32> to vector<4x4x16xf32>
    %101 = vector.shape_cast %100 : vector<4x4x16xf32> to vector<16x16xf32>
    %c14 = arith.constant 14 : index
    %c0_102 = arith.constant 0 : index
    %c0_103 = arith.constant 0 : index
    %102 = vector.load %arg2[%c14, %c0_102, %c0_103] : memref<16x16x32xf32, #tpu.memory_space<vmem>>, vector<1x16x32xf32>
    %103 = vector.shape_cast %102 : vector<1x16x32xf32> to vector<16x32xf32>
    %cst_104 = arith.constant dense<0.000000e+00> : vector<16x32xf32>
    %104 = tpu.matmul %101, %103, %cst_104 {dimension_numbers = #tpu.dot_dimension_numbers<[1], [0], [0], [1], [0, 0, 1, 1], [], []>} : vector<16x16xf32>, vector<16x32xf32>, vector<16x32xf32> -> vector<16x32xf32>
    %105 = arith.addf %98, %104 : vector<16x32xf32>
    %c3_105 = arith.constant 3 : index
    %c1_106 = arith.constant 1 : index
    %c1_107 = arith.constant 1 : index
    %c0_108 = arith.constant 0 : index
    %106 = vector.load %arg1[%c3_105, %c1_106, %c1_107, %c0_108] : memref<4x5x5x16xf32, #tpu.memory_space<vmem>>, vector<1x4x4x16xf32>
    %107 = vector.shape_cast %106 : vector<1x4x4x16xf32> to vector<4x4x16xf32>
    %108 = vector.shape_cast %107 : vector<4x4x16xf32> to vector<16x16xf32>
    %c15 = arith.constant 15 : index
    %c0_109 = arith.constant 0 : index
    %c0_110 = arith.constant 0 : index
    %109 = vector.load %arg2[%c15, %c0_109, %c0_110] : memref<16x16x32xf32, #tpu.memory_space<vmem>>, vector<1x16x32xf32>
    %110 = vector.shape_cast %109 : vector<1x16x32xf32> to vector<16x32xf32>
    %cst_111 = arith.constant dense<0.000000e+00> : vector<16x32xf32>
    %111 = tpu.matmul %108, %110, %cst_111 {dimension_numbers = #tpu.dot_dimension_numbers<[1], [0], [0], [1], [0, 0, 1, 1], [], []>} : vector<16x16xf32>, vector<16x32xf32>, vector<16x32xf32> -> vector<16x32xf32>
    %112 = arith.addf %105, %111 : vector<16x32xf32>
    %c0_112 = arith.constant 0 : index
    %c0_113 = arith.constant 0 : index
    %113 = vector.load %arg3[%c0_112, %c0_113] : memref<1x32xf32, #tpu.memory_space<vmem>>, vector<1x32xf32>
    %114 = vector.broadcast %113 : vector<1x32xf32> to vector<16x32xf32>
    %115 = arith.addf %112, %114 : vector<16x32xf32>
    %cst_114 = arith.constant 0.000000e+00 : f32
    %116 = vector.broadcast %cst_114 : f32 to vector<16x32xf32>
    %117 = arith.maximumf %115, %116 : vector<16x32xf32>
    %118 = vector.shape_cast %117 : vector<16x32xf32> to vector<4x4x32xf32>
    %c0_115 = arith.constant 0 : index
    %c0_116 = arith.constant 0 : index
    %c0_117 = arith.constant 0 : index
    %c0_118 = arith.constant 0 : index
    %119 = vector.load %arg4[%c0_115, %c0_116, %c0_117, %c0_118] : memref<1x4x4x32xf32, #tpu.memory_space<vmem>>, vector<1x4x4x32xf32>
    %120 = vector.shape_cast %119 : vector<1x4x4x32xf32> to vector<4x4x32xf32>
    %121 = vector.shape_cast %118 : vector<4x4x32xf32> to vector<1x4x4x32xf32>
    tpu.vector_store %arg4[%c0_115, %c0_116, %c0_117, %c0_118], %121 {strides = array<i32>} : memref<1x4x4x32xf32, #tpu.memory_space<vmem>>, vector<1x4x4x32xf32>,
    return
  }
  func.func @transform_0(%arg0: i32) -> (i32, i32, i32, i32) {
    %c0_i32 = arith.constant 0 : i32
    %c0_i32_0 = arith.constant 0 : i32
    %c0_i32_1 = arith.constant 0 : i32
    %c0_i32_2 = arith.constant 0 : i32
    return %arg0, %c0_i32, %c0_i32_0, %c0_i32_1 : i32, i32, i32, i32
  }
  func.func @transform_1(%arg0: i32) -> (i32, i32, i32) {
    %c0_i32 = arith.constant 0 : i32
    %c0_i32_0 = arith.constant 0 : i32
    %c0_i32_1 = arith.constant 0 : i32
    %c0_i32_2 = arith.constant 0 : i32
    return %c0_i32, %c0_i32_0, %c0_i32_1 : i32, i32, i32
  }
  func.func @transform_2(%arg0: i32) -> (i32, i32) {
    %c0_i32 = arith.constant 0 : i32
    %c0_i32_0 = arith.constant 0 : i32
    %c0_i32_1 = arith.constant 0 : i32
    return %c0_i32, %c0_i32_0 : i32, i32
  }
  func.func @transform_3(%arg0: i32) -> (i32, i32, i32, i32) {
    %c0_i32 = arith.constant 0 : i32
    %c0_i32_0 = arith.constant 0 : i32
    %c0_i32_1 = arith.constant 0 : i32
    %c0_i32_2 = arith.constant 0 : i32
    return %arg0, %c0_i32, %c0_i32_0, %c0_i32_1 : i32, i32, i32, i32
  }
}

module attributes {stable_mosaic.version = 11 : i64} {
  func.func @kernel(%arg0: i32, %arg1: memref<1x4x4x32xf32, #tpu.memory_space<vmem>>, %arg2: memref<9x32x32xf32, #tpu.memory_space<vmem>>, %arg3: memref<1x32xf32, #tpu.memory_space<vmem>>, %arg4: memref<9x32x8xf32, #tpu.memory_space<vmem>>, %arg5: memref<8x32xf32, #tpu.memory_space<vmem>>, %arg6: memref<1x4x4x32xf32, #tpu.memory_space<vmem>>, %arg7: memref<6x6x32xf32, #tpu.memory_space<vmem>>, %arg8: memref<16x32xf32, #tpu.memory_space<vmem>>) attributes {dimension_semantics = [#tpu.dimension_semantics<parallel>], iteration_bounds = array<i64: 2>, scalar_prefetch = 0 : i64, scratch_operands = 2 : i64, tpu.core_type = #tpu.core_type<tc>, window_params = [{transform_indices = @transform_0, window_bounds = array<i64: 1, 4, 4, 32>}, {pipeline_mode = #tpu.pipeline_mode<synchronous>, transform_indices = @transform_1, window_bounds = array<i64: 9, 32, 32>}, {pipeline_mode = #tpu.pipeline_mode<synchronous>, transform_indices = @transform_2, window_bounds = array<i64: 1, 32>}, {pipeline_mode = #tpu.pipeline_mode<synchronous>, transform_indices = @transform_3, window_bounds = array<i64: 9, 32, 8>}, {pipeline_mode = #tpu.pipeline_mode<synchronous>, transform_indices = @transform_4, window_bounds = array<i64: 8, 32>}, {transform_indices = @transform_5, window_bounds = array<i64: 1, 4, 4, 32>}]} {
    %cst = arith.constant 0.000000e+00 : f32
    %0 = vector.broadcast %cst : f32 to vector<6x6x32xf32>
    %c0 = arith.constant 0 : index
    %c0_0 = arith.constant 0 : index
    %c0_1 = arith.constant 0 : index
    %1 = vector.load %arg7[%c0, %c0_0, %c0_1] : memref<6x6x32xf32, #tpu.memory_space<vmem>>, vector<6x6x32xf32>
    tpu.vector_store %arg7[%c0, %c0_0, %c0_1], %0 {strides = array<i32>} : memref<6x6x32xf32, #tpu.memory_space<vmem>>, vector<6x6x32xf32>,
    %c0_2 = arith.constant 0 : index
    %c0_3 = arith.constant 0 : index
    %c0_4 = arith.constant 0 : index
    %c0_5 = arith.constant 0 : index
    %2 = vector.load %arg1[%c0_2, %c0_3, %c0_4, %c0_5] : memref<1x4x4x32xf32, #tpu.memory_space<vmem>>, vector<1x4x4x32xf32>
    %3 = vector.shape_cast %2 : vector<1x4x4x32xf32> to vector<4x4x32xf32>
    %c1 = arith.constant 1 : index
    %c1_6 = arith.constant 1 : index
    %c0_7 = arith.constant 0 : index
    %4 = vector.load %arg7[%c1, %c1_6, %c0_7] : memref<6x6x32xf32, #tpu.memory_space<vmem>>, vector<4x4x32xf32>
    tpu.vector_store %arg7[%c1, %c1_6, %c0_7], %3 {strides = array<i32>} : memref<6x6x32xf32, #tpu.memory_space<vmem>>, vector<4x4x32xf32>,
    %cst_8 = arith.constant 0.000000e+00 : f32
    %5 = vector.broadcast %cst_8 : f32 to vector<16x32xf32>
    %c0_9 = arith.constant 0 : index
    %c0_10 = arith.constant 0 : index
    %c0_11 = arith.constant 0 : index
    %6 = vector.load %arg7[%c0_9, %c0_10, %c0_11] : memref<6x6x32xf32, #tpu.memory_space<vmem>>, vector<4x4x32xf32>
    %7 = vector.shape_cast %6 : vector<4x4x32xf32> to vector<16x32xf32>
    %c0_12 = arith.constant 0 : index
    %c0_13 = arith.constant 0 : index
    %c0_14 = arith.constant 0 : index
    %8 = vector.load %arg2[%c0_12, %c0_13, %c0_14] : memref<9x32x32xf32, #tpu.memory_space<vmem>>, vector<1x32x32xf32>
    %9 = vector.shape_cast %8 : vector<1x32x32xf32> to vector<32x32xf32>
    %cst_15 = arith.constant dense<0.000000e+00> : vector<16x32xf32>
    %10 = tpu.matmul %7, %9, %cst_15 {dimension_numbers = #tpu.dot_dimension_numbers<[1], [0], [0], [1], [0, 0, 1, 1], [], []>} : vector<16x32xf32>, vector<32x32xf32>, vector<16x32xf32> -> vector<16x32xf32>
    %11 = arith.addf %5, %10 : vector<16x32xf32>
    %c0_16 = arith.constant 0 : index
    %c1_17 = arith.constant 1 : index
    %c0_18 = arith.constant 0 : index
    %12 = vector.load %arg7[%c0_16, %c1_17, %c0_18] : memref<6x6x32xf32, #tpu.memory_space<vmem>>, vector<4x4x32xf32>
    %13 = vector.shape_cast %12 : vector<4x4x32xf32> to vector<16x32xf32>
    %c1_19 = arith.constant 1 : index
    %c0_20 = arith.constant 0 : index
    %c0_21 = arith.constant 0 : index
    %14 = vector.load %arg2[%c1_19, %c0_20, %c0_21] : memref<9x32x32xf32, #tpu.memory_space<vmem>>, vector<1x32x32xf32>
    %15 = vector.shape_cast %14 : vector<1x32x32xf32> to vector<32x32xf32>
    %cst_22 = arith.constant dense<0.000000e+00> : vector<16x32xf32>
    %16 = tpu.matmul %13, %15, %cst_22 {dimension_numbers = #tpu.dot_dimension_numbers<[1], [0], [0], [1], [0, 0, 1, 1], [], []>} : vector<16x32xf32>, vector<32x32xf32>, vector<16x32xf32> -> vector<16x32xf32>
    %17 = arith.addf %11, %16 : vector<16x32xf32>
    %c0_23 = arith.constant 0 : index
    %c2 = arith.constant 2 : index
    %c0_24 = arith.constant 0 : index
    %18 = vector.load %arg7[%c0_23, %c2, %c0_24] : memref<6x6x32xf32, #tpu.memory_space<vmem>>, vector<4x4x32xf32>
    %19 = vector.shape_cast %18 : vector<4x4x32xf32> to vector<16x32xf32>
    %c2_25 = arith.constant 2 : index
    %c0_26 = arith.constant 0 : index
    %c0_27 = arith.constant 0 : index
    %20 = vector.load %arg2[%c2_25, %c0_26, %c0_27] : memref<9x32x32xf32, #tpu.memory_space<vmem>>, vector<1x32x32xf32>
    %21 = vector.shape_cast %20 : vector<1x32x32xf32> to vector<32x32xf32>
    %cst_28 = arith.constant dense<0.000000e+00> : vector<16x32xf32>
    %22 = tpu.matmul %19, %21, %cst_28 {dimension_numbers = #tpu.dot_dimension_numbers<[1], [0], [0], [1], [0, 0, 1, 1], [], []>} : vector<16x32xf32>, vector<32x32xf32>, vector<16x32xf32> -> vector<16x32xf32>
    %23 = arith.addf %17, %22 : vector<16x32xf32>
    %c1_29 = arith.constant 1 : index
    %c0_30 = arith.constant 0 : index
    %c0_31 = arith.constant 0 : index
    %24 = vector.load %arg7[%c1_29, %c0_30, %c0_31] : memref<6x6x32xf32, #tpu.memory_space<vmem>>, vector<4x4x32xf32>
    %25 = vector.shape_cast %24 : vector<4x4x32xf32> to vector<16x32xf32>
    %c3 = arith.constant 3 : index
    %c0_32 = arith.constant 0 : index
    %c0_33 = arith.constant 0 : index
    %26 = vector.load %arg2[%c3, %c0_32, %c0_33] : memref<9x32x32xf32, #tpu.memory_space<vmem>>, vector<1x32x32xf32>
    %27 = vector.shape_cast %26 : vector<1x32x32xf32> to vector<32x32xf32>
    %cst_34 = arith.constant dense<0.000000e+00> : vector<16x32xf32>
    %28 = tpu.matmul %25, %27, %cst_34 {dimension_numbers = #tpu.dot_dimension_numbers<[1], [0], [0], [1], [0, 0, 1, 1], [], []>} : vector<16x32xf32>, vector<32x32xf32>, vector<16x32xf32> -> vector<16x32xf32>
    %29 = arith.addf %23, %28 : vector<16x32xf32>
    %c1_35 = arith.constant 1 : index
    %c1_36 = arith.constant 1 : index
    %c0_37 = arith.constant 0 : index
    %30 = vector.load %arg7[%c1_35, %c1_36, %c0_37] : memref<6x6x32xf32, #tpu.memory_space<vmem>>, vector<4x4x32xf32>
    %31 = vector.shape_cast %30 : vector<4x4x32xf32> to vector<16x32xf32>
    %c4 = arith.constant 4 : index
    %c0_38 = arith.constant 0 : index
    %c0_39 = arith.constant 0 : index
    %32 = vector.load %arg2[%c4, %c0_38, %c0_39] : memref<9x32x32xf32, #tpu.memory_space<vmem>>, vector<1x32x32xf32>
    %33 = vector.shape_cast %32 : vector<1x32x32xf32> to vector<32x32xf32>
    %cst_40 = arith.constant dense<0.000000e+00> : vector<16x32xf32>
    %34 = tpu.matmul %31, %33, %cst_40 {dimension_numbers = #tpu.dot_dimension_numbers<[1], [0], [0], [1], [0, 0, 1, 1], [], []>} : vector<16x32xf32>, vector<32x32xf32>, vector<16x32xf32> -> vector<16x32xf32>
    %35 = arith.addf %29, %34 : vector<16x32xf32>
    %c1_41 = arith.constant 1 : index
    %c2_42 = arith.constant 2 : index
    %c0_43 = arith.constant 0 : index
    %36 = vector.load %arg7[%c1_41, %c2_42, %c0_43] : memref<6x6x32xf32, #tpu.memory_space<vmem>>, vector<4x4x32xf32>
    %37 = vector.shape_cast %36 : vector<4x4x32xf32> to vector<16x32xf32>
    %c5 = arith.constant 5 : index
    %c0_44 = arith.constant 0 : index
    %c0_45 = arith.constant 0 : index
    %38 = vector.load %arg2[%c5, %c0_44, %c0_45] : memref<9x32x32xf32, #tpu.memory_space<vmem>>, vector<1x32x32xf32>
    %39 = vector.shape_cast %38 : vector<1x32x32xf32> to vector<32x32xf32>
    %cst_46 = arith.constant dense<0.000000e+00> : vector<16x32xf32>
    %40 = tpu.matmul %37, %39, %cst_46 {dimension_numbers = #tpu.dot_dimension_numbers<[1], [0], [0], [1], [0, 0, 1, 1], [], []>} : vector<16x32xf32>, vector<32x32xf32>, vector<16x32xf32> -> vector<16x32xf32>
    %41 = arith.addf %35, %40 : vector<16x32xf32>
    %c2_47 = arith.constant 2 : index
    %c0_48 = arith.constant 0 : index
    %c0_49 = arith.constant 0 : index
    %42 = vector.load %arg7[%c2_47, %c0_48, %c0_49] : memref<6x6x32xf32, #tpu.memory_space<vmem>>, vector<4x4x32xf32>
    %43 = vector.shape_cast %42 : vector<4x4x32xf32> to vector<16x32xf32>
    %c6 = arith.constant 6 : index
    %c0_50 = arith.constant 0 : index
    %c0_51 = arith.constant 0 : index
    %44 = vector.load %arg2[%c6, %c0_50, %c0_51] : memref<9x32x32xf32, #tpu.memory_space<vmem>>, vector<1x32x32xf32>
    %45 = vector.shape_cast %44 : vector<1x32x32xf32> to vector<32x32xf32>
    %cst_52 = arith.constant dense<0.000000e+00> : vector<16x32xf32>
    %46 = tpu.matmul %43, %45, %cst_52 {dimension_numbers = #tpu.dot_dimension_numbers<[1], [0], [0], [1], [0, 0, 1, 1], [], []>} : vector<16x32xf32>, vector<32x32xf32>, vector<16x32xf32> -> vector<16x32xf32>
    %47 = arith.addf %41, %46 : vector<16x32xf32>
    %c2_53 = arith.constant 2 : index
    %c1_54 = arith.constant 1 : index
    %c0_55 = arith.constant 0 : index
    %48 = vector.load %arg7[%c2_53, %c1_54, %c0_55] : memref<6x6x32xf32, #tpu.memory_space<vmem>>, vector<4x4x32xf32>
    %49 = vector.shape_cast %48 : vector<4x4x32xf32> to vector<16x32xf32>
    %c7 = arith.constant 7 : index
    %c0_56 = arith.constant 0 : index
    %c0_57 = arith.constant 0 : index
    %50 = vector.load %arg2[%c7, %c0_56, %c0_57] : memref<9x32x32xf32, #tpu.memory_space<vmem>>, vector<1x32x32xf32>
    %51 = vector.shape_cast %50 : vector<1x32x32xf32> to vector<32x32xf32>
    %cst_58 = arith.constant dense<0.000000e+00> : vector<16x32xf32>
    %52 = tpu.matmul %49, %51, %cst_58 {dimension_numbers = #tpu.dot_dimension_numbers<[1], [0], [0], [1], [0, 0, 1, 1], [], []>} : vector<16x32xf32>, vector<32x32xf32>, vector<16x32xf32> -> vector<16x32xf32>
    %53 = arith.addf %47, %52 : vector<16x32xf32>
    %c2_59 = arith.constant 2 : index
    %c2_60 = arith.constant 2 : index
    %c0_61 = arith.constant 0 : index
    %54 = vector.load %arg7[%c2_59, %c2_60, %c0_61] : memref<6x6x32xf32, #tpu.memory_space<vmem>>, vector<4x4x32xf32>
    %55 = vector.shape_cast %54 : vector<4x4x32xf32> to vector<16x32xf32>
    %c8 = arith.constant 8 : index
    %c0_62 = arith.constant 0 : index
    %c0_63 = arith.constant 0 : index
    %56 = vector.load %arg2[%c8, %c0_62, %c0_63] : memref<9x32x32xf32, #tpu.memory_space<vmem>>, vector<1x32x32xf32>
    %57 = vector.shape_cast %56 : vector<1x32x32xf32> to vector<32x32xf32>
    %cst_64 = arith.constant dense<0.000000e+00> : vector<16x32xf32>
    %58 = tpu.matmul %55, %57, %cst_64 {dimension_numbers = #tpu.dot_dimension_numbers<[1], [0], [0], [1], [0, 0, 1, 1], [], []>} : vector<16x32xf32>, vector<32x32xf32>, vector<16x32xf32> -> vector<16x32xf32>
    %59 = arith.addf %53, %58 : vector<16x32xf32>
    %c0_65 = arith.constant 0 : index
    %c0_66 = arith.constant 0 : index
    %60 = vector.load %arg3[%c0_65, %c0_66] : memref<1x32xf32, #tpu.memory_space<vmem>>, vector<1x32xf32>
    %61 = vector.broadcast %60 : vector<1x32xf32> to vector<16x32xf32>
    %62 = arith.addf %59, %61 : vector<16x32xf32>
    %c0_67 = arith.constant 0 : index
    %c0_68 = arith.constant 0 : index
    %63 = vector.load %arg8[%c0_67, %c0_68] : memref<16x32xf32, #tpu.memory_space<vmem>>, vector<16x32xf32>
    tpu.vector_store %arg8[%c0_67, %c0_68], %62 {strides = array<i32>} : memref<16x32xf32, #tpu.memory_space<vmem>>, vector<16x32xf32>,
    %c0_69 = arith.constant 0 : index
    %c0_70 = arith.constant 0 : index
    %64 = vector.load %arg8[%c0_69, %c0_70] : memref<16x32xf32, #tpu.memory_space<vmem>>, vector<16x32xf32>
    %cst_71 = arith.constant 0.000000e+00 : f32
    %65 = vector.broadcast %cst_71 : f32 to vector<16x32xf32>
    %66 = arith.maximumf %64, %65 : vector<16x32xf32>
    %67 = vector.shape_cast %66 : vector<16x32xf32> to vector<4x4x32xf32>
    %c1_72 = arith.constant 1 : index
    %c1_73 = arith.constant 1 : index
    %c0_74 = arith.constant 0 : index
    %68 = vector.load %arg7[%c1_72, %c1_73, %c0_74] : memref<6x6x32xf32, #tpu.memory_space<vmem>>, vector<4x4x32xf32>
    tpu.vector_store %arg7[%c1_72, %c1_73, %c0_74], %67 {strides = array<i32>} : memref<6x6x32xf32, #tpu.memory_space<vmem>>, vector<4x4x32xf32>,
    %cst_75 = arith.constant 0.000000e+00 : f32
    %69 = vector.broadcast %cst_75 : f32 to vector<16x8xf32>
    %c0_76 = arith.constant 0 : index
    %c0_77 = arith.constant 0 : index
    %c0_78 = arith.constant 0 : index
    %70 = vector.load %arg7[%c0_76, %c0_77, %c0_78] : memref<6x6x32xf32, #tpu.memory_space<vmem>>, vector<4x4x32xf32>
    %71 = vector.shape_cast %70 : vector<4x4x32xf32> to vector<16x32xf32>
    %c0_79 = arith.constant 0 : index
    %c0_80 = arith.constant 0 : index
    %c0_81 = arith.constant 0 : index
    %72 = vector.load %arg4[%c0_79, %c0_80, %c0_81] : memref<9x32x8xf32, #tpu.memory_space<vmem>>, vector<1x32x8xf32>
    %73 = vector.shape_cast %72 : vector<1x32x8xf32> to vector<32x8xf32>
    %cst_82 = arith.constant dense<0.000000e+00> : vector<16x8xf32>
    %74 = tpu.matmul %71, %73, %cst_82 {dimension_numbers = #tpu.dot_dimension_numbers<[1], [0], [0], [1], [0, 0, 1, 1], [], []>} : vector<16x32xf32>, vector<32x8xf32>, vector<16x8xf32> -> vector<16x8xf32>
    %75 = arith.addf %69, %74 : vector<16x8xf32>
    %c0_83 = arith.constant 0 : index
    %c1_84 = arith.constant 1 : index
    %c0_85 = arith.constant 0 : index
    %76 = vector.load %arg7[%c0_83, %c1_84, %c0_85] : memref<6x6x32xf32, #tpu.memory_space<vmem>>, vector<4x4x32xf32>
    %77 = vector.shape_cast %76 : vector<4x4x32xf32> to vector<16x32xf32>
    %c1_86 = arith.constant 1 : index
    %c0_87 = arith.constant 0 : index
    %c0_88 = arith.constant 0 : index
    %78 = vector.load %arg4[%c1_86, %c0_87, %c0_88] : memref<9x32x8xf32, #tpu.memory_space<vmem>>, vector<1x32x8xf32>
    %79 = vector.shape_cast %78 : vector<1x32x8xf32> to vector<32x8xf32>
    %cst_89 = arith.constant dense<0.000000e+00> : vector<16x8xf32>
    %80 = tpu.matmul %77, %79, %cst_89 {dimension_numbers = #tpu.dot_dimension_numbers<[1], [0], [0], [1], [0, 0, 1, 1], [], []>} : vector<16x32xf32>, vector<32x8xf32>, vector<16x8xf32> -> vector<16x8xf32>
    %81 = arith.addf %75, %80 : vector<16x8xf32>
    %c0_90 = arith.constant 0 : index
    %c2_91 = arith.constant 2 : index
    %c0_92 = arith.constant 0 : index
    %82 = vector.load %arg7[%c0_90, %c2_91, %c0_92] : memref<6x6x32xf32, #tpu.memory_space<vmem>>, vector<4x4x32xf32>
    %83 = vector.shape_cast %82 : vector<4x4x32xf32> to vector<16x32xf32>
    %c2_93 = arith.constant 2 : index
    %c0_94 = arith.constant 0 : index
    %c0_95 = arith.constant 0 : index
    %84 = vector.load %arg4[%c2_93, %c0_94, %c0_95] : memref<9x32x8xf32, #tpu.memory_space<vmem>>, vector<1x32x8xf32>
    %85 = vector.shape_cast %84 : vector<1x32x8xf32> to vector<32x8xf32>
    %cst_96 = arith.constant dense<0.000000e+00> : vector<16x8xf32>
    %86 = tpu.matmul %83, %85, %cst_96 {dimension_numbers = #tpu.dot_dimension_numbers<[1], [0], [0], [1], [0, 0, 1, 1], [], []>} : vector<16x32xf32>, vector<32x8xf32>, vector<16x8xf32> -> vector<16x8xf32>
    %87 = arith.addf %81, %86 : vector<16x8xf32>
    %c1_97 = arith.constant 1 : index
    %c0_98 = arith.constant 0 : index
    %c0_99 = arith.constant 0 : index
    %88 = vector.load %arg7[%c1_97, %c0_98, %c0_99] : memref<6x6x32xf32, #tpu.memory_space<vmem>>, vector<4x4x32xf32>
    %89 = vector.shape_cast %88 : vector<4x4x32xf32> to vector<16x32xf32>
    %c3_100 = arith.constant 3 : index
    %c0_101 = arith.constant 0 : index
    %c0_102 = arith.constant 0 : index
    %90 = vector.load %arg4[%c3_100, %c0_101, %c0_102] : memref<9x32x8xf32, #tpu.memory_space<vmem>>, vector<1x32x8xf32>
    %91 = vector.shape_cast %90 : vector<1x32x8xf32> to vector<32x8xf32>
    %cst_103 = arith.constant dense<0.000000e+00> : vector<16x8xf32>
    %92 = tpu.matmul %89, %91, %cst_103 {dimension_numbers = #tpu.dot_dimension_numbers<[1], [0], [0], [1], [0, 0, 1, 1], [], []>} : vector<16x32xf32>, vector<32x8xf32>, vector<16x8xf32> -> vector<16x8xf32>
    %93 = arith.addf %87, %92 : vector<16x8xf32>
    %c1_104 = arith.constant 1 : index
    %c1_105 = arith.constant 1 : index
    %c0_106 = arith.constant 0 : index
    %94 = vector.load %arg7[%c1_104, %c1_105, %c0_106] : memref<6x6x32xf32, #tpu.memory_space<vmem>>, vector<4x4x32xf32>
    %95 = vector.shape_cast %94 : vector<4x4x32xf32> to vector<16x32xf32>
    %c4_107 = arith.constant 4 : index
    %c0_108 = arith.constant 0 : index
    %c0_109 = arith.constant 0 : index
    %96 = vector.load %arg4[%c4_107, %c0_108, %c0_109] : memref<9x32x8xf32, #tpu.memory_space<vmem>>, vector<1x32x8xf32>
    %97 = vector.shape_cast %96 : vector<1x32x8xf32> to vector<32x8xf32>
    %cst_110 = arith.constant dense<0.000000e+00> : vector<16x8xf32>
    %98 = tpu.matmul %95, %97, %cst_110 {dimension_numbers = #tpu.dot_dimension_numbers<[1], [0], [0], [1], [0, 0, 1, 1], [], []>} : vector<16x32xf32>, vector<32x8xf32>, vector<16x8xf32> -> vector<16x8xf32>
    %99 = arith.addf %93, %98 : vector<16x8xf32>
    %c1_111 = arith.constant 1 : index
    %c2_112 = arith.constant 2 : index
    %c0_113 = arith.constant 0 : index
    %100 = vector.load %arg7[%c1_111, %c2_112, %c0_113] : memref<6x6x32xf32, #tpu.memory_space<vmem>>, vector<4x4x32xf32>
    %101 = vector.shape_cast %100 : vector<4x4x32xf32> to vector<16x32xf32>
    %c5_114 = arith.constant 5 : index
    %c0_115 = arith.constant 0 : index
    %c0_116 = arith.constant 0 : index
    %102 = vector.load %arg4[%c5_114, %c0_115, %c0_116] : memref<9x32x8xf32, #tpu.memory_space<vmem>>, vector<1x32x8xf32>
    %103 = vector.shape_cast %102 : vector<1x32x8xf32> to vector<32x8xf32>
    %cst_117 = arith.constant dense<0.000000e+00> : vector<16x8xf32>
    %104 = tpu.matmul %101, %103, %cst_117 {dimension_numbers = #tpu.dot_dimension_numbers<[1], [0], [0], [1], [0, 0, 1, 1], [], []>} : vector<16x32xf32>, vector<32x8xf32>, vector<16x8xf32> -> vector<16x8xf32>
    %105 = arith.addf %99, %104 : vector<16x8xf32>
    %c2_118 = arith.constant 2 : index
    %c0_119 = arith.constant 0 : index
    %c0_120 = arith.constant 0 : index
    %106 = vector.load %arg7[%c2_118, %c0_119, %c0_120] : memref<6x6x32xf32, #tpu.memory_space<vmem>>, vector<4x4x32xf32>
    %107 = vector.shape_cast %106 : vector<4x4x32xf32> to vector<16x32xf32>
    %c6_121 = arith.constant 6 : index
    %c0_122 = arith.constant 0 : index
    %c0_123 = arith.constant 0 : index
    %108 = vector.load %arg4[%c6_121, %c0_122, %c0_123] : memref<9x32x8xf32, #tpu.memory_space<vmem>>, vector<1x32x8xf32>
    %109 = vector.shape_cast %108 : vector<1x32x8xf32> to vector<32x8xf32>
    %cst_124 = arith.constant dense<0.000000e+00> : vector<16x8xf32>
    %110 = tpu.matmul %107, %109, %cst_124 {dimension_numbers = #tpu.dot_dimension_numbers<[1], [0], [0], [1], [0, 0, 1, 1], [], []>} : vector<16x32xf32>, vector<32x8xf32>, vector<16x8xf32> -> vector<16x8xf32>
    %111 = arith.addf %105, %110 : vector<16x8xf32>
    %c2_125 = arith.constant 2 : index
    %c1_126 = arith.constant 1 : index
    %c0_127 = arith.constant 0 : index
    %112 = vector.load %arg7[%c2_125, %c1_126, %c0_127] : memref<6x6x32xf32, #tpu.memory_space<vmem>>, vector<4x4x32xf32>
    %113 = vector.shape_cast %112 : vector<4x4x32xf32> to vector<16x32xf32>
    %c7_128 = arith.constant 7 : index
    %c0_129 = arith.constant 0 : index
    %c0_130 = arith.constant 0 : index
    %114 = vector.load %arg4[%c7_128, %c0_129, %c0_130] : memref<9x32x8xf32, #tpu.memory_space<vmem>>, vector<1x32x8xf32>
    %115 = vector.shape_cast %114 : vector<1x32x8xf32> to vector<32x8xf32>
    %cst_131 = arith.constant dense<0.000000e+00> : vector<16x8xf32>
    %116 = tpu.matmul %113, %115, %cst_131 {dimension_numbers = #tpu.dot_dimension_numbers<[1], [0], [0], [1], [0, 0, 1, 1], [], []>} : vector<16x32xf32>, vector<32x8xf32>, vector<16x8xf32> -> vector<16x8xf32>
    %117 = arith.addf %111, %116 : vector<16x8xf32>
    %c2_132 = arith.constant 2 : index
    %c2_133 = arith.constant 2 : index
    %c0_134 = arith.constant 0 : index
    %118 = vector.load %arg7[%c2_132, %c2_133, %c0_134] : memref<6x6x32xf32, #tpu.memory_space<vmem>>, vector<4x4x32xf32>
    %119 = vector.shape_cast %118 : vector<4x4x32xf32> to vector<16x32xf32>
    %c8_135 = arith.constant 8 : index
    %c0_136 = arith.constant 0 : index
    %c0_137 = arith.constant 0 : index
    %120 = vector.load %arg4[%c8_135, %c0_136, %c0_137] : memref<9x32x8xf32, #tpu.memory_space<vmem>>, vector<1x32x8xf32>
    %121 = vector.shape_cast %120 : vector<1x32x8xf32> to vector<32x8xf32>
    %cst_138 = arith.constant dense<0.000000e+00> : vector<16x8xf32>
    %122 = tpu.matmul %119, %121, %cst_138 {dimension_numbers = #tpu.dot_dimension_numbers<[1], [0], [0], [1], [0, 0, 1, 1], [], []>} : vector<16x32xf32>, vector<32x8xf32>, vector<16x8xf32> -> vector<16x8xf32>
    %123 = arith.addf %117, %122 : vector<16x8xf32>
    %cst_139 = arith.constant 0.000000e+00 : f32
    %124 = vector.broadcast %cst_139 : f32 to vector<16x8xf32>
    %125 = arith.maximumf %123, %124 : vector<16x8xf32>
    %c0_140 = arith.constant 0 : index
    %c0_141 = arith.constant 0 : index
    %126 = vector.load %arg8[%c0_140, %c0_141] : memref<16x32xf32, #tpu.memory_space<vmem>>, vector<16x32xf32>
    %c0_142 = arith.constant 0 : index
    %c0_143 = arith.constant 0 : index
    %127 = vector.load %arg5[%c0_142, %c0_143] : memref<8x32xf32, #tpu.memory_space<vmem>>, vector<8x32xf32>
    %cst_144 = arith.constant dense<0.000000e+00> : vector<16x32xf32>
    %128 = tpu.matmul %125, %127, %cst_144 {dimension_numbers = #tpu.dot_dimension_numbers<[1], [0], [0], [1], [0, 0, 1, 1], [], []>} : vector<16x8xf32>, vector<8x32xf32>, vector<16x32xf32> -> vector<16x32xf32>
    %129 = arith.addf %126, %128 : vector<16x32xf32>
    %c0_145 = arith.constant 0 : index
    %c0_146 = arith.constant 0 : index
    %130 = vector.load %arg8[%c0_145, %c0_146] : memref<16x32xf32, #tpu.memory_space<vmem>>, vector<16x32xf32>
    tpu.vector_store %arg8[%c0_145, %c0_146], %129 {strides = array<i32>} : memref<16x32xf32, #tpu.memory_space<vmem>>, vector<16x32xf32>,
    %c0_147 = arith.constant 0 : index
    %c0_148 = arith.constant 0 : index
    %131 = vector.load %arg8[%c0_147, %c0_148] : memref<16x32xf32, #tpu.memory_space<vmem>>, vector<16x32xf32>
    %cst_149 = arith.constant 0.000000e+00 : f32
    %132 = vector.broadcast %cst_149 : f32 to vector<16x32xf32>
    %133 = arith.maximumf %131, %132 : vector<16x32xf32>
    %134 = vector.shape_cast %133 : vector<16x32xf32> to vector<4x4x32xf32>
    %c1_150 = arith.constant 1 : index
    %c1_151 = arith.constant 1 : index
    %c0_152 = arith.constant 0 : index
    %135 = vector.load %arg7[%c1_150, %c1_151, %c0_152] : memref<6x6x32xf32, #tpu.memory_space<vmem>>, vector<4x4x32xf32>
    tpu.vector_store %arg7[%c1_150, %c1_151, %c0_152], %134 {strides = array<i32>} : memref<6x6x32xf32, #tpu.memory_space<vmem>>, vector<4x4x32xf32>,
    %cst_153 = arith.constant 0.000000e+00 : f32
    %136 = vector.broadcast %cst_153 : f32 to vector<16x8xf32>
    %c0_154 = arith.constant 0 : index
    %c0_155 = arith.constant 0 : index
    %c0_156 = arith.constant 0 : index
    %137 = vector.load %arg7[%c0_154, %c0_155, %c0_156] : memref<6x6x32xf32, #tpu.memory_space<vmem>>, vector<4x4x32xf32>
    %138 = vector.shape_cast %137 : vector<4x4x32xf32> to vector<16x32xf32>
    %c0_157 = arith.constant 0 : index
    %c0_158 = arith.constant 0 : index
    %c0_159 = arith.constant 0 : index
    %139 = vector.load %arg4[%c0_157, %c0_158, %c0_159] : memref<9x32x8xf32, #tpu.memory_space<vmem>>, vector<1x32x8xf32>
    %140 = vector.shape_cast %139 : vector<1x32x8xf32> to vector<32x8xf32>
    %cst_160 = arith.constant dense<0.000000e+00> : vector<16x8xf32>
    %141 = tpu.matmul %138, %140, %cst_160 {dimension_numbers = #tpu.dot_dimension_numbers<[1], [0], [0], [1], [0, 0, 1, 1], [], []>} : vector<16x32xf32>, vector<32x8xf32>, vector<16x8xf32> -> vector<16x8xf32>
    %142 = arith.addf %136, %141 : vector<16x8xf32>
    %c0_161 = arith.constant 0 : index
    %c1_162 = arith.constant 1 : index
    %c0_163 = arith.constant 0 : index
    %143 = vector.load %arg7[%c0_161, %c1_162, %c0_163] : memref<6x6x32xf32, #tpu.memory_space<vmem>>, vector<4x4x32xf32>
    %144 = vector.shape_cast %143 : vector<4x4x32xf32> to vector<16x32xf32>
    %c1_164 = arith.constant 1 : index
    %c0_165 = arith.constant 0 : index
    %c0_166 = arith.constant 0 : index
    %145 = vector.load %arg4[%c1_164, %c0_165, %c0_166] : memref<9x32x8xf32, #tpu.memory_space<vmem>>, vector<1x32x8xf32>
    %146 = vector.shape_cast %145 : vector<1x32x8xf32> to vector<32x8xf32>
    %cst_167 = arith.constant dense<0.000000e+00> : vector<16x8xf32>
    %147 = tpu.matmul %144, %146, %cst_167 {dimension_numbers = #tpu.dot_dimension_numbers<[1], [0], [0], [1], [0, 0, 1, 1], [], []>} : vector<16x32xf32>, vector<32x8xf32>, vector<16x8xf32> -> vector<16x8xf32>
    %148 = arith.addf %142, %147 : vector<16x8xf32>
    %c0_168 = arith.constant 0 : index
    %c2_169 = arith.constant 2 : index
    %c0_170 = arith.constant 0 : index
    %149 = vector.load %arg7[%c0_168, %c2_169, %c0_170] : memref<6x6x32xf32, #tpu.memory_space<vmem>>, vector<4x4x32xf32>
    %150 = vector.shape_cast %149 : vector<4x4x32xf32> to vector<16x32xf32>
    %c2_171 = arith.constant 2 : index
    %c0_172 = arith.constant 0 : index
    %c0_173 = arith.constant 0 : index
    %151 = vector.load %arg4[%c2_171, %c0_172, %c0_173] : memref<9x32x8xf32, #tpu.memory_space<vmem>>, vector<1x32x8xf32>
    %152 = vector.shape_cast %151 : vector<1x32x8xf32> to vector<32x8xf32>
    %cst_174 = arith.constant dense<0.000000e+00> : vector<16x8xf32>
    %153 = tpu.matmul %150, %152, %cst_174 {dimension_numbers = #tpu.dot_dimension_numbers<[1], [0], [0], [1], [0, 0, 1, 1], [], []>} : vector<16x32xf32>, vector<32x8xf32>, vector<16x8xf32> -> vector<16x8xf32>
    %154 = arith.addf %148, %153 : vector<16x8xf32>
    %c1_175 = arith.constant 1 : index
    %c0_176 = arith.constant 0 : index
    %c0_177 = arith.constant 0 : index
    %155 = vector.load %arg7[%c1_175, %c0_176, %c0_177] : memref<6x6x32xf32, #tpu.memory_space<vmem>>, vector<4x4x32xf32>
    %156 = vector.shape_cast %155 : vector<4x4x32xf32> to vector<16x32xf32>
    %c3_178 = arith.constant 3 : index
    %c0_179 = arith.constant 0 : index
    %c0_180 = arith.constant 0 : index
    %157 = vector.load %arg4[%c3_178, %c0_179, %c0_180] : memref<9x32x8xf32, #tpu.memory_space<vmem>>, vector<1x32x8xf32>
    %158 = vector.shape_cast %157 : vector<1x32x8xf32> to vector<32x8xf32>
    %cst_181 = arith.constant dense<0.000000e+00> : vector<16x8xf32>
    %159 = tpu.matmul %156, %158, %cst_181 {dimension_numbers = #tpu.dot_dimension_numbers<[1], [0], [0], [1], [0, 0, 1, 1], [], []>} : vector<16x32xf32>, vector<32x8xf32>, vector<16x8xf32> -> vector<16x8xf32>
    %160 = arith.addf %154, %159 : vector<16x8xf32>
    %c1_182 = arith.constant 1 : index
    %c1_183 = arith.constant 1 : index
    %c0_184 = arith.constant 0 : index
    %161 = vector.load %arg7[%c1_182, %c1_183, %c0_184] : memref<6x6x32xf32, #tpu.memory_space<vmem>>, vector<4x4x32xf32>
    %162 = vector.shape_cast %161 : vector<4x4x32xf32> to vector<16x32xf32>
    %c4_185 = arith.constant 4 : index
    %c0_186 = arith.constant 0 : index
    %c0_187 = arith.constant 0 : index
    %163 = vector.load %arg4[%c4_185, %c0_186, %c0_187] : memref<9x32x8xf32, #tpu.memory_space<vmem>>, vector<1x32x8xf32>
    %164 = vector.shape_cast %163 : vector<1x32x8xf32> to vector<32x8xf32>
    %cst_188 = arith.constant dense<0.000000e+00> : vector<16x8xf32>
    %165 = tpu.matmul %162, %164, %cst_188 {dimension_numbers = #tpu.dot_dimension_numbers<[1], [0], [0], [1], [0, 0, 1, 1], [], []>} : vector<16x32xf32>, vector<32x8xf32>, vector<16x8xf32> -> vector<16x8xf32>
    %166 = arith.addf %160, %165 : vector<16x8xf32>
    %c1_189 = arith.constant 1 : index
    %c2_190 = arith.constant 2 : index
    %c0_191 = arith.constant 0 : index
    %167 = vector.load %arg7[%c1_189, %c2_190, %c0_191] : memref<6x6x32xf32, #tpu.memory_space<vmem>>, vector<4x4x32xf32>
    %168 = vector.shape_cast %167 : vector<4x4x32xf32> to vector<16x32xf32>
    %c5_192 = arith.constant 5 : index
    %c0_193 = arith.constant 0 : index
    %c0_194 = arith.constant 0 : index
    %169 = vector.load %arg4[%c5_192, %c0_193, %c0_194] : memref<9x32x8xf32, #tpu.memory_space<vmem>>, vector<1x32x8xf32>
    %170 = vector.shape_cast %169 : vector<1x32x8xf32> to vector<32x8xf32>
    %cst_195 = arith.constant dense<0.000000e+00> : vector<16x8xf32>
    %171 = tpu.matmul %168, %170, %cst_195 {dimension_numbers = #tpu.dot_dimension_numbers<[1], [0], [0], [1], [0, 0, 1, 1], [], []>} : vector<16x32xf32>, vector<32x8xf32>, vector<16x8xf32> -> vector<16x8xf32>
    %172 = arith.addf %166, %171 : vector<16x8xf32>
    %c2_196 = arith.constant 2 : index
    %c0_197 = arith.constant 0 : index
    %c0_198 = arith.constant 0 : index
    %173 = vector.load %arg7[%c2_196, %c0_197, %c0_198] : memref<6x6x32xf32, #tpu.memory_space<vmem>>, vector<4x4x32xf32>
    %174 = vector.shape_cast %173 : vector<4x4x32xf32> to vector<16x32xf32>
    %c6_199 = arith.constant 6 : index
    %c0_200 = arith.constant 0 : index
    %c0_201 = arith.constant 0 : index
    %175 = vector.load %arg4[%c6_199, %c0_200, %c0_201] : memref<9x32x8xf32, #tpu.memory_space<vmem>>, vector<1x32x8xf32>
    %176 = vector.shape_cast %175 : vector<1x32x8xf32> to vector<32x8xf32>
    %cst_202 = arith.constant dense<0.000000e+00> : vector<16x8xf32>
    %177 = tpu.matmul %174, %176, %cst_202 {dimension_numbers = #tpu.dot_dimension_numbers<[1], [0], [0], [1], [0, 0, 1, 1], [], []>} : vector<16x32xf32>, vector<32x8xf32>, vector<16x8xf32> -> vector<16x8xf32>
    %178 = arith.addf %172, %177 : vector<16x8xf32>
    %c2_203 = arith.constant 2 : index
    %c1_204 = arith.constant 1 : index
    %c0_205 = arith.constant 0 : index
    %179 = vector.load %arg7[%c2_203, %c1_204, %c0_205] : memref<6x6x32xf32, #tpu.memory_space<vmem>>, vector<4x4x32xf32>
    %180 = vector.shape_cast %179 : vector<4x4x32xf32> to vector<16x32xf32>
    %c7_206 = arith.constant 7 : index
    %c0_207 = arith.constant 0 : index
    %c0_208 = arith.constant 0 : index
    %181 = vector.load %arg4[%c7_206, %c0_207, %c0_208] : memref<9x32x8xf32, #tpu.memory_space<vmem>>, vector<1x32x8xf32>
    %182 = vector.shape_cast %181 : vector<1x32x8xf32> to vector<32x8xf32>
    %cst_209 = arith.constant dense<0.000000e+00> : vector<16x8xf32>
    %183 = tpu.matmul %180, %182, %cst_209 {dimension_numbers = #tpu.dot_dimension_numbers<[1], [0], [0], [1], [0, 0, 1, 1], [], []>} : vector<16x32xf32>, vector<32x8xf32>, vector<16x8xf32> -> vector<16x8xf32>
    %184 = arith.addf %178, %183 : vector<16x8xf32>
    %c2_210 = arith.constant 2 : index
    %c2_211 = arith.constant 2 : index
    %c0_212 = arith.constant 0 : index
    %185 = vector.load %arg7[%c2_210, %c2_211, %c0_212] : memref<6x6x32xf32, #tpu.memory_space<vmem>>, vector<4x4x32xf32>
    %186 = vector.shape_cast %185 : vector<4x4x32xf32> to vector<16x32xf32>
    %c8_213 = arith.constant 8 : index
    %c0_214 = arith.constant 0 : index
    %c0_215 = arith.constant 0 : index
    %187 = vector.load %arg4[%c8_213, %c0_214, %c0_215] : memref<9x32x8xf32, #tpu.memory_space<vmem>>, vector<1x32x8xf32>
    %188 = vector.shape_cast %187 : vector<1x32x8xf32> to vector<32x8xf32>
    %cst_216 = arith.constant dense<0.000000e+00> : vector<16x8xf32>
    %189 = tpu.matmul %186, %188, %cst_216 {dimension_numbers = #tpu.dot_dimension_numbers<[1], [0], [0], [1], [0, 0, 1, 1], [], []>} : vector<16x32xf32>, vector<32x8xf32>, vector<16x8xf32> -> vector<16x8xf32>
    %190 = arith.addf %184, %189 : vector<16x8xf32>
    %cst_217 = arith.constant 0.000000e+00 : f32
    %191 = vector.broadcast %cst_217 : f32 to vector<16x8xf32>
    %192 = arith.maximumf %190, %191 : vector<16x8xf32>
    %c0_218 = arith.constant 0 : index
    %c0_219 = arith.constant 0 : index
    %193 = vector.load %arg8[%c0_218, %c0_219] : memref<16x32xf32, #tpu.memory_space<vmem>>, vector<16x32xf32>
    %c0_220 = arith.constant 0 : index
    %c0_221 = arith.constant 0 : index
    %194 = vector.load %arg5[%c0_220, %c0_221] : memref<8x32xf32, #tpu.memory_space<vmem>>, vector<8x32xf32>
    %cst_222 = arith.constant dense<0.000000e+00> : vector<16x32xf32>
    %195 = tpu.matmul %192, %194, %cst_222 {dimension_numbers = #tpu.dot_dimension_numbers<[1], [0], [0], [1], [0, 0, 1, 1], [], []>} : vector<16x8xf32>, vector<8x32xf32>, vector<16x32xf32> -> vector<16x32xf32>
    %196 = arith.addf %193, %195 : vector<16x32xf32>
    %c0_223 = arith.constant 0 : index
    %c0_224 = arith.constant 0 : index
    %197 = vector.load %arg8[%c0_223, %c0_224] : memref<16x32xf32, #tpu.memory_space<vmem>>, vector<16x32xf32>
    tpu.vector_store %arg8[%c0_223, %c0_224], %196 {strides = array<i32>} : memref<16x32xf32, #tpu.memory_space<vmem>>, vector<16x32xf32>,
    %c0_225 = arith.constant 0 : index
    %c0_226 = arith.constant 0 : index
    %198 = vector.load %arg8[%c0_225, %c0_226] : memref<16x32xf32, #tpu.memory_space<vmem>>, vector<16x32xf32>
    %cst_227 = arith.constant 0.000000e+00 : f32
    %199 = vector.broadcast %cst_227 : f32 to vector<16x32xf32>
    %200 = arith.maximumf %198, %199 : vector<16x32xf32>
    %201 = vector.shape_cast %200 : vector<16x32xf32> to vector<4x4x32xf32>
    %c0_228 = arith.constant 0 : index
    %c0_229 = arith.constant 0 : index
    %c0_230 = arith.constant 0 : index
    %c0_231 = arith.constant 0 : index
    %202 = vector.load %arg6[%c0_228, %c0_229, %c0_230, %c0_231] : memref<1x4x4x32xf32, #tpu.memory_space<vmem>>, vector<1x4x4x32xf32>
    %203 = vector.shape_cast %202 : vector<1x4x4x32xf32> to vector<4x4x32xf32>
    %204 = vector.shape_cast %201 : vector<4x4x32xf32> to vector<1x4x4x32xf32>
    tpu.vector_store %arg6[%c0_228, %c0_229, %c0_230, %c0_231], %204 {strides = array<i32>} : memref<1x4x4x32xf32, #tpu.memory_space<vmem>>, vector<1x4x4x32xf32>,
    return
  }
  func.func @transform_0(%arg0: i32) -> (i32, i32, i32, i32) {
    %c0_i32 = arith.constant 0 : i32
    %c0_i32_0 = arith.constant 0 : i32
    %c0_i32_1 = arith.constant 0 : i32
    %c0_i32_2 = arith.constant 0 : i32
    return %arg0, %c0_i32, %c0_i32_0, %c0_i32_1 : i32, i32, i32, i32
  }
  func.func @transform_1(%arg0: i32) -> (i32, i32, i32) {
    %c0_i32 = arith.constant 0 : i32
    %c0_i32_0 = arith.constant 0 : i32
    %c0_i32_1 = arith.constant 0 : i32
    %c0_i32_2 = arith.constant 0 : i32
    return %c0_i32, %c0_i32_0, %c0_i32_1 : i32, i32, i32
  }
  func.func @transform_2(%arg0: i32) -> (i32, i32) {
    %c0_i32 = arith.constant 0 : i32
    %c0_i32_0 = arith.constant 0 : i32
    %c0_i32_1 = arith.constant 0 : i32
    return %c0_i32, %c0_i32_0 : i32, i32
  }
  func.func @transform_3(%arg0: i32) -> (i32, i32, i32) {
    %c0_i32 = arith.constant 0 : i32
    %c0_i32_0 = arith.constant 0 : i32
    %c0_i32_1 = arith.constant 0 : i32
    %c0_i32_2 = arith.constant 0 : i32
    return %c0_i32, %c0_i32_0, %c0_i32_1 : i32, i32, i32
  }
  func.func @transform_4(%arg0: i32) -> (i32, i32) {
    %c0_i32 = arith.constant 0 : i32
    %c0_i32_0 = arith.constant 0 : i32
    %c0_i32_1 = arith.constant 0 : i32
    return %c0_i32, %c0_i32_0 : i32, i32
  }
  func.func @transform_5(%arg0: i32) -> (i32, i32, i32, i32) {
    %c0_i32 = arith.constant 0 : i32
    %c0_i32_0 = arith.constant 0 : i32
    %c0_i32_1 = arith.constant 0 : i32
    %c0_i32_2 = arith.constant 0 : i32
    return %arg0, %c0_i32, %c0_i32_0, %c0_i32_1 : i32, i32, i32, i32
  }
}

</mosaic_0001>

<bundles_post_ra>
// kernel: encoder_forward_pallas.4
= control target key start
LH: loop header
LB: loop body
LE: loop exit
PB: predicated region body
PF: predicated region fallthrough
CT: control target
= control target key end

     0   :  { %s2230_s12 = smov 0   ;;  %s2417_s0 = inlined_call_operand.vmem [shape: f32[8,5,5,16], index: 0, kind: input, shape index: {}]   ;;  %s2418_s1 = inlined_call_operand.vmem [shape: f32[16,16,32], index: 1, kind: input, shape index: {}]   ;;  %s2419_s2 = inlined_call_operand.vmem [shape: f32[1,32], index: 2, kind: input, shape index: {}]   ;;  %s2420_s3 = inlined_call_operand.vmem [shape: f32[2,4,4,32], index: 3, kind: output, shape index: {}]  }
   0x1 LB: > { %s2236_s13 = sadd.s32 4294967295, %s2208_s12   ;;  %p1764_p0 = scmp.ge.s32.totalorder %s2208_s12, 1  ;;  %s2208_s12 = sphi %s2230_s12, %s13_s12  }
   0x2   : > { %p139_p1 = scmp.lt.s32.totalorder %s2208_s12, 3 }
   0x4   : > { %p140_p2 = pnand %p1764_p0, %p139_p1 }
   0x5   : > { %v1773_v0 = vld [vmem:[%s2418_s1 + $0x10] sm:$0xff] (!%p140_p2)  ;;  %v1774_v1 = vld [vmem:[%s2418_s1 + $0x18] sm:$0xff] (!%p140_p2)  ;;  %v1827_v2 = vld [vmem:[%s2418_s1 + $0x80] sm:$0xff] (!%p140_p2)  ;;  %s1765_s20 = sshll.u32 (!%p140_p2), %s2236_s13, 2  ;;  %vm196_vm0 = vcmask (!%p140_p2), 130048   ;;  %p171_p4 = scmp.lt.s32.totalorder (!%p140_p2), %s2236_s13, 1 }
   0x6   : > { %143 = sbr.rel (%p140_p2) target bundleno = 298 (0x12a), region = 32  ;;  %v2067_v3 = vpack.c.bf16 (!%p140_p2), %v1774_v1, %v1773_v0  ;;  %v1828_v4 = vld [vmem:[%s2418_s1 + $0x88] sm:$0xff] (!%p140_p2)  ;;  %p165_p3 = scmp.lt.s32.totalorder (!%p140_p2), %s1765_s20, 7  ;;  %v180_v5 = vld [vmem:[%s2418_s1] sm:$0xff] (!%p140_p2)  ;;  %v1835_v9 = vld [vmem:[%s2418_s1 + $0x90] sm:$0xff] (!%p140_p2)  ;;  %vm1700_vm1 = vcmask (!%p140_p2), 257024  }
   0x7   : > { %v181_v6 = vld [vmem:[%s2418_s1 + $0x8] sm:$0xff] (!%p140_p2)  ;;  %v2099_v7 = vpack.c.bf16 (!%p140_p2), %v1828_v4, %v1827_v2  ;;  %v1836_v10 = vld [vmem:[%s2418_s1 + $0x98] sm:$0xff] (!%p140_p2)  ;;  %v1779_v12 = vld [vmem:[%s2418_s1 + $0x20] sm:$0xff] (!%p140_p2) }
   0x8   : > { %v2071_v8 = vpack.c.bf16 (!%p140_p2), %v181_v6, %v180_v5  ;;  %2068 = vmatprep.subr.bf16.mxu1 (!%p140_p2), %v2067_v3  ;;  %v2103_v11 = vpack.c.bf16 (!%p140_p2), %v1836_v10, %v1835_v9  ;;  %v1780_v13 = vld [vmem:[%s2418_s1 + $0x28] sm:$0xff] (!%p140_p2)  ;;  %v1843_v14 = vld [vmem:[%s2418_s1 + $0xa0] sm:$0xff] (!%p140_p2)  ;;  %v1787_v24 = vld [vmem:[%s2418_s1 + $0x30] sm:$0xff] (!%p140_p2) }
   0x9   : > { %2100 = vmatprep.subr.bf16.mxu0 (!%p140_p2), %v2099_v7  ;;  %2070 = vmatpush3.bf16.msra.mxu1 (!%p140_p2), %v2067_v3  ;;  %v1844_v15 = vld [vmem:[%s2418_s1 + $0xa8] sm:$0xff] (!%p140_p2)  ;;  %v2075_v20 = vpack.c.bf16 (!%p140_p2), %v1780_v13, %v1779_v12  ;;  %v1788_v25 = vld [vmem:[%s2418_s1 + $0x38] sm:$0xff] (!%p140_p2)  ;;  %v1851_v26 = vld [vmem:[%s2418_s1 + $0xb0] sm:$0xff] (!%p140_p2) }
   0xa   : > { %2102 = vmatpush3.bf16.msra.mxu0 (!%p140_p2), %v2099_v7  ;;  %2072 = vmatprep.subr.bf16.mxu1 (!%p140_p2), %v2071_v8  ;;  %v2107_v22 = vpack.c.bf16 (!%p140_p2), %v1844_v15, %v1843_v14  ;;  %v1852_v27 = vld [vmem:[%s2418_s1 + $0xb8] sm:$0xff] (!%p140_p2)  ;;  %v2079_v31 = vpack.c.bf16 (!%p140_p2), %v1788_v25, %v1787_v24  ;;  %v1795_v34 = vld [vmem:[%s2418_s1 + $0x40] sm:$0xff] (!%p140_p2)  ;;  %v1796_v35 = vld [vmem:[%s2418_s1 + $0x48] sm:$0xff] (!%p140_p2) }
   0xb   : > { %2104 = vmatprep.subr.bf16.mxu0 (!%p140_p2), %v2103_v11  ;;  %v2111_v33 = vpack.c.bf16 (!%p140_p2), %v1852_v27, %v1851_v26  ;;  %v1859_v36 = vld [vmem:[%s2418_s1 + $0xc0] sm:$0xff] (!%p140_p2)  ;;  %v1860_v37 = vld [vmem:[%s2418_s1 + $0xc8] sm:$0xff] (!%p140_p2)  ;;  %v2083_v41 = vpack.c.bf16 (!%p140_p2), %v1796_v35, %v1795_v34  ;;  %v1803_v44 = vld [vmem:[%s2418_s1 + $0x50] sm:$0xff] (!%p140_p2) }
   0xc   : > { %v2115_v43 = vpack.c.bf16 (!%p140_p2), %v1860_v37, %v1859_v36  ;;  %v1804_v45 = vld [vmem:[%s2418_s1 + $0x58] sm:$0xff] (!%p140_p2)  ;;  %v1867_v46 = vld [vmem:[%s2418_s1 + $0xd0] sm:$0xff] (!%p140_p2)  ;;  %v1811_v55 = vld [vmem:[%s2418_s1 + $0x60] sm:$0xff] (!%p140_p2) }
   0xd   : > { %s2422_s20 = smov (!%p165_p3, %s1765_s20), 7  ;;  %v1868_v47 = vld [vmem:[%s2418_s1 + $0xd8] sm:$0xff]  ;;  %v2087_v51 = vpack.c.bf16 %v1804_v45, %v1803_v44  ;;  %v1812_v57 = vld [vmem:[%s2418_s1 + $0x68] sm:$0xff]  ;;  %v1875_v58 = vld [vmem:[%s2418_s1 + $0xe0] sm:$0xff]  ;;  %s2424_s13 = smov (!%p171_p4, %s2236_s13), 1 }
   0xe   : > { %s2161_s4 = smul.u32 40, %s2422_s20  ;;  %v2119_v53 = vpack.c.bf16 %v1868_v47, %v1867_v46  ;;  %v1876_v59 = vld [vmem:[%s2418_s1 + $0xe8] sm:$0xff]  ;;  %v2091_v61 = vpack.c.bf16 %v1812_v57, %v1811_v55  ;;  %v1819_v1 = vld [vmem:[%s2418_s1 + $0x70] sm:$0xff]  ;;  %v1820_v2 = vld [vmem:[%s2418_s1 + $0x78] sm:$0xff]  ;;  %s1890_s10 = sshll.u32 %s2424_s13, 4 }
   0xf   : > { %v2123_v63 = vpack.c.bf16 %v1876_v59, %v1875_v58  ;;  %v1883_v4 = vld [vmem:[%s2418_s1 + $0xf0] sm:$0xff]  ;;  %v1884_v5 = vld [vmem:[%s2418_s1 + $0xf8] sm:$0xff]  ;;  %v2095_v7 = vpack.c.bf16 %v1820_v2, %v1819_v1  ;;  %s175_s14 = scalar_lea.vmem %s2420_s3, %s1890_s10 }
  0x10   : > { %s2271_s9 = scalar_lea.vmem %s2417_s0, %s2161_s4  ;;  %v2127_v9 = vpack.c.bf16 %v1884_v5, %v1883_v4 }
  0x11   : > { %v2170_v16 = vld [vmem:[%s2271_s9 + $0x28] ss:$8 sps:$4 sm:$0xff]   ;;  %v2172_v18 = vld [vmem:[%s2271_s9 + $0x38] ss:$8 sps:$4 sm:$0xff]  }
  0x12   : > { %v2171_v17 = vld [vmem:[%s2271_s9 + $0x8] ss:$8 sps:$4 sm:$0xff]   ;;  %1959 = vmatprep.mubr.msk.f32.mxu1 %vm196_vm0, %v2170_v16  ;;  %v2173_v19 = vld [vmem:[%s2271_s9 + $0x18] ss:$8 sps:$4 sm:$0xff]  }
  0x13   : > { %2015 = vmatprep.mubr.msk.f32.mxu0 %vm196_vm0, %v2171_v17  ;;  %1960 = vmatmul.mubr.msk.f32.vlgmr.msra.gmra.mrb[0].mxu1 %vm196_vm0, %v2172_v18  ;;  %v2174_v21 = vld [vmem:[%s2271_s9] ss:$8 sps:$4 sm:$0xff]   ;;  %v2175_v23 = vld [vmem:[%s2271_s9 + $0x30] ss:$8 sps:$4 sm:$0xff]  }
  0x14   : > { %2074 = vmatpush3.bf16.msra.mxu1 %v2071_v8  ;;  %2016 = vmatmul.mubr.msk.f32.vlgmr.msra.gmra.mrb[0].mxu0 %vm196_vm0, %v2173_v19  ;;  %v2176_v28 = vld [vmem:[%s2271_s9 + $0x10] ss:$8 sps:$4 sm:$0xff]   ;;  %v2177_v29 = vld [vmem:[%s2271_s9 + $0x40] ss:$8 sps:$4 sm:$0xff]  }
  0x15   : > { %2106 = vmatpush3.bf16.msra.mxu0 %v2103_v11  ;;  %1966 = vmatprep.mubr.msk.f32.mxu1 %vm196_vm0, %v2174_v21  ;;  %v2178_v30 = vld [vmem:[%s2271_s9 + $0x1] ss:$8 sps:$4 sm:$0xff]   ;;  %v2180_v38 = vld [vmem:[%s2271_s9 + $0x11] ss:$8 sps:$4 sm:$0xff]   ;;  %v1887_v18 = vld [vmem:[%s2419_s2] ss:$0 sm:$0xff] }
  0x16   : > { %2076 = vmatprep.subr.bf16.mxu1 %v2075_v20  ;;  %2022 = vmatprep.mubr.msk.f32.mxu0 %vm196_vm0, %v2175_v23  ;;  %v2179_v32 = vld [vmem:[%s2271_s9 + $0x9] ss:$8 sps:$4 sm:$0xff]   ;;  %v2181_v39 = vld [vmem:[%s2271_s9 + $0x19] ss:$8 sps:$4 sm:$0xff]  }
  0x17   : > { %2108 = vmatprep.subr.bf16.mxu0 %v2107_v22  ;;  %v2182_v40 = vld [vmem:[%s2271_s9 + $0x29] ss:$8 sps:$4 sm:$0xff]   ;;  %v2184_v48 = vld [vmem:[%s2271_s9 + $0x39] ss:$8 sps:$4 sm:$0xff]  }
  0x18   : > { %v2183_v42 = vld [vmem:[%s2271_s9 + $0x31] ss:$8 sps:$4 sm:$0xff]   ;;  %v2185_v49 = vld [vmem:[%s2271_s9 + $0x41] ss:$8 sps:$4 sm:$0xff]  }
  0x19   : > { %v2186_v50 = vld [vmem:[%s2271_s9 + $0x50] ss:$8 sps:$4 sm:$0xff]   ;;  %v2188_v54 = vld [vmem:[%s2271_s9 + $0x60] ss:$8 sps:$4 sm:$0xff]  }
  0x1a   : > { %v2187_v52 = vld [vmem:[%s2271_s9 + $0x58] ss:$8 sps:$4 sm:$0xff]   ;;  %v2189_v56 = vld [vmem:[%s2271_s9 + $0x68] ss:$8 sps:$4 sm:$0xff]  }
  0x1b   : > { %1967 = vmatmul.mubr.msk.f32.vlgmr.msra.gmra.mrb[0].mxu1 %vm196_vm0, %v2176_v28  ;;  %v2190_v60 = vld [vmem:[%s2271_s9 + $0x78] ss:$8 sps:$4 sm:$0xff]   ;;  %v2192_v0 = vld [vmem:[%s2271_s9 + $0x88] ss:$8 sps:$4 sm:$0xff]  }
  0x1c   : > { %2078 = vmatpush3.bf16.msra.mxu1 %v2075_v20  ;;  %2023 = vmatmul.mubr.msk.f32.vlgmr.msra.gmra.mrb[0].mxu0 %vm196_vm0, %v2177_v29  ;;  %v2191_v62 = vld [vmem:[%s2271_s9 + $0x80] ss:$8 sps:$4 sm:$0xff]   ;;  %v2193_v3 = vld [vmem:[%s2271_s9 + $0x90] ss:$8 sps:$4 sm:$0xff]  }
  0x1d   : > { %2110 = vmatpush3.bf16.msra.mxu0 %v2107_v22  ;;  %1973 = vmatprep.mubr.msk.f32.mxu1 %vm196_vm0, %v2178_v30  ;;  %v2194_v6 = vld [vmem:[%s2271_s9 + $0x51] ss:$8 sps:$4 sm:$0xff]   ;;  %v2196_v10 = vld [vmem:[%s2271_s9 + $0x61] ss:$8 sps:$4 sm:$0xff]  }
  0x1e   : > { %2080 = vmatprep.subr.bf16.mxu1 %v2079_v31  ;;  %2029 = vmatprep.mubr.msk.f32.mxu0 %vm196_vm0, %v2179_v32  ;;  %v2195_v8 = vld [vmem:[%s2271_s9 + $0x59] ss:$8 sps:$4 sm:$0xff]   ;;  %v2197_v11 = vld [vmem:[%s2271_s9 + $0x69] ss:$8 sps:$4 sm:$0xff]  }
  0x1f   : > { %2112 = vmatprep.subr.bf16.mxu0 %v2111_v33  ;;  %v2198_v12 = vld [vmem:[%s2271_s9 + $0x79] ss:$8 sps:$4 sm:$0xff]   ;;  %v2200_v14 = vld [vmem:[%s2271_s9 + $0x89] ss:$8 sps:$4 sm:$0xff]  }
  0x20   : > { %v2199_v13 = vld [vmem:[%s2271_s9 + $0x81] ss:$8 sps:$4 sm:$0xff]   ;;  %v2201_v15 = vld [vmem:[%s2271_s9 + $0x91] ss:$8 sps:$4 sm:$0xff]  }
  0x23   : > { %1974 = vmatmul.mubr.msk.f32.vlgmr.msra.gmra.mrb[0].mxu1 %vm196_vm0, %v2180_v38 }
  0x24   : > { %2082 = vmatpush3.bf16.msra.mxu1 %v2079_v31  ;;  %2030 = vmatmul.mubr.msk.f32.vlgmr.msra.gmra.mrb[0].mxu0 %vm196_vm0, %v2181_v39 }
  0x25   : > { %2114 = vmatpush3.bf16.msra.mxu0 %v2111_v33  ;;  %1980 = vmatprep.mubr.msk.f32.mxu1 %vm196_vm0, %v2182_v40 }
  0x26   : > { %2084 = vmatprep.subr.bf16.mxu1 %v2083_v41  ;;  %2036 = vmatprep.mubr.msk.f32.mxu0 %vm196_vm0, %v2183_v42 }
  0x27   : > { %2116 = vmatprep.subr.bf16.mxu0 %v2115_v43 }
  0x2b   : > { %1981 = vmatmul.mubr.msk.f32.vlgmr.msra.gmra.mrb[0].mxu1 %vm196_vm0, %v2184_v48 }
  0x2c   : > { %2086 = vmatpush3.bf16.msra.mxu1 %v2083_v41  ;;  %2037 = vmatmul.mubr.msk.f32.vlgmr.msra.gmra.mrb[0].mxu0 %vm196_vm0, %v2185_v49 }
  0x2d   : > { %2118 = vmatpush3.bf16.msra.mxu0 %v2115_v43  ;;  %1987 = vmatprep.mubr.msk.f32.mxu1 %vm196_vm0, %v2186_v50 }
  0x2e   : > { %2088 = vmatprep.subr.bf16.mxu1 %v2087_v51  ;;  %2043 = vmatprep.mubr.msk.f32.mxu0 %vm196_vm0, %v2187_v52 }
  0x2f   : > { %2120 = vmatprep.subr.bf16.mxu0 %v2119_v53 }
  0x33   : > { %1988 = vmatmul.mubr.msk.f32.vlgmr.msra.gmra.mrb[0].mxu1 %vm196_vm0, %v2188_v54 }
  0x34   : > { %2090 = vmatpush3.bf16.msra.mxu1 %v2087_v51  ;;  %2044 = vmatmul.mubr.msk.f32.vlgmr.msra.gmra.mrb[0].mxu0 %vm196_vm0, %v2189_v56 }
  0x35   : > { %2122 = vmatpush3.bf16.msra.mxu0 %v2119_v53  ;;  %1994 = vmatprep.mubr.msk.f32.mxu1 %vm196_vm0, %v2190_v60 }
  0x36   : > { %2092 = vmatprep.subr.bf16.mxu1 %v2091_v61  ;;  %2050 = vmatprep.mubr.msk.f32.mxu0 %vm196_vm0, %v2191_v62 }
  0x37   : > { %2124 = vmatprep.subr.bf16.mxu0 %v2123_v63 }
  0x3b   : > { %1995 = vmatmul.mubr.msk.f32.vlgmr.msra.gmra.mrb[0].mxu1 %vm196_vm0, %v2192_v0 }
  0x3c   : > { %2094 = vmatpush3.bf16.msra.mxu1 %v2091_v61  ;;  %2051 = vmatmul.mubr.msk.f32.vlgmr.msra.gmra.mrb[0].mxu0 %vm196_vm0, %v2193_v3 }
  0x3d   : > { %2126 = vmatpush3.bf16.msra.mxu0 %v2123_v63  ;;  %2001 = vmatprep.mubr.msk.f32.mxu1 %vm196_vm0, %v2194_v6 }
  0x3e   : > { %2096 = vmatprep.subr.bf16.mxu1 %v2095_v7  ;;  %2057 = vmatprep.mubr.msk.f32.mxu0 %vm196_vm0, %v2195_v8 }
  0x3f   : > { %2128 = vmatprep.subr.bf16.mxu0 %v2127_v9 }
  0x43   : > { %2002 = vmatmul.mubr.msk.f32.vlgmr.msra.gmra.mrb[0].mxu1 %vm196_vm0, %v2196_v10 }
  0x44   : > { %2098 = vmatpush3.bf16.msra.mxu1 %v2095_v7  ;;  %2058 = vmatmul.mubr.msk.f32.vlgmr.msra.gmra.mrb[0].mxu0 %vm196_vm0, %v2197_v11 }
  0x45   : > { %2130 = vmatpush3.bf16.msra.mxu0 %v2127_v9  ;;  %2008 = vmatprep.mubr.msk.f32.mxu1 %vm196_vm0, %v2198_v12 }
  0x46   : > { %2064 = vmatprep.mubr.msk.f32.mxu0 %vm196_vm0, %v2199_v13 }
  0x4b   : > { %2009 = vmatmul.mubr.msk.f32.vlgmr.msra.gmra.mrb[0].mxu1 %vm196_vm0, %v2200_v14 }
  0x4c   : > { %2065 = vmatmul.mubr.msk.f32.vlgmr.msra.gmra.mrb[0].mxu0 %vm196_vm0, %v2201_v15 }
 0x11e   : > { %v2010_v16 = vpop.f32.mrb[0].mxu1 }
 0x11f   : > { %v2066_v17 = vpop.f32.mrb[0].mxu0  ;;  %v916_v19 = vpop.f32.mrb[1].mxu1 }
 0x120   : > { %v2131_v20 = vadd.f32 %v2066_v17, %v2010_v16  ;;  %v1672_v21 = vpop.f32.mrb[1].mxu0 }
 0x121   : > { %v2132_v22 = vadd.f32 %v1672_v21, %v916_v19 }
 0x122   : > { %v1691_v23 = vadd.f32 %v2131_v20, %v1887_v18 }
 0x123   : > { %v1690_v24 = vadd.f32 %v2132_v22, %v1887_v18 }
 0x124   : > { %v1693_v25 = vmax.f32 %v1691_v23, 0.0 }
 0x125   : > { %v1692_v26 = vmax.f32 %v1690_v24, 0.0 }
 0x126   : > { %v1697_v27 = vcombine.high %v1693_v25, %v1693_v25  ;;  %1703 = vst.msk [vmem:[%s175_s14 + $0x8] sm:$0xf] %vm1700_vm1, %v1693_v25 }
 0x127   : > { %v1696_v28 = vcombine.high %v1692_v26, %v1692_v26  ;;  %1701 = vst.msk [vmem:[%s175_s14] sm:$0xf] %vm1700_vm1, %v1692_v26 }
 0x128   : > { %1704 = vst.msk [vmem:[%s175_s14 + $0xc] sm:$0xf] %vm1700_vm1, %v1697_v27 }
 0x129   : > { %1702 = vst.msk [vmem:[%s175_s14 + $0x4] sm:$0xf] %vm1700_vm1, %v1696_v28 }
 0x12a PF: > { %s13_s12 = sadd.s32 1, %s2208_s12  }
 0x12b   : > { %p10_p5 = scmp.ge.s32.totalorder %s13_s12, 4  }
 0x12d   :  { %12 = sbr.rel (!%p10_p5) target bundleno = 1 (0x1), region = 84 }

// kernel: encoder_forward_pallas.3
= control target key start
LH: loop header
LB: loop body
LE: loop exit
PB: predicated region body
PF: predicated region fallthrough
CT: control target
= control target key end

     0   :  { %s3464_s12 = smov 0   ;;  %s3789_s0 = inlined_call_operand.vmem [shape: f32[8,9,9,3], index: 0, kind: input, shape index: {}]   ;;  %s3790_s1 = inlined_call_operand.vmem [shape: f32[16,3,16], index: 1, kind: input, shape index: {}]   ;;  %s3791_s2 = inlined_call_operand.vmem [shape: f32[1,16], index: 2, kind: input, shape index: {}]   ;;  %s3792_s3 = inlined_call_operand.vmem [shape: f32[2,8,8,16], index: 3, kind: output, shape index: {}]  }
   0x1 LB: > { %s3470_s13 = sadd.s32 4294967295, %s3442_s12   ;;  %p2659_p0 = scmp.ge.s32.totalorder %s3442_s12, 1  ;;  %s3442_s12 = sphi %s3464_s12, %s13_s12  }
   0x2   : > { %p139_p1 = scmp.lt.s32.totalorder %s3442_s12, 3 }
   0x4   : > { %p140_p2 = pnand %p2659_p0, %p139_p1 }
   0x5   : > { %v2672_v0 = vld [vmem:[%s3790_s1 + $0x4] sm:$0x7] (!%p140_p2)  ;;  %vm221_vm0 = vcmask (!%p140_p2), 1042432   ;;  %v2799_v1 = vld [vmem:[%s3790_s1 + $0x20] sm:$0x7] (!%p140_p2)  ;;  %s2660_s18 = sshll.u32 (!%p140_p2), %s3470_s13, 2 }
   0x6   : > { %143 = sbr.rel (%p140_p2) target bundleno = 364 (0x16c), region = 32  ;;  %3083 = vmatprep.subr.msk.mxu1 (!%p140_p2), %vm221_vm0, %v2672_v0  ;;  %3195 = vmatprep.subr.msk.mxu0 (!%p140_p2), %vm221_vm0, %v2799_v1  ;;  %p165_p3 = scmp.lt.s32.totalorder (!%p140_p2), %s2660_s18, 7  ;;  %v184_v2 = vld [vmem:[%s3790_s1] sm:$0x7] (!%p140_p2)  ;;  %v2817_v3 = vld [vmem:[%s3790_s1 + $0x24] sm:$0x7] (!%p140_p2) }
   0x7   : > { %3084 = vmatpush3.msk.msra.mxu1 (!%p140_p2), %vm221_vm0, %v2672_v0  ;;  %3196 = vmatpush3.msk.msra.mxu0 (!%p140_p2), %vm221_vm0, %v2799_v1  ;;  %vm196_vm1 = vcmask (!%p140_p2), 23552   ;;  %v2691_v10 = vld [vmem:[%s3790_s1 + $0x8] sm:$0x7] (!%p140_p2)  ;;  %v2709_v23 = vld [vmem:[%s3790_s1 + $0xc] sm:$0x7] (!%p140_p2)  ;;  %p171_p4 = scmp.lt.s32.totalorder (!%p140_p2), %s3470_s13, 1 }
   0x8   : > { %3097 = vmatprep.subr.msk.mxu1 (!%p140_p2), %vm221_vm0, %v184_v2  ;;  %3209 = vmatprep.subr.msk.mxu0 (!%p140_p2), %vm221_vm0, %v2817_v3  ;;  %v2835_v11 = vld [vmem:[%s3790_s1 + $0x28] sm:$0x7] (!%p140_p2)  ;;  %v2853_v24 = vld [vmem:[%s3790_s1 + $0x2c] sm:$0x7] (!%p140_p2)  ;;  %v2727_v30 = vld [vmem:[%s3790_s1 + $0x10] sm:$0x7] (!%p140_p2) }
   0x9   : > { %v2871_v31 = vld [vmem:[%s3790_s1 + $0x30] sm:$0x7] (!%p140_p2)  ;;  %v2745_v41 = vld [vmem:[%s3790_s1 + $0x14] sm:$0x7] (!%p140_p2)  ;;  %v2763_v52 = vld [vmem:[%s3790_s1 + $0x18] sm:$0x7] (!%p140_p2) }
   0xa   : > { %v2889_v42 = vld [vmem:[%s3790_s1 + $0x34] sm:$0x7] (!%p140_p2)  ;;  %v2907_v53 = vld [vmem:[%s3790_s1 + $0x38] sm:$0x7] (!%p140_p2)  ;;  %v2781_v63 = vld [vmem:[%s3790_s1 + $0x1c] sm:$0x7] (!%p140_p2) }
   0xb   : > { %v2925_v0 = vld [vmem:[%s3790_s1 + $0x3c] sm:$0x7] (!%p140_p2)  ;;  %vm2591_vm2 = vcmask (!%p140_p2), 130048  }
   0xd   : > { %s3794_s18 = smov (!%p165_p3, %s2660_s18), 7  ;;  %s3796_s13 = smov (!%p171_p4, %s3470_s13), 1 }
   0xe   : > { %s3427_s23 = smul.u32 144, %s3794_s18  ;;  %s2938_s29 = sshll.u32 %s3796_s13, 6 }
   0xf   : > { %s3768_s4 = scalar_lea.vmem %s3792_s3, %s2938_s29 }
  0x10   : > { %s3496_s26 = scalar_lea.vmem %s3789_s0, %s3427_s23 }
  0x11   : > { %v2664_v4 = vld [vmem:[%s3496_s26 + $0x90] sm:$0xff]  ;;  %v2665_v6 = vld [vmem:[%s3496_s26 + $0xa0] sm:$0xff] }
  0x12   : > { %v2791_v5 = vld [vmem:[%s3496_s26 + $0x10] sm:$0xff]  ;;  %3085 = vmatprep.mubr.msk.f32.mxu1 %vm196_vm1, %v2664_v4  ;;  %v2792_v7 = vld [vmem:[%s3496_s26 + $0x20] sm:$0xff] }
  0x13   : > { %3197 = vmatprep.mubr.msk.f32.mxu0 %vm196_vm1, %v2791_v5  ;;  %v2666_v8 = vld [vmem:[%s3496_s26 + $0xb0] sm:$0xff]  ;;  %3086 = vmatmul.mubr.msk.f32.vlgmr.msra.gmra.mrb[0].mxu1 %vm196_vm1, %v2665_v6  ;;  %v2667_v12 = vld [vmem:[%s3496_s26 + $0xc0] sm:$0xff] }
  0x14   : > { %v2793_v9 = vld [vmem:[%s3496_s26 + $0x30] sm:$0xff]  ;;  %3198 = vmatmul.mubr.msk.f32.vlgmr.msra.gmra.mrb[0].mxu0 %vm196_vm1, %v2792_v7  ;;  %3098 = vmatpush3.msk.msra.mxu1 %vm221_vm0, %v184_v2  ;;  %v2794_v13 = vld [vmem:[%s3496_s26 + $0x40] sm:$0xff] }
  0x15   : > { %3210 = vmatpush3.msk.msra.mxu0 %vm221_vm0, %v2817_v3  ;;  %3088 = vmatprep.mubr.msk.f32.mxu1 %vm196_vm1, %v2666_v8  ;;  %v2668_v14 = vld [vmem:[%s3496_s26 + $0xd0] sm:$0xff]  ;;  %v2669_v16 = vld [vmem:[%s3496_s26 + $0xe0] sm:$0xff] }
  0x16   : > { %3200 = vmatprep.mubr.msk.f32.mxu0 %vm196_vm1, %v2793_v9  ;;  %v2795_v15 = vld [vmem:[%s3496_s26 + $0x50] sm:$0xff]  ;;  %3111 = vmatprep.subr.msk.mxu1 %vm221_vm0, %v2691_v10  ;;  %v2796_v17 = vld [vmem:[%s3496_s26 + $0x60] sm:$0xff] }
  0x17   : > { %3223 = vmatprep.subr.msk.mxu0 %vm221_vm0, %v2835_v11  ;;  %3089 = vmatmul.mubr.msk.f32.gmra.mrb[2].mxu1 %vm196_vm1, %v2667_v12  ;;  %v2670_v18 = vld [vmem:[%s3496_s26 + $0xf0] sm:$0xff]  ;;  %v2671_v20 = vld [vmem:[%s3496_s26 + $0x100] sm:$0xff] }
  0x18   : > { %3201 = vmatmul.mubr.msk.f32.gmra.mrb[2].mxu0 %vm196_vm1, %v2794_v13  ;;  %3091 = vmatprep.mubr.msk.f32.mxu1 %vm196_vm1, %v2668_v14  ;;  %v2797_v19 = vld [vmem:[%s3496_s26 + $0x70] sm:$0xff]  ;;  %v2798_v21 = vld [vmem:[%s3496_s26 + $0x80] sm:$0xff] }
  0x19   : > { %3203 = vmatprep.mubr.msk.f32.mxu0 %vm196_vm1, %v2795_v15  ;;  %v176_v22 = vld [vmem:[%s3496_s26] sm:$0xff]  ;;  %v2816_v25 = vld [vmem:[%s3496_s26 + $0x110] sm:$0xff] }
  0x1a   : > { %v462_v26 = vld [vmem:[%s3496_s26 + $0x1] sm:$0xff]  ;;  %v2827_v27 = vld [vmem:[%s3496_s26 + $0x11] sm:$0xff] }
  0x1b   : > { %3092 = vmatmul.mubr.msk.f32.gmra.mrb[4].mxu1 %vm196_vm1, %v2669_v16  ;;  %v2828_v28 = vld [vmem:[%s3496_s26 + $0x21] sm:$0xff]  ;;  %v2829_v29 = vld [vmem:[%s3496_s26 + $0x31] sm:$0xff] }
  0x1c   : > { %3204 = vmatmul.mubr.msk.f32.gmra.mrb[4].mxu0 %vm196_vm1, %v2796_v17  ;;  %3094 = vmatprep.mubr.msk.f32.mxu1 %vm196_vm1, %v2670_v18  ;;  %v2830_v32 = vld [vmem:[%s3496_s26 + $0x41] sm:$0xff]  ;;  %v2831_v33 = vld [vmem:[%s3496_s26 + $0x51] sm:$0xff] }
  0x1d   : > { %3206 = vmatprep.mubr.msk.f32.mxu0 %vm196_vm1, %v2797_v19  ;;  %v2832_v34 = vld [vmem:[%s3496_s26 + $0x61] sm:$0xff]  ;;  %v2833_v35 = vld [vmem:[%s3496_s26 + $0x71] sm:$0xff] }
  0x1e   : > { %v2834_v36 = vld [vmem:[%s3496_s26 + $0x81] sm:$0xff]  ;;  %v2701_v37 = vld [vmem:[%s3496_s26 + $0x91] sm:$0xff] }
  0x1f   : > { %3095 = vmatmul.mubr.msk.f32.gmra.mrb[6].mxu1 %vm196_vm1, %v2671_v20  ;;  %v2845_v38 = vld [vmem:[%s3496_s26 + $0xa1] sm:$0xff]  ;;  %v2846_v39 = vld [vmem:[%s3496_s26 + $0xb1] sm:$0xff] }
  0x20   : > { %3207 = vmatmul.mubr.msk.f32.gmra.mrb[6].mxu0 %vm196_vm1, %v2798_v21  ;;  %3099 = vmatprep.mubr.msk.f32.mxu1 %vm196_vm1, %v176_v22  ;;  %v2847_v40 = vld [vmem:[%s3496_s26 + $0xc1] sm:$0xff]  ;;  %v2848_v43 = vld [vmem:[%s3496_s26 + $0xd1] sm:$0xff] }
  0x21   : > { %3211 = vmatprep.mubr.msk.f32.mxu0 %vm196_vm1, %v2665_v6  ;;  %v2849_v44 = vld [vmem:[%s3496_s26 + $0xe1] sm:$0xff]  ;;  %v2850_v45 = vld [vmem:[%s3496_s26 + $0xf1] sm:$0xff] }
  0x22   : > { %v2851_v46 = vld [vmem:[%s3496_s26 + $0x101] sm:$0xff]  ;;  %v2852_v47 = vld [vmem:[%s3496_s26 + $0x111] sm:$0xff] }
  0x23   : > { %3100 = vmatmul.mubr.msk.f32.vlgmr.msra.gmra.mrb[0].mxu1 %vm196_vm1, %v2791_v5  ;;  %v2719_v48 = vld [vmem:[%s3496_s26 + $0x120] sm:$0xff]  ;;  %v2863_v49 = vld [vmem:[%s3496_s26 + $0x130] sm:$0xff] }
  0x24   : > { %3212 = vmatmul.mubr.msk.f32.vlgmr.msra.gmra.mrb[0].mxu0 %vm196_vm1, %v2666_v8  ;;  %3112 = vmatpush3.msk.msra.mxu1 %vm221_vm0, %v2691_v10  ;;  %v2864_v50 = vld [vmem:[%s3496_s26 + $0x140] sm:$0xff]  ;;  %v2865_v51 = vld [vmem:[%s3496_s26 + $0x150] sm:$0xff] }
  0x25   : > { %3224 = vmatpush3.msk.msra.mxu0 %vm221_vm0, %v2835_v11  ;;  %3102 = vmatprep.mubr.msk.f32.mxu1 %vm196_vm1, %v2792_v7  ;;  %v2866_v54 = vld [vmem:[%s3496_s26 + $0x160] sm:$0xff]  ;;  %v2867_v55 = vld [vmem:[%s3496_s26 + $0x170] sm:$0xff] }
  0x26   : > { %3214 = vmatprep.mubr.msk.f32.mxu0 %vm196_vm1, %v2667_v12  ;;  %3125 = vmatprep.subr.msk.mxu1 %vm221_vm0, %v2709_v23  ;;  %v2868_v56 = vld [vmem:[%s3496_s26 + $0x180] sm:$0xff]  ;;  %v2869_v57 = vld [vmem:[%s3496_s26 + $0x190] sm:$0xff] }
  0x27   : > { %3237 = vmatprep.subr.msk.mxu0 %vm221_vm0, %v2853_v24  ;;  %3103 = vmatmul.mubr.msk.f32.gmra.mrb[2].mxu1 %vm196_vm1, %v2793_v9  ;;  %v2870_v58 = vld [vmem:[%s3496_s26 + $0x1a0] sm:$0xff]  ;;  %v2737_v59 = vld [vmem:[%s3496_s26 + $0x1b0] sm:$0xff] }
  0x28   : > { %3215 = vmatmul.mubr.msk.f32.gmra.mrb[2].mxu0 %vm196_vm1, %v2668_v14  ;;  %3105 = vmatprep.mubr.msk.f32.mxu1 %vm196_vm1, %v2794_v13  ;;  %v2881_v60 = vld [vmem:[%s3496_s26 + $0x1c0] sm:$0xff]  ;;  %v2882_v61 = vld [vmem:[%s3496_s26 + $0x1d0] sm:$0xff] }
  0x29   : > { %3217 = vmatprep.mubr.msk.f32.mxu0 %vm196_vm1, %v2669_v16  ;;  %v2883_v62 = vld [vmem:[%s3496_s26 + $0x1e0] sm:$0xff]  ;;  %v2884_v1 = vld [vmem:[%s3496_s26 + $0x1f0] sm:$0xff] }
  0x2a   : > { %v2885_v2 = vld [vmem:[%s3496_s26 + $0x200] sm:$0xff]  ;;  %v2886_v3 = vld [vmem:[%s3496_s26 + $0x210] sm:$0xff] }
  0x2b   : > { %3106 = vmatmul.mubr.msk.f32.gmra.mrb[4].mxu1 %vm196_vm1, %v2795_v15  ;;  %v2887_v4 = vld [vmem:[%s3496_s26 + $0x220] sm:$0xff]  ;;  %v2888_v5 = vld [vmem:[%s3496_s26 + $0x230] sm:$0xff] }
  0x2c   : > { %3218 = vmatmul.mubr.msk.f32.gmra.mrb[4].mxu0 %vm196_vm1, %v2670_v18  ;;  %3108 = vmatprep.mubr.msk.f32.mxu1 %vm196_vm1, %v2796_v17  ;;  %v2755_v6 = vld [vmem:[%s3496_s26 + $0x121] sm:$0xff]  ;;  %v2899_v7 = vld [vmem:[%s3496_s26 + $0x131] sm:$0xff] }
  0x2d   : > { %3220 = vmatprep.mubr.msk.f32.mxu0 %vm196_vm1, %v2671_v20  ;;  %v2900_v8 = vld [vmem:[%s3496_s26 + $0x141] sm:$0xff]  ;;  %v2901_v9 = vld [vmem:[%s3496_s26 + $0x151] sm:$0xff] }
  0x2e   : > { %v2902_v10 = vld [vmem:[%s3496_s26 + $0x161] sm:$0xff]  ;;  %v2903_v11 = vld [vmem:[%s3496_s26 + $0x171] sm:$0xff] }
  0x2f   : > { %3109 = vmatmul.mubr.msk.f32.gmra.mrb[6].mxu1 %vm196_vm1, %v2797_v19  ;;  %v2904_v12 = vld [vmem:[%s3496_s26 + $0x181] sm:$0xff]  ;;  %v2905_v13 = vld [vmem:[%s3496_s26 + $0x191] sm:$0xff] }
  0x30   : > { %3221 = vmatmul.mubr.msk.f32.gmra.mrb[6].mxu0 %vm196_vm1, %v2816_v25  ;;  %3113 = vmatprep.mubr.msk.f32.mxu1 %vm196_vm1, %v462_v26  ;;  %v2906_v14 = vld [vmem:[%s3496_s26 + $0x1a1] sm:$0xff]  ;;  %v2773_v15 = vld [vmem:[%s3496_s26 + $0x1b1] sm:$0xff]  ;;  %v2935_v26 = vld [vmem:[%s3791_s2] ss:$0 sm:$0xff] }
  0x31   : > { %3225 = vmatprep.mubr.msk.f32.mxu0 %vm196_vm1, %v2827_v27  ;;  %v2917_v16 = vld [vmem:[%s3496_s26 + $0x1c1] sm:$0xff]  ;;  %v2918_v17 = vld [vmem:[%s3496_s26 + $0x1d1] sm:$0xff] }
  0x32   : > { %v2919_v18 = vld [vmem:[%s3496_s26 + $0x1e1] sm:$0xff]  ;;  %v2920_v19 = vld [vmem:[%s3496_s26 + $0x1f1] sm:$0xff] }
  0x33   : > { %3114 = vmatmul.mubr.msk.f32.vlgmr.msra.gmra.mrb[0].mxu1 %vm196_vm1, %v2827_v27  ;;  %v2921_v20 = vld [vmem:[%s3496_s26 + $0x201] sm:$0xff]  ;;  %v2922_v21 = vld [vmem:[%s3496_s26 + $0x211] sm:$0xff] }
  0x34   : > { %3226 = vmatmul.mubr.msk.f32.vlgmr.msra.gmra.mrb[0].mxu0 %vm196_vm1, %v2828_v28  ;;  %3126 = vmatpush3.msk.msra.mxu1 %vm221_vm0, %v2709_v23  ;;  %v2923_v22 = vld [vmem:[%s3496_s26 + $0x221] sm:$0xff]  ;;  %v2924_v23 = vld [vmem:[%s3496_s26 + $0x231] sm:$0xff] }
  0x35   : > { %3238 = vmatpush3.msk.msra.mxu0 %vm221_vm0, %v2853_v24  ;;  %3116 = vmatprep.mubr.msk.f32.mxu1 %vm196_vm1, %v2828_v28 }
  0x36   : > { %3228 = vmatprep.mubr.msk.f32.mxu0 %vm196_vm1, %v2829_v29  ;;  %3139 = vmatprep.subr.msk.mxu1 %vm221_vm0, %v2727_v30 }
  0x37   : > { %3251 = vmatprep.subr.msk.mxu0 %vm221_vm0, %v2871_v31  ;;  %3117 = vmatmul.mubr.msk.f32.gmra.mrb[2].mxu1 %vm196_vm1, %v2829_v29 }
  0x38   : > { %3229 = vmatmul.mubr.msk.f32.gmra.mrb[2].mxu0 %vm196_vm1, %v2830_v32  ;;  %3119 = vmatprep.mubr.msk.f32.mxu1 %vm196_vm1, %v2830_v32 }
  0x39   : > { %3231 = vmatprep.mubr.msk.f32.mxu0 %vm196_vm1, %v2831_v33 }
  0x3b   : > { %3120 = vmatmul.mubr.msk.f32.gmra.mrb[4].mxu1 %vm196_vm1, %v2831_v33 }
  0x3c   : > { %3232 = vmatmul.mubr.msk.f32.gmra.mrb[4].mxu0 %vm196_vm1, %v2832_v34  ;;  %3122 = vmatprep.mubr.msk.f32.mxu1 %vm196_vm1, %v2832_v34 }
  0x3d   : > { %3234 = vmatprep.mubr.msk.f32.mxu0 %vm196_vm1, %v2833_v35 }
  0x3f   : > { %3123 = vmatmul.mubr.msk.f32.gmra.mrb[6].mxu1 %vm196_vm1, %v2833_v35 }
  0x40   : > { %3235 = vmatmul.mubr.msk.f32.gmra.mrb[6].mxu0 %vm196_vm1, %v2834_v36  ;;  %3127 = vmatprep.mubr.msk.f32.mxu1 %vm196_vm1, %v2701_v37 }
  0x41   : > { %3239 = vmatprep.mubr.msk.f32.mxu0 %vm196_vm1, %v2845_v38 }
  0x43   : > { %3128 = vmatmul.mubr.msk.f32.vlgmr.msra.gmra.mrb[0].mxu1 %vm196_vm1, %v2845_v38 }
  0x44   : > { %3240 = vmatmul.mubr.msk.f32.vlgmr.msra.gmra.mrb[0].mxu0 %vm196_vm1, %v2846_v39  ;;  %3140 = vmatpush3.msk.msra.mxu1 %vm221_vm0, %v2727_v30 }
  0x45   : > { %3252 = vmatpush3.msk.msra.mxu0 %vm221_vm0, %v2871_v31  ;;  %3130 = vmatprep.mubr.msk.f32.mxu1 %vm196_vm1, %v2846_v39 }
  0x46   : > { %3242 = vmatprep.mubr.msk.f32.mxu0 %vm196_vm1, %v2847_v40  ;;  %3153 = vmatprep.subr.msk.mxu1 %vm221_vm0, %v2745_v41 }
  0x47   : > { %3265 = vmatprep.subr.msk.mxu0 %vm221_vm0, %v2889_v42  ;;  %3131 = vmatmul.mubr.msk.f32.gmra.mrb[2].mxu1 %vm196_vm1, %v2847_v40 }
  0x48   : > { %3243 = vmatmul.mubr.msk.f32.gmra.mrb[2].mxu0 %vm196_vm1, %v2848_v43  ;;  %3133 = vmatprep.mubr.msk.f32.mxu1 %vm196_vm1, %v2848_v43 }
  0x49   : > { %3245 = vmatprep.mubr.msk.f32.mxu0 %vm196_vm1, %v2849_v44 }
  0x4b   : > { %3134 = vmatmul.mubr.msk.f32.gmra.mrb[4].mxu1 %vm196_vm1, %v2849_v44 }
  0x4c   : > { %3246 = vmatmul.mubr.msk.f32.gmra.mrb[4].mxu0 %vm196_vm1, %v2850_v45  ;;  %3136 = vmatprep.mubr.msk.f32.mxu1 %vm196_vm1, %v2850_v45 }
  0x4d   : > { %3248 = vmatprep.mubr.msk.f32.mxu0 %vm196_vm1, %v2851_v46 }
  0x4f   : > { %3137 = vmatmul.mubr.msk.f32.gmra.mrb[6].mxu1 %vm196_vm1, %v2851_v46 }
  0x50   : > { %3249 = vmatmul.mubr.msk.f32.gmra.mrb[6].mxu0 %vm196_vm1, %v2852_v47  ;;  %3141 = vmatprep.mubr.msk.f32.mxu1 %vm196_vm1, %v2719_v48 }
  0x51   : > { %3253 = vmatprep.mubr.msk.f32.mxu0 %vm196_vm1, %v2863_v49 }
  0x53   : > { %3142 = vmatmul.mubr.msk.f32.vlgmr.msra.gmra.mrb[0].mxu1 %vm196_vm1, %v2863_v49 }
  0x54   : > { %3254 = vmatmul.mubr.msk.f32.vlgmr.msra.gmra.mrb[0].mxu0 %vm196_vm1, %v2864_v50  ;;  %3154 = vmatpush3.msk.msra.mxu1 %vm221_vm0, %v2745_v41 }
  0x55   : > { %3266 = vmatpush3.msk.msra.mxu0 %vm221_vm0, %v2889_v42  ;;  %3144 = vmatprep.mubr.msk.f32.mxu1 %vm196_vm1, %v2864_v50 }
  0x56   : > { %3256 = vmatprep.mubr.msk.f32.mxu0 %vm196_vm1, %v2865_v51  ;;  %3167 = vmatprep.subr.msk.mxu1 %vm221_vm0, %v2763_v52 }
  0x57   : > { %3279 = vmatprep.subr.msk.mxu0 %vm221_vm0, %v2907_v53  ;;  %3145 = vmatmul.mubr.msk.f32.gmra.mrb[2].mxu1 %vm196_vm1, %v2865_v51 }
  0x58   : > { %3257 = vmatmul.mubr.msk.f32.gmra.mrb[2].mxu0 %vm196_vm1, %v2866_v54  ;;  %3147 = vmatprep.mubr.msk.f32.mxu1 %vm196_vm1, %v2866_v54 }
  0x59   : > { %3259 = vmatprep.mubr.msk.f32.mxu0 %vm196_vm1, %v2867_v55 }
  0x5b   : > { %3148 = vmatmul.mubr.msk.f32.gmra.mrb[4].mxu1 %vm196_vm1, %v2867_v55 }
  0x5c   : > { %3260 = vmatmul.mubr.msk.f32.gmra.mrb[4].mxu0 %vm196_vm1, %v2868_v56  ;;  %3150 = vmatprep.mubr.msk.f32.mxu1 %vm196_vm1, %v2868_v56 }
  0x5d   : > { %3262 = vmatprep.mubr.msk.f32.mxu0 %vm196_vm1, %v2869_v57 }
  0x5f   : > { %3151 = vmatmul.mubr.msk.f32.gmra.mrb[6].mxu1 %vm196_vm1, %v2869_v57 }
  0x60   : > { %3263 = vmatmul.mubr.msk.f32.gmra.mrb[6].mxu0 %vm196_vm1, %v2870_v58  ;;  %3155 = vmatprep.mubr.msk.f32.mxu1 %vm196_vm1, %v2737_v59 }
  0x61   : > { %3267 = vmatprep.mubr.msk.f32.mxu0 %vm196_vm1, %v2881_v60 }
  0x63   : > { %3156 = vmatmul.mubr.msk.f32.vlgmr.msra.gmra.mrb[0].mxu1 %vm196_vm1, %v2881_v60 }
  0x64   : > { %3268 = vmatmul.mubr.msk.f32.vlgmr.msra.gmra.mrb[0].mxu0 %vm196_vm1, %v2882_v61  ;;  %3168 = vmatpush3.msk.msra.mxu1 %vm221_vm0, %v2763_v52 }
  0x65   : > { %3280 = vmatpush3.msk.msra.mxu0 %vm221_vm0, %v2907_v53  ;;  %3158 = vmatprep.mubr.msk.f32.mxu1 %vm196_vm1, %v2882_v61 }
  0x66   : > { %3270 = vmatprep.mubr.msk.f32.mxu0 %vm196_vm1, %v2883_v62  ;;  %3181 = vmatprep.subr.msk.mxu1 %vm221_vm0, %v2781_v63 }
  0x67   : > { %3293 = vmatprep.subr.msk.mxu0 %vm221_vm0, %v2925_v0  ;;  %3159 = vmatmul.mubr.msk.f32.gmra.mrb[2].mxu1 %vm196_vm1, %v2883_v62 }
  0x68   : > { %3271 = vmatmul.mubr.msk.f32.gmra.mrb[2].mxu0 %vm196_vm1, %v2884_v1  ;;  %3161 = vmatprep.mubr.msk.f32.mxu1 %vm196_vm1, %v2884_v1 }
  0x69   : > { %3273 = vmatprep.mubr.msk.f32.mxu0 %vm196_vm1, %v2885_v2 }
  0x6b   : > { %3162 = vmatmul.mubr.msk.f32.gmra.mrb[4].mxu1 %vm196_vm1, %v2885_v2 }
  0x6c   : > { %3274 = vmatmul.mubr.msk.f32.gmra.mrb[4].mxu0 %vm196_vm1, %v2886_v3  ;;  %3164 = vmatprep.mubr.msk.f32.mxu1 %vm196_vm1, %v2886_v3 }
  0x6d   : > { %3276 = vmatprep.mubr.msk.f32.mxu0 %vm196_vm1, %v2887_v4 }
  0x6f   : > { %3165 = vmatmul.mubr.msk.f32.gmra.mrb[6].mxu1 %vm196_vm1, %v2887_v4 }
  0x70   : > { %3277 = vmatmul.mubr.msk.f32.gmra.mrb[6].mxu0 %vm196_vm1, %v2888_v5  ;;  %3169 = vmatprep.mubr.msk.f32.mxu1 %vm196_vm1, %v2755_v6 }
  0x71   : > { %3281 = vmatprep.mubr.msk.f32.mxu0 %vm196_vm1, %v2899_v7 }
  0x73   : > { %3170 = vmatmul.mubr.msk.f32.vlgmr.msra.gmra.mrb[0].mxu1 %vm196_vm1, %v2899_v7 }
  0x74   : > { %3282 = vmatmul.mubr.msk.f32.vlgmr.msra.gmra.mrb[0].mxu0 %vm196_vm1, %v2900_v8  ;;  %3182 = vmatpush3.msk.msra.mxu1 %vm221_vm0, %v2781_v63 }
  0x75   : > { %3294 = vmatpush3.msk.msra.mxu0 %vm221_vm0, %v2925_v0  ;;  %3172 = vmatprep.mubr.msk.f32.mxu1 %vm196_vm1, %v2900_v8 }
  0x76   : > { %3284 = vmatprep.mubr.msk.f32.mxu0 %vm196_vm1, %v2901_v9 }
  0x77   : > { %3173 = vmatmul.mubr.msk.f32.gmra.mrb[2].mxu1 %vm196_vm1, %v2901_v9 }
  0x78   : > { %3285 = vmatmul.mubr.msk.f32.gmra.mrb[2].mxu0 %vm196_vm1, %v2902_v10  ;;  %3175 = vmatprep.mubr.msk.f32.mxu1 %vm196_vm1, %v2902_v10 }
  0x79   : > { %3287 = vmatprep.mubr.msk.f32.mxu0 %vm196_vm1, %v2903_v11 }
  0x7b   : > { %3176 = vmatmul.mubr.msk.f32.gmra.mrb[4].mxu1 %vm196_vm1, %v2903_v11 }
  0x7c   : > { %3288 = vmatmul.mubr.msk.f32.gmra.mrb[4].mxu0 %vm196_vm1, %v2904_v12  ;;  %3178 = vmatprep.mubr.msk.f32.mxu1 %vm196_vm1, %v2904_v12 }
  0x7d   : > { %3290 = vmatprep.mubr.msk.f32.mxu0 %vm196_vm1, %v2905_v13 }
  0x7f   : > { %3179 = vmatmul.mubr.msk.f32.gmra.mrb[6].mxu1 %vm196_vm1, %v2905_v13 }
  0x80   : > { %3291 = vmatmul.mubr.msk.f32.gmra.mrb[6].mxu0 %vm196_vm1, %v2906_v14  ;;  %3183 = vmatprep.mubr.msk.f32.mxu1 %vm196_vm1, %v2773_v15 }
  0x81   : > { %3295 = vmatprep.mubr.msk.f32.mxu0 %vm196_vm1, %v2917_v16 }
  0x83   : > { %3184 = vmatmul.mubr.msk.f32.vlgmr.msra.gmra.mrb[0].mxu1 %vm196_vm1, %v2917_v16 }
  0x84   : > { %3296 = vmatmul.mubr.msk.f32.vlgmr.msra.gmra.mrb[0].mxu0 %vm196_vm1, %v2918_v17  ;;  %3186 = vmatprep.mubr.msk.f32.mxu1 %vm196_vm1, %v2918_v17 }
  0x85   : > { %3298 = vmatprep.mubr.msk.f32.mxu0 %vm196_vm1, %v2919_v18 }
  0x87   : > { %3187 = vmatmul.mubr.msk.f32.gmra.mrb[2].mxu1 %vm196_vm1, %v2919_v18 }
  0x88   : > { %3299 = vmatmul.mubr.msk.f32.gmra.mrb[2].mxu0 %vm196_vm1, %v2920_v19  ;;  %3189 = vmatprep.mubr.msk.f32.mxu1 %vm196_vm1, %v2920_v19 }
  0x89   : > { %3301 = vmatprep.mubr.msk.f32.mxu0 %vm196_vm1, %v2921_v20 }
  0x8b   : > { %3190 = vmatmul.mubr.msk.f32.gmra.mrb[4].mxu1 %vm196_vm1, %v2921_v20 }
  0x8c   : > { %3302 = vmatmul.mubr.msk.f32.gmra.mrb[4].mxu0 %vm196_vm1, %v2922_v21  ;;  %3192 = vmatprep.mubr.msk.f32.mxu1 %vm196_vm1, %v2922_v21 }
  0x8d   : > { %3304 = vmatprep.mubr.msk.f32.mxu0 %vm196_vm1, %v2923_v22 }
  0x8f   : > { %3193 = vmatmul.mubr.msk.f32.gmra.mrb[6].mxu1 %vm196_vm1, %v2923_v22 }
  0x90   : > { %3305 = vmatmul.mubr.msk.f32.gmra.mrb[6].mxu0 %vm196_vm1, %v2924_v23 }
 0x156   : > { %v3185_v24 = vpop.f32.mrb[0].mxu1 }
 0x157   : > { %v3297_v25 = vpop.f32.mrb[0].mxu0  ;;  %v1317_v28 = vpop.f32.mrb[1].mxu1 }
 0x158   : > { %v3307_v27 = vadd.f32 %v3297_v25, %v3185_v24  ;;  %v2521_v29 = vpop.f32.mrb[1].mxu0 }
 0x159   : > { %v3308_v30 = vadd.f32 %v2521_v29, %v1317_v28 }
 0x15a   : > { %v2576_v31 = vadd.f32 %v3307_v27, %v2935_v26  ;;  %v3188_v33 = vpop.f32.mrb[2].mxu1 }
 0x15b   : > { %v2575_v32 = vadd.f32 %v3308_v30, %v2935_v26  ;;  %v3300_v34 = vpop.f32.mrb[2].mxu0  ;;  %v1327_v37 = vpop.f32.mrb[3].mxu1 }
 0x15c   : > { %v2584_v35 = vmax.f32 %v2576_v31, 0.0  ;;  %v3309_v36 = vadd.f32 %v3300_v34, %v3188_v33  ;;  %v2531_v38 = vpop.f32.mrb[3].mxu0 }
 0x15d   : > { %v2583_v39 = vmax.f32 %v2575_v32, 0.0  ;;  %v3310_v40 = vadd.f32 %v2531_v38, %v1327_v37 }
 0x15e   : > { %2593 = vst.msk [vmem:[%s3768_s4 + $0x8] sm:$0xff] %vm2591_vm2, %v2584_v35  ;;  %v2578_v41 = vadd.f32 %v3309_v36, %v2935_v26  ;;  %v3191_v43 = vpop.f32.mrb[4].mxu1 }
 0x15f   : > { %2592 = vst.msk [vmem:[%s3768_s4] sm:$0xff] %vm2591_vm2, %v2583_v39  ;;  %v2577_v42 = vadd.f32 %v3310_v40, %v2935_v26  ;;  %v3303_v44 = vpop.f32.mrb[4].mxu0  ;;  %v1337_v47 = vpop.f32.mrb[5].mxu1 }
 0x160   : > { %v2586_v45 = vmax.f32 %v2578_v41, 0.0  ;;  %v3311_v46 = vadd.f32 %v3303_v44, %v3191_v43  ;;  %v2541_v48 = vpop.f32.mrb[5].mxu0 }
 0x161   : > { %v2585_v49 = vmax.f32 %v2577_v42, 0.0  ;;  %v3312_v50 = vadd.f32 %v2541_v48, %v1337_v47 }
 0x162   : > { %2595 = vst.msk [vmem:[%s3768_s4 + $0x18] sm:$0xff] %vm2591_vm2, %v2586_v45  ;;  %v2580_v51 = vadd.f32 %v3311_v46, %v2935_v26  ;;  %v3194_v53 = vpop.f32.mrb[6].mxu1 }
 0x163   : > { %2594 = vst.msk [vmem:[%s3768_s4 + $0x10] sm:$0xff] %vm2591_vm2, %v2585_v49  ;;  %v2579_v52 = vadd.f32 %v3312_v50, %v2935_v26  ;;  %v3306_v54 = vpop.f32.mrb[6].mxu0  ;;  %v1347_v57 = vpop.f32.mrb[7].mxu1 }
 0x164   : > { %v2588_v55 = vmax.f32 %v2580_v51, 0.0  ;;  %v3313_v56 = vadd.f32 %v3306_v54, %v3194_v53  ;;  %v2551_v58 = vpop.f32.mrb[7].mxu0 }
 0x165   : > { %v2587_v59 = vmax.f32 %v2579_v52, 0.0  ;;  %v3314_v60 = vadd.f32 %v2551_v58, %v1347_v57 }
 0x166   : > { %2597 = vst.msk [vmem:[%s3768_s4 + $0x28] sm:$0xff] %vm2591_vm2, %v2588_v55  ;;  %v2582_v61 = vadd.f32 %v3313_v56, %v2935_v26 }
 0x167   : > { %2596 = vst.msk [vmem:[%s3768_s4 + $0x20] sm:$0xff] %vm2591_vm2, %v2587_v59  ;;  %v2581_v62 = vadd.f32 %v3314_v60, %v2935_v26 }
 0x168   : > { %v2590_v63 = vmax.f32 %v2582_v61, 0.0 }
 0x169   : > { %v2589_v0 = vmax.f32 %v2581_v62, 0.0 }
 0x16a   : > { %2599 = vst.msk [vmem:[%s3768_s4 + $0x38] sm:$0xff] %vm2591_vm2, %v2590_v63 }
 0x16b   : > { %2598 = vst.msk [vmem:[%s3768_s4 + $0x30] sm:$0xff] %vm2591_vm2, %v2589_v0 }
 0x16c PF: > { %s13_s12 = sadd.s32 1, %s3442_s12  }
 0x16d   : > { %p10_p5 = scmp.ge.s32.totalorder %s13_s12, 4  }
 0x16f   :  { %12 = sbr.rel (!%p10_p5) target bundleno = 1 (0x1), region = 84 }

// kernel: encoder_forward_pallas.5
= control target key start
LH: loop header
LB: loop body
LE: loop exit
PB: predicated region body
PF: predicated region fallthrough
CT: control target
= control target key end

     0   :  { %10 = vsyncpa [#allocation5], 0  ;;  %s4752_s0 = inlined_call_operand.vmem [shape: f32[2,4,4,32], index: 0, kind: input, shape index: {}]   ;;  %s4753_s1 = inlined_call_operand.vmem [shape: f32[9,32,32], index: 1, kind: input, shape index: {}]   ;;  %s4754_s2 = inlined_call_operand.vmem [shape: f32[1,32], index: 2, kind: input, shape index: {}]   ;;  %s4755_s3 = inlined_call_operand.vmem [shape: f32[9,32,8], index: 3, kind: input, shape index: {}]   ;;  %s4756_s4 = inlined_call_operand.vmem [shape: f32[8,32], index: 4, kind: input, shape index: {}]   ;;  %s4757_s5 = inlined_call_operand.hbm [shape: f32[2,4,4,32], index: 5, kind: output, shape index: {}]  }
   0x1   :  { %12 = vsyncpa [#allocation5 + $0x1], 0  ;;  %s4223_s18 = smov 0   ;;  %s4225_s19 = smov 0  }
   0x2   :  { %s4227_s20 = smov 0   ;;  %s4229_s21 = smov 0  }
   0x3 LB: > { %s4244_s22 = sadd.s32 4294967295, %s4187_s21   ;;  %s3121_s23 = sadd.s32 4294967294, %s4187_s21   ;;  %s4187_s21 = sphi %s4229_s21, %s4763_s21   ;;  %s4183_s20 = sphi %s4227_s20, %s4762_s20   ;;  %s4179_s19 = sphi %s4225_s19, %s4761_s19   ;;  %s4175_s18 = sphi %s4223_s18, %s4760_s18  }
   0x4   : > { %s4248_s24 = sadd.s32 1, %s4187_s21   ;;  %s135_s25 = sadd.s32 1, %s4183_s20 }
   0x5   : > { %s132_s26 = ssub.s32 %s4187_s21, %s4248_s24  ;;  %p145_p0 = scmp.ne.s32.totalorder %s4183_s20, %s4179_s19 }
   0x6   : > { %p133_p1 = scmp.eq.s32.totalorder %s132_s26, 0  ;;  %p146_p2 = scmp.eq.s32.totalorder %s4244_s22, 1 }
   0x7   : > { %p151_p3 = scmp.ne.s32.totalorder %s4179_s19, %s4175_s18  ;;  %p152_p4 = scmp.eq.s32.totalorder %s3121_s23, 1 }
   0x8   : > { %s4259_s27 = scalar_select %p133_p1, %s4183_s20, %s135_s25  }
   0x9   : > { %p4261_p5 = por %p146_p2, %p145_p0  ;;  %p4265_p6 = por %p152_p4, %p151_p3 }
   0xa   : > { %p3124_p7 = scmp.ge.s32.totalorder %s4187_s21, 1  ;;  %p190_p8 = scmp.lt.s32.totalorder %s4187_s21, 3 }
   0xc   : > { %p191_p9 = pnand %p3124_p7, %p190_p8 }
   0xd   : > { %v3128_v0 = vld [vmem:[%s4753_s1 + $0x20] sm:$0xff] (!%p191_p9)  ;;  %v3129_v1 = vld [vmem:[%s4753_s1 + $0x28] sm:$0xff] (!%p191_p9)  ;;  %v3130_v2 = vld [vmem:[%s4753_s1 + $0x30] sm:$0xff] (!%p191_p9)  ;;  %p218_p10 = scmp.lt.s32.totalorder (!%p191_p9), %s4244_s22, 1  ;;  %vm223_vm0 = vcmask (!%p191_p9), 259072   ;;  %v4189_v5 = vmov (!%p191_p9), 0.0  }
   0xe   : > { %194 = sbr.rel (%p191_p9) target bundleno = 1343 (0x53f), region = 40  ;;  %v3765_v3 = vpack.c.bf16 (!%p191_p9), %v3129_v1, %v3128_v0  ;;  %v3131_v4 = vld [vmem:[%s4753_s1 + $0x38] sm:$0xff] (!%p191_p9)  ;;  %224 = vst.msk [vmem:[#allocation2] sm:$0x3f] (!%p191_p9), %vm223_vm0, %v4189_v5  ;;  %225 = vst.msk [vmem:[#allocation2 + $0x8] sm:$0x3f] (!%p191_p9), %vm223_vm0, %v4189_v5 }
   0xf   : > { %226 = vst.msk [vmem:[#allocation2 + $0x10] sm:$0x3f] (!%p191_p9), %vm223_vm0, %v4189_v5  ;;  %227 = vst.msk [vmem:[#allocation2 + $0x18] sm:$0x3f] (!%p191_p9), %vm223_vm0, %v4189_v5  ;;  %v3769_v6 = vpack.c.bf16 (!%p191_p9), %v3131_v4, %v3130_v2  ;;  %v244_v7 = vld [vmem:[%s4753_s1] sm:$0xff] (!%p191_p9)  ;;  %v245_v8 = vld [vmem:[%s4753_s1 + $0x8] sm:$0xff] (!%p191_p9) }
  0x10   : > { %228 = vst.msk [vmem:[#allocation2 + $0x20] sm:$0x3f] (!%p191_p9), %vm223_vm0, %v4189_v5  ;;  %229 = vst.msk [vmem:[#allocation2 + $0x28] sm:$0x3f] (!%p191_p9), %vm223_vm0, %v4189_v5  ;;  %3766 = vmatprep.subr.bf16.mxu0 (!%p191_p9), %v3765_v3  ;;  %vm235_vm1 = vcmask (!%p191_p9), 257024   ;;  %v3773_v9 = vpack.c.bf16 (!%p191_p9), %v245_v8, %v244_v7  ;;  %v246_v14 = vld [vmem:[%s4753_s1 + $0x10] sm:$0xff] (!%p191_p9) }
  0x11   : > { %3768 = vmatpush3.bf16.msra.mxu0 (!%p191_p9), %v3765_v3  ;;  %v247_v15 = vld [vmem:[%s4753_s1 + $0x18] sm:$0xff] (!%p191_p9)  ;;  %vm263_vm2 = vcmask (!%p191_p9), 261120   ;;  %v3136_v17 = vld [vmem:[%s4753_s1 + $0x40] sm:$0xff] (!%p191_p9)  ;;  %v3137_v18 = vld [vmem:[%s4753_s1 + $0x48] sm:$0xff] (!%p191_p9)  ;;  %vm1990_vm3 = vcmask (!%p191_p9), 64512   ;;  %s215_s14 = sand.u32 (!%p191_p9), 1, %s4179_s19  }
  0x12   : > { %3770 = vmatprep.subr.bf16.mxu0 (!%p191_p9), %v3769_v6  ;;  %v3777_v20 = vpack.c.bf16 (!%p191_p9), %v247_v15, %v246_v14  ;;  %v3781_v22 = vpack.c.bf16 (!%p191_p9), %v3137_v18, %v3136_v17  ;;  %v3138_v23 = vld [vmem:[%s4753_s1 + $0x50] sm:$0xff] (!%p191_p9)  ;;  %v3139_v24 = vld [vmem:[%s4753_s1 + $0x58] sm:$0xff] (!%p191_p9)  ;;  %v3142_v28 = vld [vmem:[%s4753_s1 + $0x60] sm:$0xff] (!%p191_p9)  ;;  %s3125_s15 = sshll.u32 (!%p191_p9), %s215_s14, 4  ;;  %s3289_s16 = sshll.u32 (!%p191_p9), %s4244_s22, 8 }
  0x13   : > { %v3785_v27 = vpack.c.bf16 (!%p191_p9), %v3139_v24, %v3138_v23  ;;  %v3143_v29 = vld [vmem:[%s4753_s1 + $0x68] sm:$0xff] (!%p191_p9)  ;;  %v3144_v31 = vld [vmem:[%s4753_s1 + $0x70] sm:$0xff] (!%p191_p9)  ;;  %v3145_v32 = vld [vmem:[%s4753_s1 + $0x78] sm:$0xff] (!%p191_p9)  ;;  %s217_s17 = scalar_lea.vmem (!%p191_p9), [#allocation4], %s3125_s15  ;;  %s4190_s7 = smov (!%p191_p9), [#allocation4]  }
  0x14   : > { %v3789_v30 = vpack.c.bf16 (!%p191_p9), %v3143_v29, %v3142_v28  ;;  %v3148_v35 = vld [vmem:[%s4753_s1 + $0x80] sm:$0xff] (!%p191_p9)  ;;  %v3793_v36 = vpack.c.bf16 (!%p191_p9), %v3145_v32, %v3144_v31  ;;  %v3149_v37 = vld [vmem:[%s4753_s1 + $0x88] sm:$0xff] (!%p191_p9)  ;;  %v3150_v39 = vld [vmem:[%s4753_s1 + $0x90] sm:$0xff] (!%p191_p9)  ;;  %s4129_s8 = sshll.u32 (!%p191_p9), %s4190_s7, 4  ;;  %s4130_s8 = int_to_ptr.vmem [resolvable:$false] %s4129_s8 }
  0x15   : > { %s219_s13 = scalar_select %p218_p10, %s4244_s22, 1  ;;  %3772 = vmatpush3.bf16.msra.mxu0 %v3769_v6  ;;  %v3797_v38 = vpack.c.bf16 %v3149_v37, %v3148_v35  ;;  %v3151_v40 = vld [vmem:[%s4753_s1 + $0x98] sm:$0xff]  ;;  %v3154_v44 = vld [vmem:[%s4753_s1 + $0xa0] sm:$0xff]  ;;  %v3155_v45 = vld [vmem:[%s4753_s1 + $0xa8] sm:$0xff] }
  0x16   : > { %3774 = vmatprep.subr.bf16.mxu0 %v3773_v9  ;;  %v3801_v43 = vpack.c.bf16 %v3151_v40, %v3150_v39  ;;  %v3805_v46 = vpack.c.bf16 %v3155_v45, %v3154_v44  ;;  %v3156_v47 = vld [vmem:[%s4753_s1 + $0xb0] sm:$0xff]  ;;  %v3157_v48 = vld [vmem:[%s4753_s1 + $0xb8] sm:$0xff]  ;;  %v3160_v52 = vld [vmem:[%s4753_s1 + $0xc0] sm:$0xff]  ;;  %s4711_s22 = scalar_lea.sflag [#allocation5], %s215_s14  ;;  %s4131_s9 = scalar_lea.vmem %s4130_s8, 512 }
  0x17   : > { %s3288_s23 = sshll.u32 %s219_s13, 4  ;;  %v3809_v51 = vpack.c.bf16 %v3157_v48, %v3156_v47  ;;  %v3161_v53 = vld [vmem:[%s4753_s1 + $0xc8] sm:$0xff]  ;;  %v3162_v55 = vld [vmem:[%s4753_s1 + $0xd0] sm:$0xff]  ;;  %v3163_v56 = vld [vmem:[%s4753_s1 + $0xd8] sm:$0xff] }
  0x18   : > { %s222_s30 = scalar_lea.vmem %s4752_s0, %s3288_s23  ;;  %v3813_v54 = vpack.c.bf16 %v3161_v53, %v3160_v52  ;;  %v3817_v59 = vpack.c.bf16 %v3163_v56, %v3162_v55  ;;  %v3166_v60 = vld [vmem:[%s4753_s1 + $0xe0] sm:$0xff]  ;;  %v3167_v61 = vld [vmem:[%s4753_s1 + $0xe8] sm:$0xff]  ;;  %v3168_v63 = vld [vmem:[%s4753_s1 + $0xf0] sm:$0xff]  ;;  %s3059_s23 = sshll.u32 %s217_s17, 4  ;;  %s4706_s23 = int_to_ptr.vmem [resolvable:$true] %s3059_s23 }
  0x19   : > { %v230_v10 = vld [vmem:[%s222_s30] sm:$0xf]  ;;  %v233_v11 = vld [vmem:[%s222_s30 + $0xc] sm:$0xf]  ;;  %v231_v12 = vld [vmem:[%s222_s30 + $0x4] sm:$0xf]  ;;  %v3821_v62 = vpack.c.bf16 %v3167_v61, %v3166_v60  ;;  %p4132_p0 = scmp.lt.s32.totalorder %s4706_s23, %s4130_s8 }
  0x1a   : > { %236 = vst.msk [vmem:[#allocation2 + $0x9] sm:$0xf] %vm235_vm1, %v230_v10  ;;  %239 = vst.msk [vmem:[#allocation2 + $0x21] sm:$0xf] %vm235_vm1, %v233_v11  ;;  %v232_v13 = vld [vmem:[%s222_s30 + $0x8] sm:$0xf]  ;;  %s4704_s30 = scalar_lea.hbm %s4757_s5, %s3289_s16 }
  0x1b   : > { %237 = vst.msk [vmem:[#allocation2 + $0x11] sm:$0xf] %vm235_vm1, %v231_v12  ;;  %238 = vst.msk [vmem:[#allocation2 + $0x19] sm:$0xf] %vm235_vm1, %v232_v13  ;;  %v3169_v0 = vld [vmem:[%s4753_s1 + $0xf8] sm:$0xff]  ;;  %v3172_v4 = vld [vmem:[%s4753_s1 + $0x100] sm:$0xff] }
  0x1c   : > { %v3825_v3 = vpack.c.bf16 %v3169_v0, %v3168_v63  ;;  %v3173_v5 = vld [vmem:[%s4753_s1 + $0x108] sm:$0xff]  ;;  %v3174_v7 = vld [vmem:[%s4753_s1 + $0x110] sm:$0xff]  ;;  %v3175_v8 = vld [vmem:[%s4753_s1 + $0x118] sm:$0xff]  ;;  %s4125_s6 = scalar_lea.vmem %s4706_s23, 256 }
  0x1d   : > { %v3829_v6 = vpack.c.bf16 %v3173_v5, %v3172_v4  ;;  %v3833_v11 = vpack.c.bf16 %v3175_v8, %v3174_v7  ;;  %v3179_v13 = vld [vmem:[%s4755_s3 + $0x20] sm:$0xff]  ;;  %v3180_v14 = vld [vmem:[%s4755_s3 + $0x28] sm:$0xff]  ;;  %v3202_v23 = vld [vmem:[%s4755_s3 + $0x98] sm:$0xff]  ;;  %p4126_p11 = scmp.ne.s32.totalorder %s4706_s23, %s4125_s6  ;;  %p4133_p1 = scmp.lt.s32.totalorder %s4131_s9, %s4125_s6 }
  0x1e   : > { %v4412_v15 = vpack.c.bf16 %v3180_v14, %v3179_v13  ;;  %v3200_v17 = vld [vmem:[%s4755_s3 + $0x88] sm:$0xff]  ;;  %v3205_v28 = vld [vmem:[%s4755_s3 + $0xa0] sm:$0xff]  ;;  %v3207_v44 = vld [vmem:[%s4755_s3 + $0xb0] sm:$0xff] }
  0x1f   : > { %v3206_v29 = vld [vmem:[%s4755_s3 + $0xa8] sm:$0xff]  ;;  %v3178_v31 = vld [vmem:[%s4754_s2] ss:$0 sm:$0xff]  ;;  %v3208_v45 = vld [vmem:[%s4755_s3 + $0xb8] sm:$0xff]  ;;  %p4127_p12 = pnand %p4126_p11, %p4261_p5  ;;  %p4134_p2 = por %p4133_p1, %p4132_p0 }
  0x20   : > { %v3187_v47 = vld [vmem:[%s4755_s3 + $0x40] sm:$0xff]  ;;  %v3188_v48 = vld [vmem:[%s4755_s3 + $0x48] sm:$0xff]  ;;  %v4507_v56 = vpack.c.bf16 %v3208_v45, %v3207_v44  ;;  %v3190_v60 = vld [vmem:[%s4755_s3 + $0x58] sm:$0xff] }
  0x21   : > { %v4071_v16 = vld [vmem:[#allocation2 + $0x1] ss:$8 sps:$4 sm:$0xff]   ;;  %v3213_v61 = vld [vmem:[%s4755_s3 + $0xd0] sm:$0xff]  ;;  %v3214_v63 = vld [vmem:[%s4755_s3 + $0xd8] sm:$0xff]  ;;  %p4128_p13 = pneg %p4127_p12 }
  0x22   : > { %v4072_v19 = vld [vmem:[#allocation2 + $0x11] ss:$8 sps:$4 sm:$0xff]   ;;  %3466 = vmatprep.mubr.msk.f32.mxu0 %vm263_vm2, %v4071_v16  ;;  %v4073_v21 = vld [vmem:[#allocation2] ss:$8 sps:$4 sm:$0xff]   ;;  %v4552_v8 = vpack.c.bf16 %v3214_v63, %v3213_v61 }
  0x23   : > { %3467 = vmatmul.mubr.msk.f32.vlgmr.msra.gmra.mrb[0].mxu0 %vm263_vm2, %v4072_v19  ;;  %v4074_v25 = vld [vmem:[#allocation2 + $0x10] ss:$8 sps:$4 sm:$0xff]   ;;  %v4075_v26 = vld [vmem:[#allocation2 + $0x2] ss:$8 sps:$4 sm:$0xff]   ;;  %p4135_p3 = pnand %p4134_p2, %p4128_p13 }
  0x24   : > { %3776 = vmatpush3.bf16.msra.mxu0 %v3773_v9  ;;  %3477 = vmatprep.mubr.msk.f32.mxu0 %vm263_vm2, %v4073_v21  ;;  %v4076_v33 = vld [vmem:[#allocation2 + $0x12] ss:$8 sps:$4 sm:$0xff]   ;;  %v4084_v1 = vld [vmem:[#allocation2 + $0x20] ss:$8 sps:$4 sm:$0xff]  }
  0x25   : > { %3778 = vmatprep.subr.bf16.mxu0 %v3777_v20  ;;  %v4077_v34 = vld [vmem:[#allocation2 + $0x8] ss:$8 sps:$4 sm:$0xff]   ;;  %v4078_v41 = vld [vmem:[#allocation2 + $0x18] ss:$8 sps:$4 sm:$0xff]  }
  0x26   : > { %v4079_v42 = vld [vmem:[#allocation2 + $0x9] ss:$8 sps:$4 sm:$0xff]   ;;  %v4080_v49 = vld [vmem:[#allocation2 + $0x19] ss:$8 sps:$4 sm:$0xff]  }
  0x27   : > { %v4081_v50 = vld [vmem:[#allocation2 + $0xa] ss:$8 sps:$4 sm:$0xff]   ;;  %v4082_v57 = vld [vmem:[#allocation2 + $0x1a] ss:$8 sps:$4 sm:$0xff]  }
  0x28   : > { %3780 = vmatpush3.bf16.msra.mxu0 %v3777_v20  ;;  %v4083_v58 = vld [vmem:[#allocation2 + $0x10] ss:$8 sps:$4 sm:$0xff]   ;;  %v4086_v9 = vld [vmem:[#allocation2 + $0x21] ss:$8 sps:$4 sm:$0xff]  }
  0x29   : > { %3782 = vmatprep.subr.bf16.mxu0 %v3781_v22  ;;  %v4085_v2 = vld [vmem:[#allocation2 + $0x11] ss:$8 sps:$4 sm:$0xff]   ;;  %v4088_v12 = vld [vmem:[#allocation2 + $0x22] ss:$8 sps:$4 sm:$0xff]  }
  0x2a   : > { %v4087_v10 = vld [vmem:[#allocation2 + $0x12] ss:$8 sps:$4 sm:$0xff]   ;;  %v3199_v16 = vld [vmem:[%s4755_s3 + $0x80] sm:$0xff]  ;;  %v3212_v53 = vld [vmem:[%s4755_s3 + $0xc8] sm:$0xff] }
  0x2b   : > { %3478 = vmatmul.mubr.msk.f32.vlgmr.msra.gmra.mrb[0].mxu0 %vm263_vm2, %v4074_v25  ;;  %v4420_v18 = vpack.c.bf16 %v3200_v17, %v3199_v16  ;;  %v3181_v19 = vld [vmem:[%s4755_s3 + $0x30] sm:$0xff]  ;;  %v3182_v20 = vld [vmem:[%s4755_s3 + $0x38] sm:$0xff]  ;;  %v1130_v25 = vld [vmem:[%s4755_s3] sm:$0xff] }
  0x2c   : > { %3784 = vmatpush3.bf16.msra.mxu0 %v3781_v22  ;;  %3488 = vmatprep.mubr.msk.f32.mxu0 %vm263_vm2, %v4075_v26  ;;  %v3201_v21 = vld [vmem:[%s4755_s3 + $0x90] sm:$0xff]  ;;  %v4432_v22 = vpack.c.bf16 %v3182_v20, %v3181_v19  ;;  %v1131_v26 = vld [vmem:[%s4755_s3 + $0x8] sm:$0xff]  ;;  %v3211_v52 = vld [vmem:[%s4755_s3 + $0xc0] sm:$0xff] }
  0x2d   : > { %3786 = vmatprep.subr.bf16.mxu0 %v3785_v27  ;;  %3870 = vmatprep.subr.bf16.mxu1 %v4420_v18  ;;  %v4439_v24 = vpack.c.bf16 %v3202_v23, %v3201_v21  ;;  %v3193_v0 = vld [vmem:[%s4755_s3 + $0x60] sm:$0xff]  ;;  %v3219_v14 = vld [vmem:[%s4755_s3 + $0xf0] sm:$0xff]  ;;  %v3220_v16 = vld [vmem:[%s4755_s3 + $0xf8] sm:$0xff] }
  0x2e   : > { %3872 = vmatpush3.bf16.msra.mxu1 %v4420_v18  ;;  %v3217_v5 = vld [vmem:[%s4755_s3 + $0xe0] sm:$0xff]  ;;  %v4584_v23 = vpack.c.bf16 %v3220_v16, %v3219_v14 }
  0x2f   : > { %3874 = vmatprep.subr.bf16.mxu1 %v4439_v24 }
  0x30   : > { %3788 = vmatpush3.bf16.msra.mxu0 %v3785_v27  ;;  %v4452_v27 = vpack.c.bf16 %v1131_v26, %v1130_v25  ;;  %v3223_v26 = vld [vmem:[%s4755_s3 + $0x100] sm:$0xff] }
  0x31   : > { %3790 = vmatprep.subr.bf16.mxu0 %v3789_v30 }
  0x32   : > { %3876 = vmatpush3.bf16.msra.mxu1 %v4439_v24 }
  0x33   : > { %3489 = vmatmul.mubr.msk.f32.vlgmr.msra.gmra.mrb[0].mxu0 %vm263_vm2, %v4076_v33 }
  0x34   : > { %3792 = vmatpush3.bf16.msra.mxu0 %v3789_v30  ;;  %3499 = vmatprep.mubr.msk.f32.mxu0 %vm263_vm2, %v4077_v34  ;;  %v4461_v30 = vpack.c.bf16 %v3206_v29, %v3205_v28  ;;  %v3224_v28 = vld [vmem:[%s4755_s3 + $0x108] sm:$0xff] }
  0x35   : > { %3794 = vmatprep.subr.bf16.mxu0 %v3793_v36  ;;  %v4599_v29 = vpack.c.bf16 %v3224_v28, %v3223_v26 }
  0x36   : > { %3878 = vmatprep.subr.bf16.mxu1 %v4461_v30 }
  0x38   : > { %3796 = vmatpush3.bf16.msra.mxu0 %v3793_v36 }
  0x39   : > { %3798 = vmatprep.subr.bf16.mxu0 %v3797_v38 }
  0x3b   : > { %3500 = vmatmul.mubr.msk.f32.vlgmr.msra.gmra.mrb[0].mxu0 %vm263_vm2, %v4078_v41 }
  0x3c   : > { %3800 = vmatpush3.bf16.msra.mxu0 %v3797_v38  ;;  %3510 = vmatprep.mubr.msk.f32.mxu0 %vm263_vm2, %v4079_v42  ;;  %v1132_v42 = vld [vmem:[%s4755_s3 + $0x10] sm:$0xff] }
  0x3d   : > { %3802 = vmatprep.subr.bf16.mxu0 %v3801_v43 }
  0x40   : > { %3804 = vmatpush3.bf16.msra.mxu0 %v3801_v43  ;;  %v1133_v43 = vld [vmem:[%s4755_s3 + $0x18] sm:$0xff] }
  0x41   : > { %3806 = vmatprep.subr.bf16.mxu0 %v3805_v46  ;;  %v4505_v55 = vpack.c.bf16 %v1133_v43, %v1132_v42 }
  0x43   : > { %3511 = vmatmul.mubr.msk.f32.vlgmr.msra.gmra.mrb[0].mxu0 %vm263_vm2, %v4080_v49 }
  0x44   : > { %3808 = vmatpush3.bf16.msra.mxu0 %v3805_v46  ;;  %3521 = vmatprep.mubr.msk.f32.mxu0 %vm263_vm2, %v4081_v50 }
  0x45   : > { %3810 = vmatprep.subr.bf16.mxu0 %v3809_v51 }
  0x48   : > { %3812 = vmatpush3.bf16.msra.mxu0 %v3809_v51 }
  0x49   : > { %3814 = vmatprep.subr.bf16.mxu0 %v3813_v54 }
  0x4b   : > { %3522 = vmatmul.mubr.msk.f32.vlgmr.msra.gmra.mrb[0].mxu0 %vm263_vm2, %v4082_v57 }
  0x4c   : > { %3816 = vmatpush3.bf16.msra.mxu0 %v3813_v54  ;;  %3532 = vmatprep.mubr.msk.f32.mxu0 %vm263_vm2, %v4083_v58  ;;  %v3189_v58 = vld [vmem:[%s4755_s3 + $0x50] sm:$0xff] }
  0x4d   : > { %3818 = vmatprep.subr.bf16.mxu0 %v3817_v59 }
  0x50   : > { %3820 = vmatpush3.bf16.msra.mxu0 %v3817_v59  ;;  %v4516_v59 = vpack.c.bf16 %v3188_v48, %v3187_v47 }
  0x51   : > { %3822 = vmatprep.subr.bf16.mxu0 %v3821_v62 }
  0x53   : > { %3533 = vmatmul.mubr.msk.f32.vlgmr.msra.gmra.mrb[0].mxu0 %vm263_vm2, %v4084_v1  ;;  %v3194_v1 = vld [vmem:[%s4755_s3 + $0x68] sm:$0xff] }
  0x54   : > { %3824 = vmatpush3.bf16.msra.mxu0 %v3821_v62  ;;  %3543 = vmatprep.mubr.msk.f32.mxu0 %vm263_vm2, %v4085_v2  ;;  %v4528_v62 = vpack.c.bf16 %v3212_v53, %v3211_v52 }
  0x55   : > { %3826 = vmatprep.subr.bf16.mxu0 %v3825_v3 }
  0x58   : > { %3828 = vmatpush3.bf16.msra.mxu0 %v3825_v3  ;;  %v4541_v3 = vpack.c.bf16 %v3190_v60, %v3189_v58 }
  0x59   : > { %3830 = vmatprep.subr.bf16.mxu0 %v3829_v6 }
  0x5b   : > { %3544 = vmatmul.mubr.msk.f32.vlgmr.msra.gmra.mrb[0].mxu0 %vm263_vm2, %v4086_v9 }
  0x5c   : > { %3832 = vmatpush3.bf16.msra.mxu0 %v3829_v6  ;;  %3554 = vmatprep.mubr.msk.f32.mxu0 %vm263_vm2, %v4087_v10  ;;  %v3218_v6 = vld [vmem:[%s4755_s3 + $0xe8] sm:$0xff]  ;;  %v4558_v10 = vpack.c.bf16 %v3194_v1, %v3193_v0 }
  0x5d   : > { %3834 = vmatprep.subr.bf16.mxu0 %v3833_v11  ;;  %v4569_v13 = vpack.c.bf16 %v3218_v6, %v3217_v5 }
  0x60   : > { %3836 = vmatpush3.bf16.msra.mxu0 %v3833_v11  ;;  %v3195_v11 = vld [vmem:[%s4755_s3 + $0x70] sm:$0xff] }
  0x61   : > { %3838 = vmatprep.subr.bf16.mxu0 %v4412_v15 }
  0x63   : > { %3555 = vmatmul.mubr.msk.f32.vlgmr.msra.gmra.mrb[0].mxu0 %vm263_vm2, %v4088_v12  ;;  %v3196_v12 = vld [vmem:[%s4755_s3 + $0x78] sm:$0xff] }
  0x64   : > { %3840 = vmatpush3.bf16.msra.mxu0 %v4412_v15  ;;  %v4579_v19 = vpack.c.bf16 %v3196_v12, %v3195_v11 }
  0x65   : > { %3842 = vmatprep.subr.bf16.mxu0 %v4432_v22 }
  0x68   : > { %3844 = vmatpush3.bf16.msra.mxu0 %v4432_v22 }
  0x69   : > { %3846 = vmatprep.subr.bf16.mxu0 %v4452_v27 }
 0x136   : > { %v3556_v32 = vpop.f32.mrb[0].mxu0 }
 0x137   : > { %v1109_v33 = vadd.f32 %v3556_v32, %v3178_v31  ;;  %v1090_v34 = vpop.f32.mrb[1].mxu0  ;;  %v3226_v32 = vld [vmem:[%s4755_s3 + $0x118] sm:$0xff] }
 0x138   : > { %v1108_v35 = vadd.f32 %v3178_v31, %v1090_v34  ;;  %v3225_v31 = vld [vmem:[%s4755_s3 + $0x110] sm:$0xff] }
 0x139   : > { %1111 = vst.msk [vmem:[#allocation3 + $0x8] sm:$0xff] %vm263_vm2, %v1109_v33 }
 0x13a   : > { %1110 = vst.msk [vmem:[#allocation3] sm:$0xff] %vm263_vm2, %v1108_v35  ;;  %v4611_v35 = vpack.c.bf16 %v3226_v32, %v3225_v31 }
 0x140   : > { %v4469_v36 = vld [vmem:[#allocation3 + $0x8] sm:$0xff] }
 0x141   : > { %v1115_v37 = vmax.f32 %v4469_v36, 0.0  ;;  %v4472_v38 = vld [vmem:[#allocation3] sm:$0xff] }
 0x142   : > { %v1114_v39 = vmax.f32 %v4472_v38, 0.0 }
 0x143   : > { %v1119_v40 = vcombine.high %v1115_v37, %v1115_v37  ;;  %1124 = vst.msk [vmem:[#allocation2 + $0x19] sm:$0xf] %vm235_vm1, %v1115_v37 }
 0x144   : > { %v1118_v41 = vcombine.high %v1114_v39, %v1114_v39  ;;  %1122 = vst.msk [vmem:[#allocation2 + $0x9] sm:$0xf] %vm235_vm1, %v1114_v39 }
 0x145   : > { %1125 = vst.msk [vmem:[#allocation2 + $0x21] sm:$0xf] %vm235_vm1, %v1119_v40  ;;  %v1989_v40 = vld [vmem:[%s4756_s4] sm:$0xff] }
 0x146   : > { %1123 = vst.msk [vmem:[#allocation2 + $0x11] sm:$0xf] %vm235_vm1, %v1118_v41 }
 0x14b   : > { %v4089_v46 = vld [vmem:[#allocation2 + $0x1] ss:$8 sps:$4 sm:$0xff]  }
 0x14c   : > { %3565 = vmatprep.mubr.msk.f32.mxu0 %vm263_vm2, %v4089_v46  ;;  %v4092_v51 = vld [vmem:[#allocation2] ss:$8 sps:$4 sm:$0xff]  }
 0x14d   : > { %v4090_v49 = vld [vmem:[#allocation2 + $0x11] ss:$8 sps:$4 sm:$0xff]   ;;  %v4096_v4 = vld [vmem:[#allocation2 + $0x2] ss:$8 sps:$4 sm:$0xff]  }
 0x14e   : > { %v4091_v50 = vld [vmem:[#allocation2 + $0x9] ss:$8 sps:$4 sm:$0xff]   ;;  %3566 = vmatmul.mubr.msk.f32.vlgmr.msra.gmra.mrb[2].mxu0 %vm263_vm2, %v4090_v49  ;;  %v4093_v54 = vld [vmem:[#allocation2 + $0x19] ss:$8 sps:$4 sm:$0xff]  }
 0x14f   : > { %3609 = vmatprep.mubr.msk.f32.mxu1 %vm263_vm2, %v4091_v50  ;;  %3848 = vmatpush3.bf16.msra.mxu0 %v4452_v27  ;;  %v4094_v57 = vld [vmem:[#allocation2 + $0xa] ss:$8 sps:$4 sm:$0xff]   ;;  %v4097_v7 = vld [vmem:[#allocation2 + $0x1a] ss:$8 sps:$4 sm:$0xff]  }
 0x150   : > { %3576 = vmatprep.mubr.msk.f32.mxu0 %vm263_vm2, %v4092_v51  ;;  %3610 = vmatmul.mubr.msk.f32.vlgmr.msra.gmra.mrb[0].mxu1 %vm263_vm2, %v4093_v54  ;;  %v4095_v2 = vld [vmem:[#allocation2 + $0x10] ss:$8 sps:$4 sm:$0xff]   ;;  %v4101_v21 = vld [vmem:[#allocation2 + $0x20] ss:$8 sps:$4 sm:$0xff]  }
 0x151   : > { %3880 = vmatpush3.bf16.msra.mxu1 %v4461_v30  ;;  %3620 = vmatprep.mubr.msk.f32.mxu1 %vm263_vm2, %v4094_v57  ;;  %v4098_v9 = vld [vmem:[#allocation2 + $0x10] ss:$8 sps:$4 sm:$0xff]   ;;  %v4104_v34 = vld [vmem:[#allocation2 + $0x21] ss:$8 sps:$4 sm:$0xff]  }
 0x152   : > { %3850 = vmatprep.subr.bf16.mxu0 %v4505_v55  ;;  %3882 = vmatprep.subr.bf16.mxu1 %v4507_v56  ;;  %v4099_v17 = vld [vmem:[#allocation2 + $0x12] ss:$8 sps:$4 sm:$0xff]   ;;  %v4106_v39 = vld [vmem:[#allocation2 + $0x22] ss:$8 sps:$4 sm:$0xff]  }
 0x153   : > { %3852 = vmatpush3.bf16.msra.mxu0 %v4505_v55  ;;  %v4100_v20 = vld [vmem:[#allocation2 + $0x8] ss:$8 sps:$4 sm:$0xff]   ;;  %v4103_v33 = vld [vmem:[#allocation2 + $0x18] ss:$8 sps:$4 sm:$0xff]  }
 0x154   : > { %3854 = vmatprep.subr.bf16.mxu0 %v4516_v59  ;;  %v4102_v25 = vld [vmem:[#allocation2 + $0x11] ss:$8 sps:$4 sm:$0xff]  }
 0x155   : > { %3884 = vmatpush3.bf16.msra.mxu1 %v4507_v56  ;;  %v4105_v37 = vld [vmem:[#allocation2 + $0x12] ss:$8 sps:$4 sm:$0xff]  }
 0x156   : > { %3577 = vmatmul.mubr.msk.f32.vlgmr.msra.gmra.mrb[2].mxu0 %vm263_vm2, %v4095_v2  ;;  %3886 = vmatprep.subr.bf16.mxu1 %v4528_v62 }
 0x157   : > { %3856 = vmatpush3.bf16.msra.mxu0 %v4516_v59  ;;  %3587 = vmatprep.mubr.msk.f32.mxu0 %vm263_vm2, %v4096_v4 }
 0x158   : > { %3621 = vmatmul.mubr.msk.f32.vlgmr.msra.gmra.mrb[0].mxu1 %vm263_vm2, %v4097_v7  ;;  %3858 = vmatprep.subr.bf16.mxu0 %v4541_v3 }
 0x159   : > { %3888 = vmatpush3.bf16.msra.mxu1 %v4528_v62  ;;  %3631 = vmatprep.mubr.msk.f32.mxu1 %vm263_vm2, %v4098_v9 }
 0x15a   : > { %3890 = vmatprep.subr.bf16.mxu1 %v4552_v8 }
 0x15b   : > { %3860 = vmatpush3.bf16.msra.mxu0 %v4541_v3 }
 0x15c   : > { %3862 = vmatprep.subr.bf16.mxu0 %v4558_v10 }
 0x15d   : > { %3892 = vmatpush3.bf16.msra.mxu1 %v4552_v8 }
 0x15e   : > { %3588 = vmatmul.mubr.msk.f32.vlgmr.msra.gmra.mrb[2].mxu0 %vm263_vm2, %v4099_v17  ;;  %3894 = vmatprep.subr.bf16.mxu1 %v4569_v13 }
 0x15f   : > { %3864 = vmatpush3.bf16.msra.mxu0 %v4558_v10  ;;  %3598 = vmatprep.mubr.msk.f32.mxu0 %vm263_vm2, %v4100_v20 }
 0x160   : > { %3632 = vmatmul.mubr.msk.f32.vlgmr.msra.gmra.mrb[0].mxu1 %vm263_vm2, %v4101_v21  ;;  %3866 = vmatprep.subr.bf16.mxu0 %v4579_v19 }
 0x161   : > { %3896 = vmatpush3.bf16.msra.mxu1 %v4569_v13  ;;  %3642 = vmatprep.mubr.msk.f32.mxu1 %vm263_vm2, %v4102_v25 }
 0x162   : > { %3898 = vmatprep.subr.bf16.mxu1 %v4584_v23 }
 0x163   : > { %3868 = vmatpush3.bf16.msra.mxu0 %v4579_v19 }
 0x164   : > { %3656 = vmatprep.subr.mxu0 %v1989_v40 }
 0x165   : > { %3900 = vmatpush3.bf16.msra.mxu1 %v4584_v23 }
 0x166   : > { %3599 = vmatmul.mubr.msk.f32.vlgmr.msra.gmra.mrb[2].mxu0 %vm263_vm2, %v4103_v33  ;;  %3902 = vmatprep.subr.bf16.mxu1 %v4599_v29 }
 0x167   : > { %3657 = vmatpush3.msra.mxu0 %v1989_v40 }
 0x168   : > { %3643 = vmatmul.mubr.msk.f32.vlgmr.msra.gmra.mrb[0].mxu1 %vm263_vm2, %v4104_v34  ;;  %3760 = vmatprep.subr.mxu0 %v1989_v40 }
 0x169   : > { %3904 = vmatpush3.bf16.msra.mxu1 %v4599_v29  ;;  %3653 = vmatprep.mubr.msk.f32.mxu1 %vm263_vm2, %v4105_v37 }
 0x16a   : > { %3906 = vmatprep.subr.bf16.mxu1 %v4611_v35 }
 0x16d   : > { %3908 = vmatpush3.bf16.msra.mxu1 %v4611_v35 }
 0x16e   : > { %3910 = vmatprep.subr.bf16.mxu1 %v4412_v15 }
 0x170   : > { %3654 = vmatmul.mubr.msk.f32.vlgmr.msra.gmra.mrb[0].mxu1 %vm263_vm2, %v4106_v39 }
 0x171   : > { %3912 = vmatpush3.bf16.msra.mxu1 %v4412_v15 }
 0x172   : > { %3914 = vmatprep.subr.bf16.mxu1 %v4432_v22 }
 0x175   : > { %3916 = vmatpush3.bf16.msra.mxu1 %v4432_v22 }
 0x176   : > { %3918 = vmatprep.subr.bf16.mxu1 %v4452_v27 }
 0x239   : > { %v3600_v41 = vpop.f32.mrb[2].mxu0 }
 0x23a   : > { %v1494_v42 = vpop.f32.mrb[3].mxu0 }
 0x243   : > { %v3655_v43 = vpop.f32.mrb[0].mxu1 }
 0x244   : > { %v3981_v44 = vadd.f32 %v3655_v43, %v3600_v41  ;;  %v1974_v45 = vpop.f32.mrb[1].mxu1 }
 0x245   : > { %v3982_v46 = vadd.f32 %v1974_v45, %v1494_v42 }
 0x246   : > { %v1986_v47 = vmax.f32 %v3981_v44, 0.0 }
 0x247   : > { %v1985_v15 = vmax.f32 %v3982_v46, 0.0 }
 0x249   : > { %3658 = vmatprep.mubr.msk.f32.mxu0 %vm1990_vm3, %v1985_v15 }
 0x24a   : > { %3659 = vmatmul.mubr.msk.f32.vlgmr.msra.gmra.mrb[4].mxu0 %vm1990_vm3, %v1986_v47 }
 0x24b   : > { %3761 = vmatpush3.msra.mxu0 %v1989_v40 }
 0x31d   : > { %v3660_v22 = vpop.f32.mrb[4].mxu0 }
 0x31e   : > { %v2073_v48 = vadd.f32 %v3660_v22, %v4469_v36  ;;  %v2063_v49 = vpop.f32.mrb[5].mxu0 }
 0x31f   : > { %v2072_v50 = vadd.f32 %v2063_v49, %v4472_v38 }
 0x320   : > { %2075 = vst.msk [vmem:[#allocation3 + $0x8] sm:$0xff] %vm263_vm2, %v2073_v48 }
 0x321   : > { %2074 = vst.msk [vmem:[#allocation3] sm:$0xff] %vm263_vm2, %v2072_v50 }
 0x327   : > { %v4633_v51 = vld [vmem:[#allocation3 + $0x8] sm:$0xff] }
 0x328   : > { %v2079_v52 = vmax.f32 %v4633_v51, 0.0  ;;  %v4636_v53 = vld [vmem:[#allocation3] sm:$0xff] }
 0x329   : > { %v2078_v54 = vmax.f32 %v4636_v53, 0.0 }
 0x32a   : > { %v2083_v57 = vcombine.high %v2079_v52, %v2079_v52  ;;  %2088 = vst.msk [vmem:[#allocation2 + $0x19] sm:$0xf] %vm235_vm1, %v2079_v52 }
 0x32b   : > { %v2082_v58 = vcombine.high %v2078_v54, %v2078_v54  ;;  %2086 = vst.msk [vmem:[#allocation2 + $0x9] sm:$0xf] %vm235_vm1, %v2078_v54 }
 0x32c   : > { %2089 = vst.msk [vmem:[#allocation2 + $0x21] sm:$0xf] %vm235_vm1, %v2083_v57 }
 0x32d   : > { %2087 = vst.msk [vmem:[#allocation2 + $0x11] sm:$0xf] %vm235_vm1, %v2082_v58 }
 0x332   : > { %v4107_v36 = vld [vmem:[#allocation2 + $0x1] ss:$8 sps:$4 sm:$0xff]  }
 0x333   : > { %3669 = vmatprep.mubr.msk.f32.mxu1 %vm263_vm2, %v4107_v36  ;;  %v4109_v60 = vld [vmem:[#allocation2] ss:$8 sps:$4 sm:$0xff]  }
 0x334   : > { %v4108_v38 = vld [vmem:[#allocation2 + $0x11] ss:$8 sps:$4 sm:$0xff]   ;;  %v4111_v63 = vld [vmem:[#allocation2 + $0x2] ss:$8 sps:$4 sm:$0xff]  }
 0x335   : > { %3670 = vmatmul.mubr.msk.f32.vlgmr.msra.gmra.mrb[2].mxu1 %vm263_vm2, %v4108_v38  ;;  %v4110_v61 = vld [vmem:[#allocation2 + $0x10] ss:$8 sps:$4 sm:$0xff]   ;;  %v4124_v4 = vld [vmem:[#allocation2 + $0x22] ss:$8 sps:$4 sm:$0xff]  }
 0x336   : > { %3920 = vmatpush3.bf16.msra.mxu1 %v4452_v27  ;;  %3680 = vmatprep.mubr.msk.f32.mxu1 %vm263_vm2, %v4109_v60  ;;  %v4112_v27 = vld [vmem:[#allocation2 + $0x12] ss:$8 sps:$4 sm:$0xff]  }
 0x337   : > { %3922 = vmatprep.subr.bf16.mxu1 %v4505_v55  ;;  %v4113_v0 = vld [vmem:[#allocation2 + $0x8] ss:$8 sps:$4 sm:$0xff]   ;;  %v4116_v1 = vld [vmem:[#allocation2 + $0x19] ss:$8 sps:$4 sm:$0xff]  }
 0x338   : > { %v4117_v2 = vld [vmem:[#allocation2 + $0xa] ss:$8 sps:$4 sm:$0xff]  }
 0x33a   : > { %3924 = vmatpush3.bf16.msra.mxu1 %v4505_v55  ;;  %v4114_v55 = vld [vmem:[#allocation2 + $0x18] ss:$8 sps:$4 sm:$0xff]  }
 0x33b   : > { %3926 = vmatprep.subr.bf16.mxu1 %v4516_v59 }
 0x33d   : > { %3681 = vmatmul.mubr.msk.f32.vlgmr.msra.gmra.mrb[2].mxu1 %vm263_vm2, %v4110_v61 }
 0x33e   : > { %3928 = vmatpush3.bf16.msra.mxu1 %v4516_v59  ;;  %3691 = vmatprep.mubr.msk.f32.mxu1 %vm263_vm2, %v4111_v63  ;;  %v4115_v59 = vld [vmem:[#allocation2 + $0x9] ss:$8 sps:$4 sm:$0xff]  }
 0x33f   : > { %3930 = vmatprep.subr.bf16.mxu1 %v4541_v3 }
 0x342   : > { %3932 = vmatpush3.bf16.msra.mxu1 %v4541_v3  ;;  %v4119_v3 = vld [vmem:[#allocation2 + $0x10] ss:$8 sps:$4 sm:$0xff]  }
 0x343   : > { %3934 = vmatprep.subr.bf16.mxu1 %v4558_v10 }
 0x345   : > { %3692 = vmatmul.mubr.msk.f32.vlgmr.msra.gmra.mrb[2].mxu1 %vm263_vm2, %v4112_v27 }
 0x346   : > { %3936 = vmatpush3.bf16.msra.mxu1 %v4558_v10  ;;  %3702 = vmatprep.mubr.msk.f32.mxu1 %vm263_vm2, %v4113_v0 }
 0x347   : > { %3938 = vmatprep.subr.bf16.mxu1 %v4579_v19 }
 0x34a   : > { %3940 = vmatpush3.bf16.msra.mxu1 %v4579_v19 }
 0x34b   : > { %3942 = vmatprep.subr.bf16.mxu1 %v4420_v18 }
 0x34d   : > { %3703 = vmatmul.mubr.msk.f32.vlgmr.msra.gmra.mrb[2].mxu1 %vm263_vm2, %v4114_v55 }
 0x34e   : > { %3944 = vmatpush3.bf16.msra.mxu1 %v4420_v18  ;;  %3713 = vmatprep.mubr.msk.f32.mxu1 %vm263_vm2, %v4115_v59  ;;  %v4118_v18 = vld [vmem:[#allocation2 + $0x1a] ss:$8 sps:$4 sm:$0xff]  }
 0x34f   : > { %3946 = vmatprep.subr.bf16.mxu1 %v4439_v24 }
 0x352   : > { %3948 = vmatpush3.bf16.msra.mxu1 %v4439_v24  ;;  %v4120_v24 = vld [vmem:[#allocation2 + $0x20] ss:$8 sps:$4 sm:$0xff]  }
 0x353   : > { %3950 = vmatprep.subr.bf16.mxu1 %v4461_v30 }
 0x355   : > { %3714 = vmatmul.mubr.msk.f32.vlgmr.msra.gmra.mrb[2].mxu1 %vm263_vm2, %v4116_v1 }
 0x356   : > { %3952 = vmatpush3.bf16.msra.mxu1 %v4461_v30  ;;  %3724 = vmatprep.mubr.msk.f32.mxu1 %vm263_vm2, %v4117_v2  ;;  %v4121_v30 = vld [vmem:[#allocation2 + $0x11] ss:$8 sps:$4 sm:$0xff]  }
 0x357   : > { %3954 = vmatprep.subr.bf16.mxu1 %v4507_v56 }
 0x35a   : > { %3956 = vmatpush3.bf16.msra.mxu1 %v4507_v56  ;;  %v4122_v56 = vld [vmem:[#allocation2 + $0x21] ss:$8 sps:$4 sm:$0xff]  }
 0x35b   : > { %3958 = vmatprep.subr.bf16.mxu1 %v4528_v62 }
 0x35d   : > { %3725 = vmatmul.mubr.msk.f32.vlgmr.msra.gmra.mrb[2].mxu1 %vm263_vm2, %v4118_v18 }
 0x35e   : > { %3960 = vmatpush3.bf16.msra.mxu1 %v4528_v62  ;;  %3735 = vmatprep.mubr.msk.f32.mxu1 %vm263_vm2, %v4119_v3  ;;  %v4123_v62 = vld [vmem:[#allocation2 + $0x12] ss:$8 sps:$4 sm:$0xff]  }
 0x35f   : > { %3962 = vmatprep.subr.bf16.mxu1 %v4552_v8 }
 0x362   : > { %3964 = vmatpush3.bf16.msra.mxu1 %v4552_v8 }
 0x363   : > { %3966 = vmatprep.subr.bf16.mxu1 %v4569_v13 }
 0x365   : > { %3736 = vmatmul.mubr.msk.f32.vlgmr.msra.gmra.mrb[2].mxu1 %vm263_vm2, %v4120_v24 }
 0x366   : > { %3968 = vmatpush3.bf16.msra.mxu1 %v4569_v13  ;;  %3746 = vmatprep.mubr.msk.f32.mxu1 %vm263_vm2, %v4121_v30 }
 0x367   : > { %3970 = vmatprep.subr.bf16.mxu1 %v4584_v23 }
 0x36a   : > { %3972 = vmatpush3.bf16.msra.mxu1 %v4584_v23 }
 0x36b   : > { %3974 = vmatprep.subr.bf16.mxu1 %v4599_v29 }
 0x36d   : > { %3747 = vmatmul.mubr.msk.f32.vlgmr.msra.gmra.mrb[2].mxu1 %vm263_vm2, %v4122_v56 }
 0x36e   : > { %3976 = vmatpush3.bf16.msra.mxu1 %v4599_v29  ;;  %3757 = vmatprep.mubr.msk.f32.mxu1 %vm263_vm2, %v4123_v62 }
 0x36f   : > { %3978 = vmatprep.subr.bf16.mxu1 %v4611_v35 }
 0x372   : > { %3980 = vmatpush3.bf16.msra.mxu1 %v4611_v35 }
 0x375   : > { %3758 = vmatmul.mubr.msk.f32.vlgmr.msra.gmra.mrb[2].mxu1 %vm263_vm2, %v4124_v4 }
 0x448   : > { %v3759_v5 = vpop.f32.mrb[2].mxu1 }
 0x449   : > { %v2930_v6 = vpop.f32.mrb[3].mxu1  ;;  %v2942_v8 = vmax.f32 %v3759_v5, 0.0 }
 0x44a   : > { %v2941_v7 = vmax.f32 %v2930_v6, 0.0 }
 0x44c   : > { %3762 = vmatprep.mubr.msk.f32.mxu0 %vm1990_vm3, %v2941_v7 }
 0x44d   : > { %3763 = vmatmul.mubr.msk.f32.vlgmr.msra.gmra.mrb[6].mxu0 %vm1990_vm3, %v2942_v8 }
 0x520   : > { %v3764_v9 = vpop.f32.mrb[6].mxu0 }
 0x521   : > { %v3028_v10 = vadd.f32 %v3764_v9, %v4633_v51  ;;  %v3018_v11 = vpop.f32.mrb[7].mxu0 }
 0x522   : > { %v3027_v12 = vadd.f32 %v3018_v11, %v4636_v53 }
 0x523   : > { %3030 = vst.msk [vmem:[#allocation3 + $0x8] sm:$0xff] %vm263_vm2, %v3028_v10 }
 0x524   : > { %3029 = vst.msk [vmem:[#allocation3] sm:$0xff] %vm263_vm2, %v3027_v12 }
 0x52a   : > { %v3032_v13 = vld [vmem:[#allocation3 + $0x8] sm:$0xff] }
 0x52b   : > { %v3031_v14 = vld [vmem:[#allocation3] sm:$0xff]  ;;  %v3034_v16 = vmax.f32 %v3032_v13, 0.0 }
 0x52c   : > { %v3033_v17 = vmax.f32 %v3031_v14, 0.0 }
 0x52d   : > { %v3038_v19 = vcombine.high %v3034_v16, %v3034_v16  ;;  %3043 = vst.msk [vmem:[%s217_s17 + $0x8] sm:$0xf] %vm235_vm1, %v3034_v16 }
 0x52e   : > { %v3037_v20 = vcombine.high %v3033_v17, %v3033_v17  ;;  %3041 = vst.msk [vmem:[%s217_s17] sm:$0xf] %vm235_vm1, %v3033_v17 }
 0x52f   : > { %3044 = vst.msk [vmem:[%s217_s17 + $0xc] sm:$0xf] %vm235_vm1, %v3038_v19 }
 0x530   : > { %3042 = vst.msk [vmem:[%s217_s17 + $0x4] sm:$0xf] %vm235_vm1, %v3037_v20 }
 0x531   : > { %4138 = shalt.err (!%p4135_p3)
}
 0x532   : > { %s4139_s10 = scalar_lea.hbm %s4704_s30, 256  ;;  %s4143_s13 = scalar_lea.hbm %s4757_s5, 512 }
 0x533   : > { %p4140_p4 = scmp.ne.s32.totalorder %s4704_s30, %s4139_s10  ;;  %p4144_p9 = scmp.lt.u32.totalorder %s4704_s30, %s4757_s5 }
 0x534   : > { %p4145_p10 = scmp.lt.u32.totalorder %s4143_s13, %s4139_s10  ;;  %p4147_p12 = scmp.lt.u32.totalorder %s4139_s10, %s4704_s30 }
 0x535   : > { %p4141_p7 = pnand %p4140_p4, %p4261_p5 }
 0x536   : > { %p4146_p11 = por %p4145_p10, %p4144_p9 }
 0x537   : > { %p4142_p8 = pneg %p4141_p7 }
 0x538   : > { %p4148_p13 = por %p4147_p12, %p4146_p11 }
 0x53a   : > { %p4149_p0 = pnand %p4148_p13, %p4142_p8 }
 0x53c   : > { %4152 = shalt.err (!%p4149_p0)
}
 0x53d   : > { %s4191_s16 = smov 64   ;;  %s4192_s17 = smov 4  }
 0x53e   : > { %4029 = dma.vmem_to_hbm [thread:$0]  (%p4261_p5), %s4706_s23, 256, %s4704_s30, %s4711_s22, %s4191_s16, %s4191_s16, %s4192_s17  }
 0x53f PF: > { %p4035_p1 = scmp.ge.s32.totalorder %s4187_s21, 2  ;;  %s3074_s25 = sand.u32 1, %s4175_s18  }
 0x540   : > { %s3075_s26 = scalar_lea.sflag [#allocation5], %s3074_s25 }
 0x541   : > { %p4032_p2 = pnand %p4035_p1, %p4265_p6 }
 0x543   : > { %4170 = dma.done.wait (!%p4032_p2), %s3075_s26, 256  }
 0x544   : > { %4172 = vsyncadd (!%p4032_p2), %s3075_s26, 4294967040  ;;  %p15_p3 = scmp.ge.s32.totalorder %s4248_s24, 4   ;;  %s4760_s18 = smov %s4179_s19 }
 0x545   : > { %s4761_s19 = smov %s4183_s20  ;;  %s4762_s20 = smov %s4259_s27 }
 0x546   : > { %s4763_s21 = smov %s4248_s24  ;;  %17 = sbr.rel (!%p15_p3) target bundleno = 3 (0x3), region = 93 }
 0x54d   :  { %3080 = vsyncpa [#allocation5], 1 }
 0x54e   :  { %3082 = vsyncpa [#allocation5 + $0x1], 1 }

</bundles_post_ra>
